<compile_context>
chip_gen: v7x
topology: tpu7x:2x2x1
jax: 0.10.0
libtpu: 0.0.40
codegen_flags: <defaults>
</compile_context>

<pallas_src>
import jax
import jax.numpy as jnp
from jax.experimental import pallas as pl
from jax.experimental.pallas import tpu as pltpu


LATENT_DIM = 64
HIDDEN = (128, 256, 512, 1024)
BN_EPS = 0.8          # nn.BatchNorm1d(out_feat, 0.8): second positional arg is eps
LEAKY_SLOPE = 0.2


def _leaky_relu(x, slope=LEAKY_SLOPE):
    return jnp.where(x > 0, x, slope * x)


def _round_up(x, m):
    return ((x + m - 1) // m) * m


def generator_kernel(z_ref,
                     w1_ref, b1_ref,
                     w2_ref, b2_ref,
                     w3_ref, b3_ref,
                     w4_ref, b4_ref,
                     w5_ref, b5_ref,
                     out_ref):
    # ---- Block 1: Linear(latent, 128) + LeakyReLU (no BatchNorm) ----
    h = jnp.dot(z_ref[...], w1_ref[...],
                preferred_element_type=jnp.float32) + b1_ref[...]
    h = _leaky_relu(h).astype(jnp.bfloat16)                   # bf16 running activation

    # ---- Blocks 2-4: Linear with BN(eval) folded into (w, b), then LeakyReLU ----
    def block(h_bf16, w_ref, b_ref):
        y = jnp.dot(h_bf16, w_ref[...],
                    preferred_element_type=jnp.float32) + b_ref[...]
        return _leaky_relu(y).astype(jnp.bfloat16)

    h = block(h, w2_ref, b2_ref)
    h = block(h, w3_ref, b3_ref)
    h = block(h, w4_ref, b4_ref)

    # ---- Final: Linear(1024, prod(img_shape)) + Tanh (lane-dense output) ----
    y = jnp.dot(h, w5_ref[...],
                preferred_element_type=jnp.float32) + b5_ref[...]
    out_ref[...] = jnp.tanh(y)


def generator_forward(z, params, img_shape, *, tile_b=512):
    """z: (B, latent_dim) f32.  Returns (B, *img_shape) f32 in [-1, 1]."""
    (w1, b1), (w2, b2), (w3, b3), (w4, b4), (w5, b5) = params
    B, latent = z.shape
    out_dim = w5.shape[1]

    # Batch tile: multiple of 16 (bf16 sublane packing).  For large batches round
    # to a multiple of 256 (MXU M depth), cap at tile_b (<=512 keeps the working
    # set inside v7x's 64 MiB VMEM) and keep >=2 grid steps so both v7x TCs work.
    b16 = _round_up(B, 16)
    if b16 <= tile_b:
        tb = b16
    else:
        tb = min(tile_b, max(256, _round_up(pl.cdiv(b16, 2), 256)))
    grid_b = pl.cdiv(b16, tb)
    b_pad = grid_b * tb
    if b_pad != B:
        z = jnp.pad(z, ((0, b_pad - B), (0, 0)))
    z = z.astype(jnp.bfloat16)                                # bf16 into the MXU

    batch_map = lambda i: (i, 0)
    const_map = lambda i: (0, 0)                              # weights stay VMEM-resident
    wspec = lambda a: pl.BlockSpec(a.shape, const_map)

    weight_args = (w1, b1, w2, b2, w3, b3, w4, b4, w5, b5)

    out = pl.pallas_call(
        generator_kernel,
        out_shape=jax.ShapeDtypeStruct((b_pad, out_dim), jnp.float32),
        grid=(grid_b,),
        in_specs=[pl.BlockSpec((tb, latent), batch_map)] + [wspec(a) for a in weight_args],
        out_specs=pl.BlockSpec((tb, out_dim), batch_map),
        compiler_params=pltpu.CompilerParams(
            dimension_semantics=("parallel",),
            vmem_limit_bytes=40 << 20,
        ),
    )(z, *weight_args)

    return out[:B].reshape(B, *img_shape)


def init_params(key, latent_dim, out_dim):
    """Deterministic synthetic parameters.  BatchNorm (eval mode, eps=0.8) and the
    Linear bias are folded into a single affine per layer, in f32, then the weight
    is cast to bf16 exactly once (the MXU input dtype)."""
    ks = iter(jax.random.split(key, 24))
    dims = (latent_dim,) + HIDDEN                              # (64, 128, 256, 512, 1024)

    def linear(fan_in, fan_out):
        bound = 1.0 / float(fan_in) ** 0.5
        w = jax.random.uniform(next(ks), (fan_in, fan_out), jnp.float32, -bound, bound)
        b = jax.random.uniform(next(ks), (1, fan_out), jnp.float32, -bound, bound)
        return w, b

    def bn(n):
        gamma = jax.random.uniform(next(ks), (1, n), jnp.float32, 0.5, 1.5)
        beta = 0.1 * jax.random.normal(next(ks), (1, n), jnp.float32)
        mean = 0.1 * jax.random.normal(next(ks), (1, n), jnp.float32)
        var = jax.random.uniform(next(ks), (1, n), jnp.float32, 0.5, 1.5)
        scale = gamma / jnp.sqrt(var + BN_EPS)                 # eval-mode BN
        shift = beta - mean * scale
        return scale, shift

    def folded(fan_in, fan_out):
        w, b = linear(fan_in, fan_out)
        s, t = bn(fan_out)
        w_f = (w * s).astype(jnp.bfloat16)                     # fold in f32, cast once
        b_f = b * s + t                                        # keep bias/shift in f32
        return w_f, b_f

    w1, b1 = linear(dims[0], dims[1])
    w2, b2 = folded(dims[1], dims[2])
    w3, b3 = folded(dims[2], dims[3])
    w4, b4 = folded(dims[3], dims[4])
    w5, b5 = linear(dims[4], out_dim)

    return ((w1.astype(jnp.bfloat16), b1),
            (w2, b2), (w3, b3), (w4, b4),
            (w5.astype(jnp.bfloat16), b5))


def reference_forward(z, params, img_shape):
    """Pure-JAX reference with identical numerics (bf16 dot inputs / activations,
    f32 accumulation, folded eval-mode BatchNorm)."""
    (w1, b1), (w2, b2), (w3, b3), (w4, b4), (w5, b5) = params
    bf = jnp.bfloat16

    h = jnp.dot(z.astype(bf), w1, preferred_element_type=jnp.float32) + b1
    h = _leaky_relu(h).astype(bf)

    def block(h, w, b):
        y = jnp.dot(h, w, preferred_element_type=jnp.float32) + b
        return _leaky_relu(y).astype(bf)

    h = block(h, w2, b2)
    h = block(h, w3, b3)
    h = block(h, w4, b4)
    y = jnp.tanh(jnp.dot(h, w5, preferred_element_type=jnp.float32) + b5)
    return y.reshape(z.shape[0], *img_shape)


if __name__ == "__main__":
    key = jax.random.PRNGKey(0)
    k_z, k_p = jax.random.split(key)

    # Small shapes consistent with the module: img_shape = (channels, img_size, img_size)
    B, C, H, W = 2, 4, 16, 16
    img_shape = (C, H, W)
    out_dim = C * H * W                                        # 1024

    z = jax.random.normal(k_z, (B, LATENT_DIM), dtype=jnp.float32)
    params = init_params(k_p, LATENT_DIM, out_dim)

    img = generator_forward(z, params, img_shape)
    img = jax.block_until_ready(img)

    ref = reference_forward(z, params, img_shape)
    assert img.shape == (B, C, H, W)
    assert jnp.allclose(img, ref, atol=1e-2, rtol=1e-2), float(jnp.max(jnp.abs(img - ref)))

    print("KERNEL_OK")
</pallas_src>

<mosaic_0001>
module attributes {stable_mosaic.version = 11 : i64} {
  func.func @generator_kernel(%arg0: i32, %arg1: memref<16x64xbf16, #tpu.memory_space<vmem>>, %arg2: memref<64x128xbf16, #tpu.memory_space<vmem>>, %arg3: memref<1x128xf32, #tpu.memory_space<vmem>>, %arg4: memref<128x256xbf16, #tpu.memory_space<vmem>>, %arg5: memref<1x256xf32, #tpu.memory_space<vmem>>, %arg6: memref<256x512xbf16, #tpu.memory_space<vmem>>, %arg7: memref<1x512xf32, #tpu.memory_space<vmem>>, %arg8: memref<512x1024xbf16, #tpu.memory_space<vmem>>, %arg9: memref<1x1024xf32, #tpu.memory_space<vmem>>, %arg10: memref<1024x1024xbf16, #tpu.memory_space<vmem>>, %arg11: memref<1x1024xf32, #tpu.memory_space<vmem>>, %arg12: memref<16x1024xf32, #tpu.memory_space<vmem>>) attributes {dimension_semantics = [#tpu.dimension_semantics<parallel>], iteration_bounds = array<i64: 1>, scalar_prefetch = 0 : i64, scratch_operands = 0 : i64, tpu.core_type = #tpu.core_type<tc>, window_params = [{transform_indices = @transform_0, window_bounds = array<i64: 16, 64>}, {pipeline_mode = #tpu.pipeline_mode<synchronous>, transform_indices = @transform_1, window_bounds = array<i64: 64, 128>}, {pipeline_mode = #tpu.pipeline_mode<synchronous>, transform_indices = @transform_2, window_bounds = array<i64: 1, 128>}, {pipeline_mode = #tpu.pipeline_mode<synchronous>, transform_indices = @transform_3, window_bounds = array<i64: 128, 256>}, {pipeline_mode = #tpu.pipeline_mode<synchronous>, transform_indices = @transform_4, window_bounds = array<i64: 1, 256>}, {pipeline_mode = #tpu.pipeline_mode<synchronous>, transform_indices = @transform_5, window_bounds = array<i64: 256, 512>}, {pipeline_mode = #tpu.pipeline_mode<synchronous>, transform_indices = @transform_6, window_bounds = array<i64: 1, 512>}, {pipeline_mode = #tpu.pipeline_mode<synchronous>, transform_indices = @transform_7, window_bounds = array<i64: 512, 1024>}, {pipeline_mode = #tpu.pipeline_mode<synchronous>, transform_indices = @transform_8, window_bounds = array<i64: 1, 1024>}, {pipeline_mode = #tpu.pipeline_mode<synchronous>, transform_indices = @transform_9, window_bounds = array<i64: 1024, 1024>}, {pipeline_mode = #tpu.pipeline_mode<synchronous>, transform_indices = @transform_10, window_bounds = array<i64: 1, 1024>}, {transform_indices = @transform_11, window_bounds = array<i64: 16, 1024>}]} {
    %c0 = arith.constant 0 : index
    %c0_0 = arith.constant 0 : index
    %0 = vector.load %arg1[%c0, %c0_0] : memref<16x64xbf16, #tpu.memory_space<vmem>>, vector<16x64xbf16>
    %c0_1 = arith.constant 0 : index
    %c0_2 = arith.constant 0 : index
    %1 = vector.load %arg2[%c0_1, %c0_2] : memref<64x128xbf16, #tpu.memory_space<vmem>>, vector<64x128xbf16>
    %cst = arith.constant dense<0.000000e+00> : vector<16x128xf32>
    %2 = tpu.matmul %0, %1, %cst {dimension_numbers = #tpu.dot_dimension_numbers<[1], [0], [0], [1], [0, 0, 1, 1], [], []>} : vector<16x64xbf16>, vector<64x128xbf16>, vector<16x128xf32> -> vector<16x128xf32>
    %c0_3 = arith.constant 0 : index
    %c0_4 = arith.constant 0 : index
    %3 = vector.load %arg3[%c0_3, %c0_4] : memref<1x128xf32, #tpu.memory_space<vmem>>, vector<1x128xf32>
    %4 = vector.broadcast %3 : vector<1x128xf32> to vector<16x128xf32>
    %5 = arith.addf %2, %4 : vector<16x128xf32>
    %cst_5 = arith.constant 0.000000e+00 : f32
    %6 = vector.broadcast %cst_5 : f32 to vector<16x128xf32>
    %7 = arith.cmpf ogt, %5, %6 : vector<16x128xf32>
    %cst_6 = arith.constant 2.000000e-01 : f32
    %8 = vector.broadcast %cst_6 : f32 to vector<16x128xf32>
    %9 = arith.mulf %8, %5 : vector<16x128xf32>
    %10 = arith.select %7, %5, %9 : vector<16x128xi1>, vector<16x128xf32>
    %11 = arith.truncf %10 : vector<16x128xf32> to vector<16x128xbf16>
    %c0_7 = arith.constant 0 : index
    %c0_8 = arith.constant 0 : index
    %12 = vector.load %arg4[%c0_7, %c0_8] : memref<128x256xbf16, #tpu.memory_space<vmem>>, vector<128x256xbf16>
    %cst_9 = arith.constant dense<0.000000e+00> : vector<16x256xf32>
    %13 = tpu.matmul %11, %12, %cst_9 {dimension_numbers = #tpu.dot_dimension_numbers<[1], [0], [0], [1], [0, 0, 1, 1], [], []>} : vector<16x128xbf16>, vector<128x256xbf16>, vector<16x256xf32> -> vector<16x256xf32>
    %c0_10 = arith.constant 0 : index
    %c0_11 = arith.constant 0 : index
    %14 = vector.load %arg5[%c0_10, %c0_11] : memref<1x256xf32, #tpu.memory_space<vmem>>, vector<1x256xf32>
    %15 = vector.broadcast %14 : vector<1x256xf32> to vector<16x256xf32>
    %16 = arith.addf %13, %15 : vector<16x256xf32>
    %cst_12 = arith.constant 0.000000e+00 : f32
    %17 = vector.broadcast %cst_12 : f32 to vector<16x256xf32>
    %18 = arith.cmpf ogt, %16, %17 : vector<16x256xf32>
    %cst_13 = arith.constant 2.000000e-01 : f32
    %19 = vector.broadcast %cst_13 : f32 to vector<16x256xf32>
    %20 = arith.mulf %19, %16 : vector<16x256xf32>
    %21 = arith.select %18, %16, %20 : vector<16x256xi1>, vector<16x256xf32>
    %22 = arith.truncf %21 : vector<16x256xf32> to vector<16x256xbf16>
    %c0_14 = arith.constant 0 : index
    %c0_15 = arith.constant 0 : index
    %23 = vector.load %arg6[%c0_14, %c0_15] : memref<256x512xbf16, #tpu.memory_space<vmem>>, vector<256x512xbf16>
    %cst_16 = arith.constant dense<0.000000e+00> : vector<16x512xf32>
    %24 = tpu.matmul %22, %23, %cst_16 {dimension_numbers = #tpu.dot_dimension_numbers<[1], [0], [0], [1], [0, 0, 1, 1], [], []>} : vector<16x256xbf16>, vector<256x512xbf16>, vector<16x512xf32> -> vector<16x512xf32>
    %c0_17 = arith.constant 0 : index
    %c0_18 = arith.constant 0 : index
    %25 = vector.load %arg7[%c0_17, %c0_18] : memref<1x512xf32, #tpu.memory_space<vmem>>, vector<1x512xf32>
    %26 = vector.broadcast %25 : vector<1x512xf32> to vector<16x512xf32>
    %27 = arith.addf %24, %26 : vector<16x512xf32>
    %cst_19 = arith.constant 0.000000e+00 : f32
    %28 = vector.broadcast %cst_19 : f32 to vector<16x512xf32>
    %29 = arith.cmpf ogt, %27, %28 : vector<16x512xf32>
    %cst_20 = arith.constant 2.000000e-01 : f32
    %30 = vector.broadcast %cst_20 : f32 to vector<16x512xf32>
    %31 = arith.mulf %30, %27 : vector<16x512xf32>
    %32 = arith.select %29, %27, %31 : vector<16x512xi1>, vector<16x512xf32>
    %33 = arith.truncf %32 : vector<16x512xf32> to vector<16x512xbf16>
    %c0_21 = arith.constant 0 : index
    %c0_22 = arith.constant 0 : index
    %34 = vector.load %arg8[%c0_21, %c0_22] : memref<512x1024xbf16, #tpu.memory_space<vmem>>, vector<512x1024xbf16>
    %cst_23 = arith.constant dense<0.000000e+00> : vector<16x1024xf32>
    %35 = tpu.matmul %33, %34, %cst_23 {dimension_numbers = #tpu.dot_dimension_numbers<[1], [0], [0], [1], [0, 0, 1, 1], [], []>} : vector<16x512xbf16>, vector<512x1024xbf16>, vector<16x1024xf32> -> vector<16x1024xf32>
    %c0_24 = arith.constant 0 : index
    %c0_25 = arith.constant 0 : index
    %36 = vector.load %arg9[%c0_24, %c0_25] : memref<1x1024xf32, #tpu.memory_space<vmem>>, vector<1x1024xf32>
    %37 = vector.broadcast %36 : vector<1x1024xf32> to vector<16x1024xf32>
    %38 = arith.addf %35, %37 : vector<16x1024xf32>
    %cst_26 = arith.constant 0.000000e+00 : f32
    %39 = vector.broadcast %cst_26 : f32 to vector<16x1024xf32>
    %40 = arith.cmpf ogt, %38, %39 : vector<16x1024xf32>
    %cst_27 = arith.constant 2.000000e-01 : f32
    %41 = vector.broadcast %cst_27 : f32 to vector<16x1024xf32>
    %42 = arith.mulf %41, %38 : vector<16x1024xf32>
    %43 = arith.select %40, %38, %42 : vector<16x1024xi1>, vector<16x1024xf32>
    %44 = arith.truncf %43 : vector<16x1024xf32> to vector<16x1024xbf16>
    %c0_28 = arith.constant 0 : index
    %c0_29 = arith.constant 0 : index
    %45 = vector.load %arg10[%c0_28, %c0_29] : memref<1024x1024xbf16, #tpu.memory_space<vmem>>, vector<1024x1024xbf16>
    %cst_30 = arith.constant dense<0.000000e+00> : vector<16x1024xf32>
    %46 = tpu.matmul %44, %45, %cst_30 {dimension_numbers = #tpu.dot_dimension_numbers<[1], [0], [0], [1], [0, 0, 1, 1], [], []>} : vector<16x1024xbf16>, vector<1024x1024xbf16>, vector<16x1024xf32> -> vector<16x1024xf32>
    %c0_31 = arith.constant 0 : index
    %c0_32 = arith.constant 0 : index
    %47 = vector.load %arg11[%c0_31, %c0_32] : memref<1x1024xf32, #tpu.memory_space<vmem>>, vector<1x1024xf32>
    %48 = vector.broadcast %47 : vector<1x1024xf32> to vector<16x1024xf32>
    %49 = arith.addf %46, %48 : vector<16x1024xf32>
    %50 = math.tanh %49 : vector<16x1024xf32>
    %c0_33 = arith.constant 0 : index
    %c0_34 = arith.constant 0 : index
    %51 = vector.load %arg12[%c0_33, %c0_34] : memref<16x1024xf32, #tpu.memory_space<vmem>>, vector<16x1024xf32>
    tpu.vector_store %arg12[%c0_33, %c0_34], %50 {strides = array<i32>} : memref<16x1024xf32, #tpu.memory_space<vmem>>, vector<16x1024xf32>,
    return
  }
  func.func @transform_0(%arg0: i32) -> (i32, i32) {
    %c0_i32 = arith.constant 0 : i32
    %c0_i32_0 = arith.constant 0 : i32
    return %arg0, %c0_i32 : i32, i32
  }
  func.func @transform_1(%arg0: i32) -> (i32, i32) {
    %c0_i32 = arith.constant 0 : i32
    %c0_i32_0 = arith.constant 0 : i32
    %c0_i32_1 = arith.constant 0 : i32
    return %c0_i32, %c0_i32_0 : i32, i32
  }
  func.func @transform_2(%arg0: i32) -> (i32, i32) {
    %c0_i32 = arith.constant 0 : i32
    %c0_i32_0 = arith.constant 0 : i32
    %c0_i32_1 = arith.constant 0 : i32
    return %c0_i32, %c0_i32_0 : i32, i32
  }
  func.func @transform_3(%arg0: i32) -> (i32, i32) {
    %c0_i32 = arith.constant 0 : i32
    %c0_i32_0 = arith.constant 0 : i32
    %c0_i32_1 = arith.constant 0 : i32
    return %c0_i32, %c0_i32_0 : i32, i32
  }
  func.func @transform_4(%arg0: i32) -> (i32, i32) {
    %c0_i32 = arith.constant 0 : i32
    %c0_i32_0 = arith.constant 0 : i32
    %c0_i32_1 = arith.constant 0 : i32
    return %c0_i32, %c0_i32_0 : i32, i32
  }
  func.func @transform_5(%arg0: i32) -> (i32, i32) {
    %c0_i32 = arith.constant 0 : i32
    %c0_i32_0 = arith.constant 0 : i32
    %c0_i32_1 = arith.constant 0 : i32
    return %c0_i32, %c0_i32_0 : i32, i32
  }
  func.func @transform_6(%arg0: i32) -> (i32, i32) {
    %c0_i32 = arith.constant 0 : i32
    %c0_i32_0 = arith.constant 0 : i32
    %c0_i32_1 = arith.constant 0 : i32
    return %c0_i32, %c0_i32_0 : i32, i32
  }
  func.func @transform_7(%arg0: i32) -> (i32, i32) {
    %c0_i32 = arith.constant 0 : i32
    %c0_i32_0 = arith.constant 0 : i32
    %c0_i32_1 = arith.constant 0 : i32
    return %c0_i32, %c0_i32_0 : i32, i32
  }
  func.func @transform_8(%arg0: i32) -> (i32, i32) {
    %c0_i32 = arith.constant 0 : i32
    %c0_i32_0 = arith.constant 0 : i32
    %c0_i32_1 = arith.constant 0 : i32
    return %c0_i32, %c0_i32_0 : i32, i32
  }
  func.func @transform_9(%arg0: i32) -> (i32, i32) {
    %c0_i32 = arith.constant 0 : i32
    %c0_i32_0 = arith.constant 0 : i32
    %c0_i32_1 = arith.constant 0 : i32
    return %c0_i32, %c0_i32_0 : i32, i32
  }
  func.func @transform_10(%arg0: i32) -> (i32, i32) {
    %c0_i32 = arith.constant 0 : i32
    %c0_i32_0 = arith.constant 0 : i32
    %c0_i32_1 = arith.constant 0 : i32
    return %c0_i32, %c0_i32_0 : i32, i32
  }
  func.func @transform_11(%arg0: i32) -> (i32, i32) {
    %c0_i32 = arith.constant 0 : i32
    %c0_i32_0 = arith.constant 0 : i32
    return %arg0, %c0_i32 : i32, i32
  }
}

</mosaic_0001>

<bundles_post_ra>
// kernel: tpu_custom_call.1
= control target key start
LH: loop header
LB: loop body
LE: loop exit
PB: predicated region body
PF: predicated region fallthrough
CT: control target
= control target key end

     0   :  { %16 = vsyncpa [#allocation3], 0  ;;  %s8694_s0 = inlined_call_operand.hbm [shape: bf16[16,64], index: 0, kind: input, shape index: {}]   ;;  %s8695_s1 = inlined_call_operand.hbm [shape: bf16[64,128], index: 1, kind: input, shape index: {}]   ;;  %s8696_s2 = inlined_call_operand.hbm [shape: f32[1,128], index: 2, kind: input, shape index: {}]   ;;  %s8697_s3 = inlined_call_operand.hbm [shape: bf16[128,256], index: 3, kind: input, shape index: {}]   ;;  %s8698_s4 = inlined_call_operand.hbm [shape: f32[1,256], index: 4, kind: input, shape index: {}]   ;;  %s8699_s5 = inlined_call_operand.hbm [shape: bf16[256,512], index: 5, kind: input, shape index: {}]   ;;  %s8700_s6 = inlined_call_operand.hbm [shape: f32[1,512], index: 6, kind: input, shape index: {}]   ;;  %s8701_s7 = inlined_call_operand.hbm [shape: bf16[512,1024], index: 7, kind: input, shape index: {}]   ;;  %s8702_s8 = inlined_call_operand.hbm [shape: f32[1,1024], index: 8, kind: input, shape index: {}]   ;;  %s8703_s9 = inlined_call_operand.hbm [shape: bf16[1024,1024], index: 9, kind: input, shape index: {}]   ;;  %s8704_s10 = inlined_call_operand.hbm [shape: f32[1,1024], index: 10, kind: input, shape index: {}]   ;;  %s8705_s11 = inlined_call_operand.hbm [shape: f32[16,1024], index: 11, kind: output, shape index: {}]  }
   0x1   :  { %17 = vsyncpa [#allocation6], 0 }
   0x2   :  { %18 = vsyncpa [#allocation9], 0 }
   0x3   :  { %19 = vsyncpa [#allocation12], 0 }
   0x4   :  { %20 = vsyncpa [#allocation15], 0 }
   0x5   :  { %21 = vsyncpa [#allocation18], 0 }
   0x6   :  { %22 = vsyncpa [#allocation4], 0  ;;  %s8223_s17 = smov [#allocation5]   ;;  %s8224_s19 = smov [#allocation8]  }
   0x7   :  { %s40_s18 = sshll.u32 %s8223_s17, 4  ;;  %s62_s20 = sshll.u32 %s8224_s19, 4  ;;  %s41_s18 = int_to_ptr.vmem [resolvable:$true] %s40_s18  ;;  %s8307_s20 = int_to_ptr.vmem [resolvable:$true] %s62_s20 }
   0x8   :  { %s7945_s23 = scalar_lea.hbm %s8695_s1, 512 }
   0x9   :  { %p7946_p0 = scmp.ne.s32.totalorder %s8695_s1, %s7945_s23  ;;  %p7949_p1 = scmp.lt.u32.totalorder %s7945_s23, %s8695_s1 }
   0xb   :  { %p7951_p2 = pnand %p7949_p1, %p7946_p0 }
   0xd   :  { %7954 = shalt.err (!%p7951_p2)
}
   0xe   :  { %s7955_s28 = scalar_lea.vmem %s41_s18, 512  ;;  %p7960_p4 = scmp.lt.s32.totalorder %s41_s18, %s41_s18 }
   0xf   :  { %p7956_p3 = scmp.ne.s32.totalorder %s41_s18, %s7955_s28  ;;  %p7961_p5 = scmp.lt.s32.totalorder %s7955_s28, %s7955_s28 }
  0x11   :  { %p7962_p6 = por %p7961_p5, %p7960_p4 }
  0x13   :  { %p7963_p7 = pnand %p7962_p6, %p7956_p3 }
  0x15   :  { %7966 = shalt.err (!%p7963_p7)
}
  0x16   :  { %s8225_s29 = smov 64   ;;  %s8226_s30 = smov 4  }
  0x17   :  { %46 = dma.hbm_to_vmem [thread:$0]  %s8695_s1, 512, %s41_s18, [#allocation6], %s8225_s29, %s8225_s29, %s8226_s30  }
  0x18   :  { %s7967_s16 = scalar_lea.hbm %s8697_s3, 2048 }
  0x19   :  { %p7968_p8 = scmp.ne.s32.totalorder %s8697_s3, %s7967_s16  ;;  %p7971_p9 = scmp.lt.u32.totalorder %s7967_s16, %s8697_s3 }
  0x1b   :  { %p7973_p10 = pnand %p7971_p9, %p7968_p8 }
  0x1d   :  { %7976 = shalt.err (!%p7973_p10)
}
  0x1e   :  { %s7977_s23 = scalar_lea.vmem %s8307_s20, 2048  ;;  %p7982_p12 = scmp.lt.s32.totalorder %s8307_s20, %s8307_s20 }
  0x1f   :  { %p7978_p11 = scmp.ne.s32.totalorder %s8307_s20, %s7977_s23  ;;  %p7983_p13 = scmp.lt.s32.totalorder %s7977_s23, %s7977_s23 }
  0x21   :  { %p7984_p0 = por %p7983_p13, %p7982_p12 }
  0x23   :  { %p7985_p1 = pnand %p7984_p0, %p7978_p11 }
  0x25   :  { %7988 = shalt.err (!%p7985_p1)
}
  0x26   :  { %s8227_s1 = smov 128   ;;  %s8228_s18 = smov 8  }
  0x27   :  { %68 = dma.hbm_to_vmem [thread:$0]  %s8697_s3, 2048, %s8307_s20, [#allocation9], %s8227_s1, %s8227_s1, %s8228_s18  }
  0x28   :  { %s8229_s26 = smov [#allocation11]   ;;  %s7989_s13 = scalar_lea.hbm %s8699_s5, 8192 }
  0x29   :  { %s84_s27 = sshll.u32 %s8229_s26, 4  ;;  %p7990_p2 = scmp.ne.s32.totalorder %s8699_s5, %s7989_s13  ;;  %s85_s27 = int_to_ptr.vmem [resolvable:$true] %s84_s27 }
  0x2a   :  { %p7993_p3 = scmp.lt.u32.totalorder %s7989_s13, %s8699_s5 }
  0x2c   :  { %p7995_p4 = pnand %p7993_p3, %p7990_p2 }
  0x2e   :  { %7998 = shalt.err (!%p7995_p4)
}
  0x2f   :  { %s7999_s19 = scalar_lea.vmem %s85_s27, 8192  ;;  %p8004_p6 = scmp.lt.s32.totalorder %s85_s27, %s85_s27 }
  0x30   :  { %p8000_p5 = scmp.ne.s32.totalorder %s85_s27, %s7999_s19  ;;  %p8005_p7 = scmp.lt.s32.totalorder %s7999_s19, %s7999_s19 }
  0x32   :  { %p8006_p8 = por %p8005_p7, %p8004_p6 }
  0x34   :  { %p8007_p9 = pnand %p8006_p8, %p8000_p5 }
  0x36   :  { %8010 = shalt.err (!%p8007_p9)
}
  0x37   :  { %s8230_s3 = smov 256   ;;  %s8231_s20 = smov 16  }
  0x38   :  { %90 = dma.hbm_to_vmem [thread:$0]  %s8699_s5, 8192, %s85_s27, [#allocation12], %s8230_s3, %s8230_s3, %s8231_s20  }
  0x39   :  { %s8232_s23 = smov [#allocation14]   ;;  %s8011_s25 = scalar_lea.hbm %s8701_s7, 32768 }
  0x3a   :  { %s106_s1 = sshll.u32 %s8232_s23, 4  ;;  %p8012_p10 = scmp.ne.s32.totalorder %s8701_s7, %s8011_s25  ;;  %s107_s1 = int_to_ptr.vmem [resolvable:$true] %s106_s1 }
  0x3b   :  { %p8015_p11 = scmp.lt.u32.totalorder %s8011_s25, %s8701_s7 }
  0x3d   :  { %p8017_p12 = pnand %p8015_p11, %p8012_p10 }
  0x3f   :  { %8020 = shalt.err (!%p8017_p12)
}
  0x40   :  { %s8021_s14 = scalar_lea.vmem %s107_s1, 32768  ;;  %p8026_p0 = scmp.lt.s32.totalorder %s107_s1, %s107_s1 }
  0x41   :  { %p8022_p13 = scmp.ne.s32.totalorder %s107_s1, %s8021_s14  ;;  %p8027_p1 = scmp.lt.s32.totalorder %s8021_s14, %s8021_s14 }
  0x43   :  { %p8028_p2 = por %p8027_p1, %p8026_p0 }
  0x45   :  { %p8029_p3 = pnand %p8028_p2, %p8022_p13 }
  0x47   :  { %8032 = shalt.err (!%p8029_p3)
}
  0x48   :  { %s8233_s5 = smov 512   ;;  %s8234_s27 = smov 32  }
  0x49   :  { %112 = dma.hbm_to_vmem [thread:$0]  %s8701_s7, 32768, %s107_s1, [#allocation15], %s8233_s5, %s8233_s5, %s8234_s27  }
  0x4a   :  { %s8235_s17 = smov [#allocation17]   ;;  %s8236_s3 = smov [#allocation2]  }
  0x4b   :  { %s128_s19 = sshll.u32 %s8235_s17, 4  ;;  %s28_s20 = sshll.u32 %s8236_s3, 4  ;;  %s129_s19 = int_to_ptr.vmem [resolvable:$true] %s128_s19  ;;  %s8365_s20 = int_to_ptr.vmem [resolvable:$true] %s28_s20 }
  0x4c   :  { %s8033_s23 = scalar_lea.hbm %s8703_s9, 65536 }
  0x4d   :  { %p8034_p4 = scmp.ne.s32.totalorder %s8703_s9, %s8033_s23  ;;  %p8037_p5 = scmp.lt.u32.totalorder %s8033_s23, %s8703_s9 }
  0x4f   :  { %p8039_p6 = pnand %p8037_p5, %p8034_p4 }
  0x51   :  { %8042 = shalt.err (!%p8039_p6)
}
  0x52   :  { %s8043_s7 = scalar_lea.vmem %s129_s19, 65536  ;;  %p8048_p8 = scmp.lt.s32.totalorder %s129_s19, %s129_s19 }
  0x53   :  { %p8044_p7 = scmp.ne.s32.totalorder %s129_s19, %s8043_s7  ;;  %p8049_p9 = scmp.lt.s32.totalorder %s8043_s7, %s8043_s7 }
  0x55   :  { %p8050_p10 = por %p8049_p9, %p8048_p8 }
  0x57   :  { %p8051_p11 = pnand %p8050_p10, %p8044_p7 }
  0x59   :  { %8054 = shalt.err (!%p8051_p11)
}
  0x5a   :  { %134 = dma.hbm_to_vmem [thread:$0]  %s8703_s9, 65536, %s129_s19, [#allocation18], %s8233_s5, %s8233_s5, %s8234_s27  }
  0x5b   :  { %s8055_s14 = scalar_lea.hbm %s8694_s0, 128 }
  0x5c   :  { %p8056_p12 = scmp.ne.s32.totalorder %s8694_s0, %s8055_s14  ;;  %p8059_p13 = scmp.lt.u32.totalorder %s8055_s14, %s8694_s0 }
  0x5e   :  { %p8061_p0 = pnand %p8059_p13, %p8056_p12 }
  0x60   :  { %8064 = shalt.err (!%p8061_p0)
}
  0x61   :  { %s8065_s21 = scalar_lea.vmem %s8365_s20, 128  ;;  %p8070_p2 = scmp.lt.s32.totalorder %s8365_s20, %s8365_s20 }
  0x62   :  { %p8066_p1 = scmp.ne.s32.totalorder %s8365_s20, %s8065_s21  ;;  %p8071_p3 = scmp.lt.s32.totalorder %s8065_s21, %s8065_s21 }
  0x64   :  { %p8072_p4 = por %p8071_p3, %p8070_p2 }
  0x66   :  { %p8073_p5 = pnand %p8072_p4, %p8066_p1 }
  0x68   :  { %8076 = shalt.err (!%p8073_p5)
}
  0x69   :  { %34 = dma.hbm_to_vmem [thread:$0]  %s8694_s0, 128, %s8365_s20, [#allocation3], %s8225_s29, %s8225_s29, %s8226_s30  }
  0x6a   :  { %s8237_s27 = smov [#allocation7]   ;;  %s8238_s22 = smov [#allocation10]  }
  0x6b   :  { %s53_s19 = sshll.u32 %s8237_s27, 4  ;;  %s75_s23 = sshll.u32 %s8238_s22, 4  ;;  %s54_s19 = int_to_ptr.vmem [resolvable:$true] %s53_s19  ;;  %s76_s23 = int_to_ptr.vmem [resolvable:$true] %s75_s23 }
  0x6c   :  { %s8077_s25 = scalar_lea.hbm %s8696_s2, 16 }
  0x6d   :  { %p8078_p6 = scmp.ne.s32.totalorder %s8696_s2, %s8077_s25  ;;  %p8081_p7 = scmp.lt.u32.totalorder %s8077_s25, %s8696_s2 }
  0x6f   :  { %p8083_p8 = pnand %p8081_p7, %p8078_p6 }
  0x71   :  { %8086 = shalt.err (!%p8083_p8)
}
  0x72   :  { %s8087_s0 = scalar_lea.vmem %s54_s19, 16  ;;  %s8091_s30 = scalar_lea.vmem %s54_s19, 32 }
  0x73   :  { %p8088_p9 = scmp.ne.s32.totalorder %s54_s19, %s8087_s0  ;;  %p8092_p10 = scmp.lt.s32.totalorder %s54_s19, %s54_s19 }
  0x74   :  { %p8093_p11 = scmp.lt.s32.totalorder %s8091_s30, %s8087_s0 }
  0x76   :  { %p8094_p12 = por %p8093_p11, %p8092_p10 }
  0x78   :  { %p8095_p13 = pnand %p8094_p12, %p8088_p9 }
  0x7a   :  { %8098 = shalt.err (!%p8095_p13)
}
  0x7b   :  { %56 = dma.hbm_to_vmem [thread:$0]  %s8696_s2, 16, %s54_s19, [#allocation6]  }
  0x7c   :  { %s8099_s15 = scalar_lea.hbm %s8698_s4, 32 }
  0x7d   :  { %p8100_p0 = scmp.ne.s32.totalorder %s8698_s4, %s8099_s15  ;;  %p8103_p1 = scmp.lt.u32.totalorder %s8099_s15, %s8698_s4 }
  0x7f   :  { %p8105_p2 = pnand %p8103_p1, %p8100_p0 }
  0x81   :  { %8108 = shalt.err (!%p8105_p2)
}
  0x82   :  { %s8109_s9 = scalar_lea.vmem %s76_s23, 32  ;;  %p8114_p4 = scmp.lt.s32.totalorder %s76_s23, %s76_s23 }
  0x83   :  { %p8110_p3 = scmp.ne.s32.totalorder %s76_s23, %s8109_s9  ;;  %p8115_p5 = scmp.lt.s32.totalorder %s8109_s9, %s8109_s9 }
  0x85   :  { %p8116_p6 = por %p8115_p5, %p8114_p4 }
  0x87   :  { %p8117_p7 = pnand %p8116_p6, %p8110_p3 }
  0x89   :  { %8120 = shalt.err (!%p8117_p7)
}
  0x8a   :  { %78 = dma.hbm_to_vmem [thread:$0]  %s8698_s4, 32, %s76_s23, [#allocation9]  }
  0x8b   :  { %s8239_s27 = smov [#allocation13]   ;;  %s8240_s22 = smov [#allocation16]  }
  0x8c   :  { %s97_s19 = sshll.u32 %s8239_s27, 4  ;;  %s119_s18 = sshll.u32 %s8240_s22, 4  ;;  %s98_s19 = int_to_ptr.vmem [resolvable:$true] %s97_s19  ;;  %s120_s18 = int_to_ptr.vmem [resolvable:$true] %s119_s18 }
  0x8d   :  { %s8121_s26 = scalar_lea.hbm %s8700_s6, 64 }
  0x8e   :  { %p8122_p8 = scmp.ne.s32.totalorder %s8700_s6, %s8121_s26  ;;  %p8125_p9 = scmp.lt.u32.totalorder %s8121_s26, %s8700_s6 }
  0x90   :  { %p8127_p10 = pnand %p8125_p9, %p8122_p8 }
  0x92   :  { %8130 = shalt.err (!%p8127_p10)
}
  0x93   :  { %s8131_s4 = scalar_lea.vmem %s98_s19, 64  ;;  %p8136_p12 = scmp.lt.s32.totalorder %s98_s19, %s98_s19 }
  0x94   :  { %p8132_p11 = scmp.ne.s32.totalorder %s98_s19, %s8131_s4  ;;  %p8137_p13 = scmp.lt.s32.totalorder %s8131_s4, %s8131_s4 }
  0x96   :  { %p8138_p0 = por %p8137_p13, %p8136_p12 }
  0x98   :  { %p8139_p1 = pnand %p8138_p0, %p8132_p11 }
  0x9a   :  { %8142 = shalt.err (!%p8139_p1)
}
  0x9b   :  { %100 = dma.hbm_to_vmem [thread:$0]  %s8700_s6, 64, %s98_s19, [#allocation12]  }
  0x9c   :  { %s8143_s13 = scalar_lea.hbm %s8702_s8, 128 }
  0x9d   :  { %p8144_p2 = scmp.ne.s32.totalorder %s8702_s8, %s8143_s13  ;;  %p8147_p3 = scmp.lt.u32.totalorder %s8143_s13, %s8702_s8 }
  0x9f   :  { %p8149_p4 = pnand %p8147_p3, %p8144_p2 }
  0xa1   :  { %8152 = shalt.err (!%p8149_p4)
}
  0xa2   :  { %s8153_s3 = scalar_lea.vmem %s120_s18, 128  ;;  %p8158_p6 = scmp.lt.s32.totalorder %s120_s18, %s120_s18 }
  0xa3   :  { %p8154_p5 = scmp.ne.s32.totalorder %s120_s18, %s8153_s3  ;;  %p8159_p7 = scmp.lt.s32.totalorder %s8153_s3, %s8153_s3 }
  0xa5   :  { %p8160_p8 = por %p8159_p7, %p8158_p6 }
  0xa7   :  { %p8161_p9 = pnand %p8160_p8, %p8154_p5 }
  0xa9   :  { %8164 = shalt.err (!%p8161_p9)
}
  0xaa   :  { %122 = dma.hbm_to_vmem [thread:$0]  %s8702_s8, 128, %s120_s18, [#allocation15]  }
  0xab   :  { %s8241_s9 = smov [#allocation19]   ;;  %s8165_s19 = scalar_lea.hbm %s8704_s10, 128 }
  0xac   :  { %s141_s2 = sshll.u32 %s8241_s9, 4  ;;  %p8166_p10 = scmp.ne.s32.totalorder %s8704_s10, %s8165_s19  ;;  %s142_s2 = int_to_ptr.vmem [resolvable:$true] %s141_s2 }
  0xad   :  { %p8169_p11 = scmp.lt.u32.totalorder %s8165_s19, %s8704_s10 }
  0xaf   :  { %p8171_p12 = pnand %p8169_p11, %p8166_p10 }
  0xb1   :  { %8174 = shalt.err (!%p8171_p12)
}
  0xb2   :  { %s8175_s7 = scalar_lea.vmem %s142_s2, 128  ;;  %p8180_p0 = scmp.lt.s32.totalorder %s142_s2, %s142_s2 }
  0xb3   :  { %p8176_p13 = scmp.ne.s32.totalorder %s142_s2, %s8175_s7  ;;  %p8181_p1 = scmp.lt.s32.totalorder %s8175_s7, %s8175_s7 }
  0xb5   :  { %p8182_p2 = por %p8181_p1, %p8180_p0 }
  0xb7   :  { %p8183_p3 = pnand %p8182_p2, %p8176_p13 }
  0xb9   :  { %8186 = shalt.err (!%p8183_p3)
}
  0xba   :  { %144 = dma.hbm_to_vmem [thread:$0]  %s8704_s10, 128, %s142_s2, [#allocation18]  }
  0xbb   :  { %8209 = dma.done.wait [#allocation3], 128  }
  0xbc   :  { %8210 = vsyncadd [#allocation3], 4294967168 }
  0xbd   :  { %8211 = dma.done.wait [#allocation6], 528  }
  0xbe   :  { %8212 = vsyncadd [#allocation6], 4294966768 }
  0xbf   :  { %8213 = dma.done.wait [#allocation9], 2080  }
  0xc0   :  { %8214 = vsyncadd [#allocation9], 4294965216 }
  0xc1   :  { %8215 = dma.done.wait [#allocation12], 8256  }
  0xc2   :  { %8216 = vsyncadd [#allocation12], 4294959040 }
  0xc3   :  { %8217 = dma.done.wait [#allocation15], 32896  }
  0xc4   :  { %8218 = vsyncadd [#allocation15], 4294934400 }
  0xc5   :  { %8219 = dma.done.wait [#allocation18], 65664  }
  0xc6   :  { %8220 = vsyncadd [#allocation18], 4294901632  ;;  %v8242_v0 = vmov 0.0   ;;  %vm8243_vm0 = vmmov 0   ;;  %v7788_v1 = vld [vmem:[#allocation5] sm:$0xff]   ;;  %v7789_v2 = vld [vmem:[#allocation5 + $0x8] sm:$0xff]  }
  0xc7   :  { %7656 = vmatprep.subr.bf16.mxu0 %v8242_v0  ;;  %7664 = vmatprep.mubr.msk.bf16.mxu0 %vm8243_vm0, %v8242_v0  ;;  %v7790_v3 = vld [vmem:[#allocation5 + $0x10] sm:$0xff]   ;;  %v7795_v5 = vld [vmem:[#allocation8] ss:$8 sps:$4 sm:$0xff]   ;;  %v7791_v9 = vld [vmem:[#allocation5 + $0x18] sm:$0xff]   ;;  %vm225_vm1 = vcmask 523264   ;;  %v8244_v22 = vmov 0  }
  0xc8   :  { %7657 = vmatpush3.bf16.msra.mxu0 %v7788_v1  ;;  %v7793_v4 = vld [vmem:[#allocation8 + $0x4] ss:$8 sps:$4 sm:$0xff]   ;;  %v7796_v6 = vld [vmem:[#allocation8 + $0x14] ss:$8 sps:$4 sm:$0xff]   ;;  %v7798_v7 = vld [vmem:[#allocation8 + $0x10] ss:$8 sps:$4 sm:$0xff]   ;;  %417 = vmatprep.mubr.bf16.mxu1 %v8244_v22 }
  0xc9   :  { %7658 = vmatprep.subr.bf16.mxu0 %v8242_v0  ;;  %385 = vmatprep.subr.bf16.mxu1 %v7793_v4  ;;  %v7799_v8 = vld [vmem:[#allocation8 + $0x24] ss:$8 sps:$4 sm:$0xff]   ;;  %v7792_v10 = vld [vmem:[#allocation2] sm:$0xff]   ;;  %v7801_v11 = vld [vmem:[#allocation8 + $0x20] ss:$8 sps:$4 sm:$0xff]   ;;  %s8245_s10 = smov [#allocation20]  }
  0xca   :  { %386 = vmatpush1.bf16.msra.mxu1 %v7795_v5  ;;  %v7802_v12 = vld [vmem:[#allocation8 + $0x34] ss:$8 sps:$4 sm:$0xff]   ;;  %v7804_v13 = vld [vmem:[#allocation8 + $0x30] ss:$8 sps:$4 sm:$0xff]   ;;  %v7805_v14 = vld [vmem:[#allocation8 + $0x44] ss:$8 sps:$4 sm:$0xff]  }
  0xcb   :  { %387 = vmatprep.subr.bf16.mxu1 %v7796_v6  ;;  %v7807_v15 = vld [vmem:[#allocation8 + $0x40] ss:$8 sps:$4 sm:$0xff]   ;;  %v7808_v16 = vld [vmem:[#allocation8 + $0x54] ss:$8 sps:$4 sm:$0xff]   ;;  %v7810_v17 = vld [vmem:[#allocation8 + $0x50] ss:$8 sps:$4 sm:$0xff]  }
  0xcc   :  { %7659 = vmatpush3.bf16.msra.mxu0 %v7789_v2  ;;  %v7811_v18 = vld [vmem:[#allocation8 + $0x64] ss:$8 sps:$4 sm:$0xff]   ;;  %v7813_v19 = vld [vmem:[#allocation8 + $0x60] ss:$8 sps:$4 sm:$0xff]   ;;  %v7814_v20 = vld [vmem:[#allocation8 + $0x74] ss:$8 sps:$4 sm:$0xff]  }
  0xcd   :  { %7660 = vmatprep.subr.bf16.mxu0 %v8242_v0  ;;  %v7816_v21 = vld [vmem:[#allocation8 + $0x70] ss:$8 sps:$4 sm:$0xff]   ;;  %v6796_v50 = vld [vmem:[#allocation7] ss:$0 sm:$0xff]  ;;  %s6779_s1 = sshll.u32 %s8245_s10, 4  ;;  %s6780_s1 = int_to_ptr.vmem [resolvable:$true] %s6779_s1 }
  0xce   :  { %388 = vmatpush1.bf16.msra.mxu1 %v7798_v7  ;;  %v7817_v23 = vld [vmem:[#allocation11] ss:$16 sps:$4 sm:$0xff]   ;;  %v7819_v24 = vld [vmem:[#allocation11 + $0x4] ss:$16 sps:$4 sm:$0xff]   ;;  %v7822_v25 = vld [vmem:[#allocation11 + $0xc] ss:$16 sps:$4 sm:$0xff]   ;;  %p8192_p5 = scmp.lt.s32.totalorder %s6780_s1, %s6780_s1 }
  0xcf   :  { %389 = vmatprep.subr.bf16.mxu1 %v7799_v8  ;;  %v7825_v26 = vld [vmem:[#allocation11 + $0x24] ss:$16 sps:$4 sm:$0xff]   ;;  %v7823_v27 = vld [vmem:[#allocation11 + $0x20] ss:$16 sps:$4 sm:$0xff]   ;;  %v7820_v61 = vld [vmem:[#allocation11 + $0x8] ss:$16 sps:$4 sm:$0xff]  }
  0xd0   :  { %7661 = vmatpush3.bf16.msra.mxu0 %v7790_v3  ;;  %v7831_v28 = vld [vmem:[#allocation11 + $0x44] ss:$16 sps:$4 sm:$0xff]   ;;  %v7829_v29 = vld [vmem:[#allocation11 + $0x40] ss:$16 sps:$4 sm:$0xff]   ;;  %v7828_v63 = vld [vmem:[#allocation11 + $0x2c] ss:$16 sps:$4 sm:$0xff]  }
  0xd1   :  { %7662 = vmatprep.subr.bf16.mxu0 %v8242_v0  ;;  %v7837_v30 = vld [vmem:[#allocation11 + $0x64] ss:$16 sps:$4 sm:$0xff]   ;;  %v7835_v31 = vld [vmem:[#allocation11 + $0x60] ss:$16 sps:$4 sm:$0xff]   ;;  %v7826_v0 = vld [vmem:[#allocation11 + $0x28] ss:$16 sps:$4 sm:$0xff]  }
  0xd2   :  { %390 = vmatpush1.bf16.msra.mxu1 %v7801_v11  ;;  %v7843_v32 = vld [vmem:[#allocation11 + $0x84] ss:$16 sps:$4 sm:$0xff]   ;;  %v7841_v33 = vld [vmem:[#allocation11 + $0x80] ss:$16 sps:$4 sm:$0xff]   ;;  %v7834_v1 = vld [vmem:[#allocation11 + $0x4c] ss:$16 sps:$4 sm:$0xff]  }
  0xd3   :  { %391 = vmatprep.subr.bf16.mxu1 %v7802_v12  ;;  %v7849_v34 = vld [vmem:[#allocation11 + $0xa4] ss:$16 sps:$4 sm:$0xff]   ;;  %v7847_v35 = vld [vmem:[#allocation11 + $0xa0] ss:$16 sps:$4 sm:$0xff]   ;;  %v7832_v2 = vld [vmem:[#allocation11 + $0x48] ss:$16 sps:$4 sm:$0xff]  }
  0xd4   :  { %7663 = vmatpush3.bf16.msra.mxu0 %v7791_v9  ;;  %v7855_v36 = vld [vmem:[#allocation11 + $0xc4] ss:$16 sps:$4 sm:$0xff]   ;;  %v7853_v37 = vld [vmem:[#allocation11 + $0xc0] ss:$16 sps:$4 sm:$0xff]   ;;  %v7840_v3 = vld [vmem:[#allocation11 + $0x6c] ss:$16 sps:$4 sm:$0xff]  }
  0xd5   :  { %848 = vmatprep.subr.bf16.mxu0 %v7819_v24  ;;  %v7861_v38 = vld [vmem:[#allocation11 + $0xe4] ss:$16 sps:$4 sm:$0xff]   ;;  %v7859_v39 = vld [vmem:[#allocation11 + $0xe0] ss:$16 sps:$4 sm:$0xff]   ;;  %v7838_v4 = vld [vmem:[#allocation11 + $0x68] ss:$16 sps:$4 sm:$0xff]  }
  0xd6   :  { %392 = vmatpush1.bf16.msra.mxu1 %v7804_v13  ;;  %v7867_v40 = vld [vmem:[#allocation11 + $0x104] ss:$16 sps:$4 sm:$0xff]   ;;  %v7865_v41 = vld [vmem:[#allocation11 + $0x100] ss:$16 sps:$4 sm:$0xff]   ;;  %v7846_v5 = vld [vmem:[#allocation11 + $0x8c] ss:$16 sps:$4 sm:$0xff]  }
  0xd7   :  { %7665 = vmatmul.mubr.msk.bf16.vlgmr.msra.gmra.mrb[0].mxu0 %vm225_vm1, %v7792_v10  ;;  %393 = vmatprep.subr.bf16.mxu1 %v7805_v14  ;;  %v7873_v42 = vld [vmem:[#allocation11 + $0x124] ss:$16 sps:$4 sm:$0xff]   ;;  %v7871_v43 = vld [vmem:[#allocation11 + $0x120] ss:$16 sps:$4 sm:$0xff]   ;;  %v7844_v6 = vld [vmem:[#allocation11 + $0x88] ss:$16 sps:$4 sm:$0xff]  }
  0xd8   :  { %849 = vmatpush1.bf16.msra.mxu0 %v7817_v23  ;;  %v7879_v44 = vld [vmem:[#allocation11 + $0x144] ss:$16 sps:$4 sm:$0xff]   ;;  %v7877_v45 = vld [vmem:[#allocation11 + $0x140] ss:$16 sps:$4 sm:$0xff]   ;;  %v7852_v7 = vld [vmem:[#allocation11 + $0xac] ss:$16 sps:$4 sm:$0xff]  }
  0xd9   :  { %850 = vmatprep.subr.bf16.mxu0 %v7825_v26  ;;  %v7885_v46 = vld [vmem:[#allocation11 + $0x164] ss:$16 sps:$4 sm:$0xff]   ;;  %v7883_v47 = vld [vmem:[#allocation11 + $0x160] ss:$16 sps:$4 sm:$0xff]   ;;  %v7850_v8 = vld [vmem:[#allocation11 + $0xa8] ss:$16 sps:$4 sm:$0xff]  }
  0xda   :  { %394 = vmatpush1.bf16.msra.mxu1 %v7807_v15  ;;  %v7891_v48 = vld [vmem:[#allocation11 + $0x184] ss:$16 sps:$4 sm:$0xff]   ;;  %v7889_v49 = vld [vmem:[#allocation11 + $0x180] ss:$16 sps:$4 sm:$0xff]   ;;  %v7858_v9 = vld [vmem:[#allocation11 + $0xcc] ss:$16 sps:$4 sm:$0xff]  }
  0xdb   :  { %395 = vmatprep.subr.bf16.mxu1 %v7808_v16  ;;  %v7856_v10 = vld [vmem:[#allocation11 + $0xc8] ss:$16 sps:$4 sm:$0xff]   ;;  %v7864_v11 = vld [vmem:[#allocation11 + $0xec] ss:$16 sps:$4 sm:$0xff]   ;;  %v7897_v23 = vld [vmem:[#allocation11 + $0x1a4] ss:$16 sps:$4 sm:$0xff]  }
  0xdc   :  { %851 = vmatpush1.bf16.msra.mxu0 %v7823_v27  ;;  %v7862_v12 = vld [vmem:[#allocation11 + $0xe8] ss:$16 sps:$4 sm:$0xff]   ;;  %v7870_v13 = vld [vmem:[#allocation11 + $0x10c] ss:$16 sps:$4 sm:$0xff]   ;;  %v7903_v27 = vld [vmem:[#allocation11 + $0x1c4] ss:$16 sps:$4 sm:$0xff]  }
  0xdd   :  { %852 = vmatprep.subr.bf16.mxu0 %v7831_v28  ;;  %v7868_v14 = vld [vmem:[#allocation11 + $0x108] ss:$16 sps:$4 sm:$0xff]   ;;  %v7876_v15 = vld [vmem:[#allocation11 + $0x12c] ss:$16 sps:$4 sm:$0xff]   ;;  %s8187_s28 = scalar_lea.vmem %s6780_s1, 2048 }
  0xde   :  { %396 = vmatpush1.bf16.msra.mxu1 %v7810_v17  ;;  %v7874_v16 = vld [vmem:[#allocation11 + $0x128] ss:$16 sps:$4 sm:$0xff]   ;;  %v7882_v17 = vld [vmem:[#allocation11 + $0x14c] ss:$16 sps:$4 sm:$0xff]   ;;  %p8188_p4 = scmp.ne.s32.totalorder %s6780_s1, %s8187_s28  ;;  %p8193_p6 = scmp.lt.s32.totalorder %s8187_s28, %s8187_s28 }
  0xdf   :  { %397 = vmatprep.subr.bf16.mxu1 %v7811_v18  ;;  %v7880_v18 = vld [vmem:[#allocation11 + $0x148] ss:$16 sps:$4 sm:$0xff]   ;;  %v7900_v24 = vld [vmem:[#allocation11 + $0x1ac] ss:$16 sps:$4 sm:$0xff]  }
  0xe0   :  { %853 = vmatpush1.bf16.msra.mxu0 %v7829_v29  ;;  %v7892_v22 = vld [vmem:[#allocation11 + $0x188] ss:$16 sps:$4 sm:$0xff]   ;;  %v7906_v28 = vld [vmem:[#allocation11 + $0x1cc] ss:$16 sps:$4 sm:$0xff]   ;;  %v7901_v29 = vld [vmem:[#allocation11 + $0x1c0] ss:$16 sps:$4 sm:$0xff]   ;;  %p8194_p7 = por %p8193_p6, %p8192_p5 }
  0xe1   :  { %854 = vmatprep.subr.bf16.mxu0 %v7837_v30  ;;  %v7898_v26 = vld [vmem:[#allocation11 + $0x1a8] ss:$16 sps:$4 sm:$0xff]  }
  0xe2   :  { %398 = vmatpush1.bf16.msra.mxu1 %v7813_v19  ;;  %v7888_v19 = vld [vmem:[#allocation11 + $0x16c] ss:$16 sps:$4 sm:$0xff]   ;;  %v7904_v30 = vld [vmem:[#allocation11 + $0x1c8] ss:$16 sps:$4 sm:$0xff]   ;;  %p8195_p8 = pnand %p8194_p7, %p8188_p4 }
  0xe3   :  { %399 = vmatprep.subr.bf16.mxu1 %v7814_v20  ;;  %v7886_v20 = vld [vmem:[#allocation11 + $0x168] ss:$16 sps:$4 sm:$0xff]  }
  0xe4   :  { %855 = vmatpush1.bf16.msra.mxu0 %v7835_v31  ;;  %v7909_v31 = vld [vmem:[#allocation11 + $0x1e4] ss:$16 sps:$4 sm:$0xff]  }
  0xe5   :  { %856 = vmatprep.subr.bf16.mxu0 %v7843_v32  ;;  %v7912_v32 = vld [vmem:[#allocation11 + $0x1ec] ss:$16 sps:$4 sm:$0xff]  }
  0xe6   :  { %400 = vmatpush1.bf16.msra.mxu1 %v7816_v21  ;;  %v7894_v21 = vld [vmem:[#allocation11 + $0x18c] ss:$16 sps:$4 sm:$0xff]  }
  0xe7   :  { %891 = vmatprep.subr.bf16.mxu1 %v7822_v25  ;;  %v7895_v25 = vld [vmem:[#allocation11 + $0x1a0] ss:$16 sps:$4 sm:$0xff]  }
  0xe8   :  { %857 = vmatpush1.bf16.msra.mxu0 %v7841_v33  ;;  %v7907_v33 = vld [vmem:[#allocation11 + $0x1e0] ss:$16 sps:$4 sm:$0xff]  }
  0xe9   :  { %858 = vmatprep.subr.bf16.mxu0 %v7849_v34  ;;  %v7910_v34 = vld [vmem:[#allocation11 + $0x1e8] ss:$16 sps:$4 sm:$0xff]  }
  0xec   :  { %859 = vmatpush1.bf16.msra.mxu0 %v7847_v35  ;;  %v962_v35 = vld [vmem:[#allocation14] sm:$0xff] }
  0xed   :  { %860 = vmatprep.subr.bf16.mxu0 %v7855_v36  ;;  %v966_v36 = vld [vmem:[#allocation14 + $0x20] sm:$0xff] }
  0xf0   :  { %861 = vmatpush1.bf16.msra.mxu0 %v7853_v37  ;;  %v963_v37 = vld [vmem:[#allocation14 + $0x8] sm:$0xff] }
  0xf1   :  { %862 = vmatprep.subr.bf16.mxu0 %v7861_v38  ;;  %v6883_v38 = vcombine.low %v962_v35, %v966_v36 }
  0xf4   :  { %863 = vmatpush1.bf16.msra.mxu0 %v7859_v39  ;;  %v6884_v39 = vcombine.high %v962_v35, %v966_v36  ;;  %v1006_v35 = vld [vmem:[#allocation14 + $0x160] sm:$0xff]  ;;  %v1003_v36 = vld [vmem:[#allocation14 + $0x148] sm:$0xff] }
  0xf5   :  { %864 = vmatprep.subr.bf16.mxu0 %v7867_v40  ;;  %v967_v40 = vld [vmem:[#allocation14 + $0x28] sm:$0xff] }
  0xf8   :  { %865 = vmatpush1.bf16.msra.mxu0 %v7865_v41  ;;  %v6885_v41 = vcombine.low %v963_v37, %v967_v40 }
  0xf9   :  { %866 = vmatprep.subr.bf16.mxu0 %v7873_v42  ;;  %v6886_v42 = vcombine.high %v963_v37, %v967_v40  ;;  %v1007_v37 = vld [vmem:[#allocation14 + $0x168] sm:$0xff] }
  0xfc   :  { %867 = vmatpush1.bf16.msra.mxu0 %v7871_v43  ;;  %v295_v43 = vlaneseq }
  0xfd   :  { %868 = vmatprep.subr.bf16.mxu0 %v7879_v44 }
  0xfe   :  { %v8459_v44 = vshrl.u32 %v295_v43, 7  ;;  %v1014_v43 = vld [vmem:[#allocation14 + $0x1a0] sm:$0xff] }
 0x100   :  { %869 = vmatpush1.bf16.msra.mxu0 %v7877_v45  ;;  %v8462_v45 = vsub.s32 0, %v8459_v44 }
 0x101   :  { %870 = vmatprep.subr.bf16.mxu0 %v7885_v46  ;;  %v293_v46 = vld [vmem:[#allocation10] sm:$0x3] }
 0x104   :  { %871 = vmatpush1.bf16.msra.mxu0 %v7883_v47  ;;  %v8465_v47 = vsub.s32 1, %v8459_v44 }
 0x105   :  { %872 = vmatprep.subr.bf16.mxu0 %v7891_v48  ;;  %v298_v48 = vrot.slane %v293_v46, %v8462_v45 }
 0x108   :  { %873 = vmatpush1.bf16.msra.mxu0 %v7889_v49  ;;  %v302_v49 = vrot.slane %v293_v46, %v8465_v47  ;;  %v1011_v46 = vld [vmem:[#allocation14 + $0x188] sm:$0xff] }
 0x109   :  { %874 = vmatprep.subr.bf16.mxu0 %v7897_v23 }
 0x10c   :  { %875 = vmatpush1.bf16.msra.mxu0 %v7895_v25 }
 0x10d   :  { %876 = vmatprep.subr.bf16.mxu0 %v7903_v27  ;;  %v998_v27 = vld [vmem:[#allocation14 + $0x120] sm:$0xff] }
 0x110   :  { %877 = vmatpush1.bf16.msra.mxu0 %v7901_v29  ;;  %v999_v29 = vld [vmem:[#allocation14 + $0x128] sm:$0xff] }
 0x111   :  { %878 = vmatprep.subr.bf16.mxu0 %v7909_v31 }
 0x114   :  { %879 = vmatpush1.bf16.msra.mxu0 %v7907_v33 }
 0x115   :  { %2540 = vmatprep.subr.bf16.mxu0 %v6884_v39 }
 0x1aa   :  { %v263_v51 = vpop.f32.mrb[0].mxu0 }
 0x1ab   :  { %v264_v52 = vadd.f32 %v6796_v50, %v263_v51  ;;  %v7666_v53 = vpop.f32.mrb[1].mxu0 }
 0x1ac   :  { %v266_v54 = vpop.f32.mrb[2].mxu0 }
 0x1ad   :  { %v272_v55 = vmul.f32 0.2, %v264_v52  ;;  %v267_v56 = vadd.f32 %v6796_v50, %v266_v54  ;;  %v7667_v57 = vpop.f32.mrb[3].mxu0  ;;  %vm270_vm2 = vcmp.gt.f32.partialorder %v264_v52, 0.0 }
 0x1af   :  { %vm271_vm3 = vcmp.gt.f32.partialorder %v267_v56, 0.0  ;;  %v273_v58 = vmul.f32 0.2, %v267_v56  ;;  %v274_v59 = vsel %vm270_vm2, %v264_v52, %v272_v55 }
 0x1b1   :  { %v275_v60 = vsel %vm271_vm3, %v267_v56, %v273_v58 }
 0x1b2   :  { %v276_v62 = vpack.c.bf16 %v275_v60, %v274_v59 }
 0x1b4   :  { %418 = vmatmul.mubr.bf16.vlgmr.msra.gmra.mrb[0].mxu1 %v276_v62  ;;  %v970_v62 = vld [vmem:[#allocation14 + $0x40] sm:$0xff] }
 0x1b5   :  { %892 = vmatpush1.bf16.msra.mxu1 %v7820_v61 }
 0x1b6   :  { %893 = vmatprep.subr.bf16.mxu1 %v7828_v63 }
 0x1b9   :  { %894 = vmatpush1.bf16.msra.mxu1 %v7826_v0 }
 0x1ba   :  { %895 = vmatprep.subr.bf16.mxu1 %v7834_v1  ;;  %v974_v1 = vld [vmem:[#allocation14 + $0x60] sm:$0xff] }
 0x1bd   :  { %896 = vmatpush1.bf16.msra.mxu1 %v7832_v2  ;;  %v971_v2 = vld [vmem:[#allocation14 + $0x48] sm:$0xff] }
 0x1be   :  { %897 = vmatprep.subr.bf16.mxu1 %v7840_v3  ;;  %v975_v3 = vld [vmem:[#allocation14 + $0x68] sm:$0xff] }
 0x1c1   :  { %898 = vmatpush1.bf16.msra.mxu1 %v7838_v4 }
 0x1c2   :  { %899 = vmatprep.subr.bf16.mxu1 %v7846_v5 }
 0x1c5   :  { %900 = vmatpush1.bf16.msra.mxu1 %v7844_v6 }
 0x1c6   :  { %901 = vmatprep.subr.bf16.mxu1 %v7852_v7 }
 0x1c9   :  { %902 = vmatpush1.bf16.msra.mxu1 %v7850_v8  ;;  %v6892_v8 = vcombine.high %v970_v62, %v974_v1 }
 0x1ca   :  { %903 = vmatprep.subr.bf16.mxu1 %v7858_v9  ;;  %v6894_v9 = vcombine.high %v971_v2, %v975_v3 }
 0x1cd   :  { %904 = vmatpush1.bf16.msra.mxu1 %v7856_v10  ;;  %v978_v10 = vld [vmem:[#allocation14 + $0x80] sm:$0xff] }
 0x1ce   :  { %905 = vmatprep.subr.bf16.mxu1 %v7864_v11  ;;  %v982_v11 = vld [vmem:[#allocation14 + $0xa0] sm:$0xff] }
 0x1d1   :  { %906 = vmatpush1.bf16.msra.mxu1 %v7862_v12  ;;  %v979_v12 = vld [vmem:[#allocation14 + $0x88] sm:$0xff] }
 0x1d2   :  { %907 = vmatprep.subr.bf16.mxu1 %v7870_v13  ;;  %v983_v13 = vld [vmem:[#allocation14 + $0xa8] sm:$0xff] }
 0x1d3   :  { %v6901_v23 = vcombine.low %v979_v12, %v983_v13 }
 0x1d5   :  { %908 = vmatpush1.bf16.msra.mxu1 %v7868_v14  ;;  %v6891_v14 = vcombine.low %v970_v62, %v974_v1  ;;  %v1030_v62 = vld [vmem:[#allocation14 + $0x220] sm:$0xff] }
 0x1d6   :  { %909 = vmatprep.subr.bf16.mxu1 %v7876_v15  ;;  %v6893_v15 = vcombine.low %v971_v2, %v975_v3 }
 0x1d9   :  { %910 = vmatpush1.bf16.msra.mxu1 %v7874_v16  ;;  %v6900_v16 = vcombine.high %v978_v10, %v982_v11 }
 0x1da   :  { %911 = vmatprep.subr.bf16.mxu1 %v7882_v17  ;;  %v6902_v17 = vcombine.high %v979_v12, %v983_v13  ;;  %v1042_v13 = vld [vmem:[#allocation14 + $0x280] sm:$0xff] }
 0x1dd   :  { %912 = vmatpush1.bf16.msra.mxu1 %v7880_v18  ;;  %v986_v18 = vld [vmem:[#allocation14 + $0xc0] sm:$0xff] }
 0x1de   :  { %913 = vmatprep.subr.bf16.mxu1 %v7888_v19  ;;  %v990_v19 = vld [vmem:[#allocation14 + $0xe0] sm:$0xff] }
 0x1e1   :  { %914 = vmatpush1.bf16.msra.mxu1 %v7886_v20  ;;  %v987_v20 = vld [vmem:[#allocation14 + $0xc8] sm:$0xff] }
 0x1e2   :  { %915 = vmatprep.subr.bf16.mxu1 %v7894_v21  ;;  %v991_v21 = vld [vmem:[#allocation14 + $0xe8] sm:$0xff] }
 0x1e3   :  { %v6910_v25 = vcombine.high %v987_v20, %v991_v21  ;;  %v6909_v31 = vcombine.low %v987_v20, %v991_v21  ;;  %v1050_v21 = vld [vmem:[#allocation14 + $0x2c0] sm:$0xff] }
 0x1e5   :  { %916 = vmatpush1.bf16.msra.mxu1 %v7892_v22  ;;  %v6899_v22 = vcombine.low %v978_v10, %v982_v11 }
 0x1e6   :  { %917 = vmatprep.subr.bf16.mxu1 %v7900_v24  ;;  %v6908_v24 = vcombine.high %v986_v18, %v990_v19 }
 0x1e9   :  { %918 = vmatpush1.bf16.msra.mxu1 %v7898_v26  ;;  %v994_v26 = vld [vmem:[#allocation14 + $0x100] sm:$0xff] }
 0x1ea   :  { %919 = vmatprep.subr.bf16.mxu1 %v7906_v28  ;;  %v995_v28 = vld [vmem:[#allocation14 + $0x108] sm:$0xff] }
 0x1eb   :  { %v6918_v33 = vcombine.high %v995_v28, %v999_v29  ;;  %v6917_v39 = vcombine.low %v995_v28, %v999_v29  ;;  %v1058_v29 = vld [vmem:[#allocation14 + $0x300] sm:$0xff] }
 0x1ed   :  { %920 = vmatpush1.bf16.msra.mxu1 %v7904_v30  ;;  %v6907_v30 = vcombine.low %v986_v18, %v990_v19 }
 0x1ee   :  { %921 = vmatprep.subr.bf16.mxu1 %v7912_v32  ;;  %v6916_v32 = vcombine.high %v994_v26, %v998_v27 }
 0x1f1   :  { %922 = vmatpush1.bf16.msra.mxu1 %v7910_v34  ;;  %v1002_v34 = vld [vmem:[#allocation14 + $0x140] sm:$0xff] }
 0x1f2   :  { %2626 = vmatprep.subr.bf16.mxu1 %v6886_v42  ;;  %v6924_v40 = vcombine.high %v1002_v34, %v1006_v35  ;;  %v1010_v42 = vld [vmem:[#allocation14 + $0x180] sm:$0xff] }
 0x287   :  { %v419_v50 = vpop.f32.mrb[0].mxu1 }
 0x288   :  { %v420_v51 = vadd.f32 %v419_v50, %v298_v48  ;;  %v421_v52 = vpop.f32.mrb[1].mxu1  ;;  %v6925_v50 = vcombine.low %v1003_v36, %v1007_v37 }
 0x289   :  { %v422_v53 = vadd.f32 %v421_v52, %v302_v49  ;;  %v423_v54 = vpop.f32.mrb[2].mxu1 }
 0x28a   :  { %v432_v55 = vmul.f32 0.2, %v420_v51  ;;  %v424_v56 = vadd.f32 %v423_v54, %v298_v48  ;;  %v425_v57 = vpop.f32.mrb[3].mxu1  ;;  %vm428_vm4 = vcmp.gt.f32.partialorder %v420_v51, 0.0  ;;  %v1015_v48 = vld [vmem:[#allocation14 + $0x1a8] sm:$0xff]  ;;  %v1022_v54 = vld [vmem:[#allocation14 + $0x1e0] sm:$0xff] }
 0x28b   :  { %v433_v58 = vmul.f32 0.2, %v422_v53  ;;  %v426_v59 = vadd.f32 %v425_v57, %v302_v49  ;;  %vm429_vm5 = vcmp.gt.f32.partialorder %v422_v53, 0.0  ;;  %v6923_v49 = vcombine.low %v1002_v34, %v1006_v35 }
 0x28c   :  { %vm430_vm6 = vcmp.gt.f32.partialorder %v424_v56, 0.0  ;;  %v434_v60 = vmul.f32 0.2, %v424_v56  ;;  %v436_v63 = vsel %vm428_vm4, %v420_v51, %v432_v55  ;;  %v6932_v51 = vcombine.high %v1010_v42, %v1014_v43  ;;  %v1019_v55 = vld [vmem:[#allocation14 + $0x1c8] sm:$0xff] }
 0x28d   :  { %vm431_vm7 = vcmp.gt.f32.partialorder %v426_v59, 0.0  ;;  %v435_v61 = vmul.f32 0.2, %v426_v59  ;;  %v437_v5 = vsel %vm429_vm5, %v422_v53, %v433_v58  ;;  %v6934_v52 = vcombine.high %v1011_v46, %v1015_v48  ;;  %v1018_v53 = vld [vmem:[#allocation14 + $0x1c0] sm:$0xff] }
 0x28e   :  { %v438_v0 = vsel %vm430_vm6, %v424_v56, %v434_v60  ;;  %v1023_v56 = vld [vmem:[#allocation14 + $0x1e8] sm:$0xff]  ;;  %v6931_v57 = vcombine.low %v1010_v42, %v1014_v43  ;;  %v6933_v58 = vcombine.low %v1011_v46, %v1015_v48  ;;  %v6939_v1 = vcombine.low %v1018_v53, %v1022_v54 }
 0x28f   :  { %v440_v4 = vpack.c.bf16 %v438_v0, %v436_v63  ;;  %v439_v6 = vsel %vm431_vm7, %v426_v59, %v435_v61  ;;  %v6940_v59 = vcombine.high %v1018_v53, %v1022_v54  ;;  %v6942_v60 = vcombine.high %v1019_v55, %v1023_v56  ;;  %v1026_v61 = vld [vmem:[#allocation14 + $0x200] sm:$0xff]  ;;  %v1027_v63 = vld [vmem:[#allocation14 + $0x208] sm:$0xff] }
 0x290   :  { %v441_v7 = vpack.c.bf16 %v439_v6, %v437_v5  ;;  %v1031_v0 = vld [vmem:[#allocation14 + $0x228] sm:$0xff]  ;;  %v6941_v2 = vcombine.low %v1019_v55, %v1023_v56  ;;  %v6948_v3 = vcombine.high %v1026_v61, %v1030_v62  ;;  %v1034_v5 = vld [vmem:[#allocation14 + $0x240] sm:$0xff] }
 0x291   :  { %v1038_v6 = vld [vmem:[#allocation14 + $0x260] sm:$0xff]  ;;  %v6949_v10 = vcombine.low %v1027_v63, %v1031_v0  ;;  %v1079_v54 = vld [vmem:[#allocation14 + $0x3a8] sm:$0xff] }
 0x292   :  { %880 = vmatprep.mubr.bf16.mxu0 %v441_v7  ;;  %923 = vmatprep.mubr.bf16.mxu1 %v441_v7  ;;  %v1035_v7 = vld [vmem:[#allocation14 + $0x248] sm:$0xff]  ;;  %v6956_v11 = vcombine.high %v1034_v5, %v1038_v6 }
 0x293   :  { %881 = vmatmul.mubr.bf16.vlgmr.msra.gmra.mrb[4].mxu0 %v440_v4  ;;  %924 = vmatmul.mubr.bf16.vlgmr.msra.gmra.mrb[4].mxu1 %v440_v4  ;;  %v6950_v4 = vcombine.high %v1027_v63, %v1031_v0 }
 0x294   :  { %2541 = vmatpush1.bf16.msra.mxu0 %v6883_v38  ;;  %2627 = vmatpush1.bf16.msra.mxu1 %v6885_v41  ;;  %v6915_v38 = vcombine.low %v994_v26, %v998_v27  ;;  %v6926_v41 = vcombine.high %v1003_v36, %v1007_v37  ;;  %v1066_v37 = vld [vmem:[#allocation14 + $0x340] sm:$0xff] }
 0x295   :  { %2542 = vmatprep.subr.bf16.mxu0 %v6892_v8  ;;  %2628 = vmatprep.subr.bf16.mxu1 %v6894_v9  ;;  %v1039_v8 = vld [vmem:[#allocation14 + $0x268] sm:$0xff]  ;;  %v6947_v9 = vcombine.low %v1026_v61, %v1030_v62 }
 0x296   :  { %v6958_v12 = vcombine.high %v1035_v7, %v1039_v8  ;;  %v6957_v18 = vcombine.low %v1035_v7, %v1039_v8  ;;  %v1087_v62 = vld [vmem:[#allocation14 + $0x3e8] sm:$0xff] }
 0x298   :  { %2543 = vmatpush1.bf16.msra.mxu0 %v6891_v14  ;;  %2629 = vmatpush1.bf16.msra.mxu1 %v6893_v15  ;;  %v1046_v14 = vld [vmem:[#allocation14 + $0x2a0] sm:$0xff]  ;;  %v1043_v15 = vld [vmem:[#allocation14 + $0x288] sm:$0xff] }
 0x299   :  { %2544 = vmatprep.subr.bf16.mxu0 %v6900_v16  ;;  %2630 = vmatprep.subr.bf16.mxu1 %v6902_v17  ;;  %v1047_v16 = vld [vmem:[#allocation14 + $0x2a8] sm:$0xff]  ;;  %v6955_v17 = vcombine.low %v1034_v5, %v1038_v6  ;;  %v6964_v19 = vcombine.high %v1042_v13, %v1046_v14 }
 0x29a   :  { %v6966_v20 = vcombine.high %v1043_v15, %v1047_v16  ;;  %v6965_v26 = vcombine.low %v1043_v15, %v1047_v16  ;;  %v8477_v6 = vld [vmem:[#allocation14 + $0x428] sm:$0xff] }
 0x29c   :  { %2545 = vmatpush1.bf16.msra.mxu0 %v6899_v22  ;;  %2631 = vmatpush1.bf16.msra.mxu1 %v6901_v23  ;;  %v1054_v22 = vld [vmem:[#allocation14 + $0x2e0] sm:$0xff]  ;;  %v1051_v23 = vld [vmem:[#allocation14 + $0x2c8] sm:$0xff] }
 0x29d   :  { %2546 = vmatprep.subr.bf16.mxu0 %v6908_v24  ;;  %2632 = vmatprep.subr.bf16.mxu1 %v6910_v25  ;;  %v1055_v24 = vld [vmem:[#allocation14 + $0x2e8] sm:$0xff]  ;;  %v6963_v25 = vcombine.low %v1042_v13, %v1046_v14  ;;  %v6972_v27 = vcombine.high %v1050_v21, %v1054_v22 }
 0x29e   :  { %v6974_v28 = vcombine.high %v1051_v23, %v1055_v24  ;;  %v6973_v34 = vcombine.low %v1051_v23, %v1055_v24 }
 0x2a0   :  { %2547 = vmatpush1.bf16.msra.mxu0 %v6907_v30  ;;  %2633 = vmatpush1.bf16.msra.mxu1 %v6909_v31  ;;  %v1062_v30 = vld [vmem:[#allocation14 + $0x320] sm:$0xff]  ;;  %v1059_v31 = vld [vmem:[#allocation14 + $0x308] sm:$0xff] }
 0x2a1   :  { %2548 = vmatprep.subr.bf16.mxu0 %v6916_v32  ;;  %2634 = vmatprep.subr.bf16.mxu1 %v6918_v33  ;;  %v1063_v32 = vld [vmem:[#allocation14 + $0x328] sm:$0xff]  ;;  %v6971_v33 = vcombine.low %v1050_v21, %v1054_v22  ;;  %v6980_v35 = vcombine.high %v1058_v29, %v1062_v30 }
 0x2a2   :  { %v6982_v36 = vcombine.high %v1059_v31, %v1063_v32  ;;  %v6981_v42 = vcombine.low %v1059_v31, %v1063_v32 }
 0x2a4   :  { %2549 = vmatpush1.bf16.msra.mxu0 %v6915_v38  ;;  %2635 = vmatpush1.bf16.msra.mxu1 %v6917_v39  ;;  %v1070_v38 = vld [vmem:[#allocation14 + $0x360] sm:$0xff]  ;;  %v1067_v39 = vld [vmem:[#allocation14 + $0x348] sm:$0xff] }
 0x2a5   :  { %2550 = vmatprep.subr.bf16.mxu0 %v6924_v40  ;;  %2636 = vmatprep.subr.bf16.mxu1 %v6926_v41  ;;  %v1071_v40 = vld [vmem:[#allocation14 + $0x368] sm:$0xff]  ;;  %v6979_v41 = vcombine.low %v1058_v29, %v1062_v30  ;;  %v6988_v43 = vcombine.high %v1066_v37, %v1070_v38  ;;  %v6987_v48 = vcombine.low %v1066_v37, %v1070_v38 }
 0x2a6   :  { %v6990_v46 = vcombine.high %v1067_v39, %v1071_v40 }
 0x2a8   :  { %2551 = vmatpush1.bf16.msra.mxu0 %v6923_v49  ;;  %2637 = vmatpush1.bf16.msra.mxu1 %v6925_v50  ;;  %v6989_v49 = vcombine.low %v1067_v39, %v1071_v40  ;;  %v1074_v50 = vld [vmem:[#allocation14 + $0x380] sm:$0xff] }
 0x2a9   :  { %2552 = vmatprep.subr.bf16.mxu0 %v6932_v51  ;;  %2638 = vmatprep.subr.bf16.mxu1 %v6934_v52  ;;  %v1078_v51 = vld [vmem:[#allocation14 + $0x3a0] sm:$0xff]  ;;  %v1075_v52 = vld [vmem:[#allocation14 + $0x388] sm:$0xff] }
 0x2aa   :  { %v6996_v53 = vcombine.high %v1074_v50, %v1078_v51  ;;  %v6995_v55 = vcombine.low %v1074_v50, %v1078_v51  ;;  %v6997_v56 = vcombine.low %v1075_v52, %v1079_v54  ;;  %v1098_v50 = vld [vmem:[#allocation14 + $0x440] sm:$0xff] }
 0x2ac   :  { %2553 = vmatpush1.bf16.msra.mxu0 %v6931_v57  ;;  %2639 = vmatpush1.bf16.msra.mxu1 %v6933_v58  ;;  %v6998_v57 = vcombine.high %v1075_v52, %v1079_v54  ;;  %v1082_v58 = vld [vmem:[#allocation14 + $0x3c0] sm:$0xff] }
 0x2ad   :  { %2554 = vmatprep.subr.bf16.mxu0 %v6940_v59  ;;  %2640 = vmatprep.subr.bf16.mxu1 %v6942_v60  ;;  %v1086_v59 = vld [vmem:[#allocation14 + $0x3e0] sm:$0xff]  ;;  %v1083_v60 = vld [vmem:[#allocation14 + $0x3c8] sm:$0xff] }
 0x2ae   :  { %v7004_v61 = vcombine.high %v1082_v58, %v1086_v59  ;;  %v7003_v63 = vcombine.low %v1082_v58, %v1086_v59  ;;  %v7005_v0 = vcombine.low %v1083_v60, %v1087_v62 }
 0x2b0   :  { %2555 = vmatpush1.bf16.msra.mxu0 %v6939_v1  ;;  %2641 = vmatpush1.bf16.msra.mxu1 %v6941_v2  ;;  %v7006_v1 = vcombine.high %v1083_v60, %v1087_v62  ;;  %v8469_v2 = vld [vmem:[#allocation14 + $0x400] sm:$0xff] }
 0x2b1   :  { %2556 = vmatprep.subr.bf16.mxu0 %v6948_v3  ;;  %2642 = vmatprep.subr.bf16.mxu1 %v6950_v4  ;;  %v8471_v3 = vld [vmem:[#allocation14 + $0x420] sm:$0xff]  ;;  %v8473_v4 = vld [vmem:[#allocation14 + $0x408] sm:$0xff] }
 0x2b2   :  { %v7012_v5 = vcombine.high %v8469_v2, %v8471_v3  ;;  %v7011_v7 = vcombine.low %v8469_v2, %v8471_v3  ;;  %v7013_v8 = vcombine.low %v8473_v4, %v8477_v6  ;;  %v1106_v60 = vld [vmem:[#allocation14 + $0x480] sm:$0xff] }
 0x2b4   :  { %2557 = vmatpush1.bf16.msra.mxu0 %v6947_v9  ;;  %2643 = vmatpush1.bf16.msra.mxu1 %v6949_v10  ;;  %v7014_v9 = vcombine.high %v8473_v4, %v8477_v6  ;;  %v8486_v10 = vsub.s32 2, %v8459_v44 }
 0x2b5   :  { %2558 = vmatprep.subr.bf16.mxu0 %v6956_v11  ;;  %2644 = vmatprep.subr.bf16.mxu1 %v6958_v12  ;;  %v506_v11 = vld [vmem:[#allocation13] sm:$0xf]  ;;  %v8489_v12 = vsub.s32 3, %v8459_v44 }
 0x2b6   :  { %v511_v13 = vrot.slane %v506_v11, %v8462_v45  ;;  %v519_v14 = vrot.slane %v506_v11, %v8486_v10  ;;  %v515_v15 = vrot.slane %v506_v11, %v8465_v47 }
 0x2b7   :  { %v523_v16 = vrot.slane %v506_v11, %v8489_v12 }
 0x2b8   :  { %2559 = vmatpush1.bf16.msra.mxu0 %v6955_v17  ;;  %2645 = vmatpush1.bf16.msra.mxu1 %v6957_v18 }
 0x2b9   :  { %2560 = vmatprep.subr.bf16.mxu0 %v6964_v19  ;;  %2646 = vmatprep.subr.bf16.mxu1 %v6966_v20 }
 0x2bc   :  { %2561 = vmatpush1.bf16.msra.mxu0 %v6963_v25  ;;  %2647 = vmatpush1.bf16.msra.mxu1 %v6965_v26 }
 0x2bd   :  { %2562 = vmatprep.subr.bf16.mxu0 %v6972_v27  ;;  %2648 = vmatprep.subr.bf16.mxu1 %v6974_v28 }
 0x2c0   :  { %2563 = vmatpush1.bf16.msra.mxu0 %v6971_v33  ;;  %2649 = vmatpush1.bf16.msra.mxu1 %v6973_v34 }
 0x2c1   :  { %2564 = vmatprep.subr.bf16.mxu0 %v6980_v35  ;;  %2650 = vmatprep.subr.bf16.mxu1 %v6982_v36 }
 0x2c4   :  { %2565 = vmatpush1.bf16.msra.mxu0 %v6979_v41  ;;  %2651 = vmatpush1.bf16.msra.mxu1 %v6981_v42 }
 0x2c5   :  { %2566 = vmatprep.subr.bf16.mxu0 %v6988_v43  ;;  %2652 = vmatprep.subr.bf16.mxu1 %v6990_v46 }
 0x2c8   :  { %2567 = vmatpush1.bf16.msra.mxu0 %v6987_v48  ;;  %2653 = vmatpush1.bf16.msra.mxu1 %v6989_v49 }
 0x2c9   :  { %2568 = vmatprep.subr.bf16.mxu0 %v6996_v53  ;;  %2654 = vmatprep.subr.bf16.mxu1 %v6998_v57  ;;  %v1103_v57 = vld [vmem:[#allocation14 + $0x468] sm:$0xff] }
 0x2cc   :  { %2569 = vmatpush1.bf16.msra.mxu0 %v6995_v55  ;;  %2655 = vmatpush1.bf16.msra.mxu1 %v6997_v56  ;;  %v1102_v55 = vld [vmem:[#allocation14 + $0x460] sm:$0xff]  ;;  %v1099_v56 = vld [vmem:[#allocation14 + $0x448] sm:$0xff] }
 0x2cd   :  { %2570 = vmatprep.subr.bf16.mxu0 %v7004_v61  ;;  %2656 = vmatprep.subr.bf16.mxu1 %v7006_v1  ;;  %v7020_v61 = vcombine.high %v1098_v50, %v1102_v55  ;;  %v7022_v62 = vcombine.high %v1099_v56, %v1103_v57  ;;  %v1111_v1 = vld [vmem:[#allocation14 + $0x4a8] sm:$0xff] }
 0x2d0   :  { %2571 = vmatpush1.bf16.msra.mxu0 %v7003_v63  ;;  %2657 = vmatpush1.bf16.msra.mxu1 %v7005_v0  ;;  %v1110_v63 = vld [vmem:[#allocation14 + $0x4a0] sm:$0xff]  ;;  %v1107_v0 = vld [vmem:[#allocation14 + $0x488] sm:$0xff] }
 0x2d1   :  { %2583 = vmatprep.subr.bf16.mxu0 %v7012_v5  ;;  %2669 = vmatprep.subr.bf16.mxu1 %v7014_v9  ;;  %v7019_v5 = vcombine.low %v1098_v50, %v1102_v55  ;;  %v7021_v9 = vcombine.low %v1099_v56, %v1103_v57  ;;  %v7028_v11 = vcombine.high %v1106_v60, %v1110_v63  ;;  %v1155_v55 = vld [vmem:[#allocation14 + $0x608] sm:$0xff] }
 0x2d2   :  { %v7027_v2 = vcombine.low %v1106_v60, %v1110_v63  ;;  %v7029_v3 = vcombine.low %v1107_v0, %v1111_v1  ;;  %v1159_v56 = vld [vmem:[#allocation14 + $0x628] sm:$0xff]  ;;  %v1162_v63 = vld [vmem:[#allocation14 + $0x640] sm:$0xff] }
 0x366   :  { %v882_v17 = vpop.f32.mrb[4].mxu0  ;;  %v925_v18 = vpop.f32.mrb[4].mxu1 }
 0x367   :  { %v883_v19 = vadd.f32 %v882_v17, %v511_v13  ;;  %v926_v20 = vadd.f32 %v925_v18, %v519_v14  ;;  %v884_v21 = vpop.f32.mrb[5].mxu0  ;;  %v927_v22 = vpop.f32.mrb[5].mxu1  ;;  %v1119_v17 = vld [vmem:[#allocation14 + $0x4e8] sm:$0xff] }
 0x368   :  { %v885_v23 = vadd.f32 %v884_v21, %v515_v15  ;;  %v928_v24 = vadd.f32 %v927_v22, %v523_v16  ;;  %v886_v25 = vpop.f32.mrb[6].mxu0  ;;  %v929_v26 = vpop.f32.mrb[6].mxu1  ;;  %v1123_v18 = vld [vmem:[#allocation14 + $0x508] sm:$0xff] }
 0x369   :  { %vm934_vm8 = vcmp.gt.f32.partialorder %v883_v19, 0.0  ;;  %v942_v27 = vmul.f32 0.2, %v883_v19  ;;  %vm936_vm9 = vcmp.gt.f32.partialorder %v926_v20, 0.0  ;;  %v944_v28 = vmul.f32 0.2, %v926_v20 }
 0x36a   :  { %vm935_vm10 = vcmp.gt.f32.partialorder %v885_v23, 0.0  ;;  %v943_v29 = vmul.f32 0.2, %v885_v23  ;;  %vm937_vm11 = vcmp.gt.f32.partialorder %v928_v24, 0.0  ;;  %v945_v30 = vmul.f32 0.2, %v928_v24 }
 0x36b   :  { %v887_v31 = vadd.f32 %v886_v25, %v511_v13  ;;  %v930_v32 = vadd.f32 %v929_v26, %v519_v14  ;;  %v888_v33 = vpop.f32.mrb[7].mxu0  ;;  %v931_v34 = vpop.f32.mrb[7].mxu1  ;;  %v950_v35 = vsel %vm934_vm8, %v883_v19, %v942_v27  ;;  %v952_v36 = vsel %vm936_vm9, %v926_v20, %v944_v28  ;;  %v1114_v14 = vld [vmem:[#allocation14 + $0x4c0] sm:$0xff]  ;;  %v1127_v19 = vld [vmem:[#allocation14 + $0x528] sm:$0xff] }
 0x36c   :  { %v889_v37 = vadd.f32 %v888_v33, %v515_v15  ;;  %v932_v38 = vadd.f32 %v931_v34, %v523_v16  ;;  %v951_v43 = vsel %vm935_vm10, %v885_v23, %v943_v29  ;;  %v953_v46 = vsel %vm937_vm11, %v928_v24, %v945_v30  ;;  %v1118_v15 = vld [vmem:[#allocation14 + $0x4e0] sm:$0xff]  ;;  %v1115_v16 = vld [vmem:[#allocation14 + $0x4c8] sm:$0xff] }
 0x36d   :  { %vm938_vm12 = vcmp.gt.f32.partialorder %v887_v31, 0.0  ;;  %v946_v39 = vmul.f32 0.2, %v887_v31  ;;  %vm940_vm13 = vcmp.gt.f32.partialorder %v930_v32, 0.0  ;;  %v948_v40 = vmul.f32 0.2, %v930_v32 }
 0x36e   :  { %vm939_vm14 = vcmp.gt.f32.partialorder %v889_v37, 0.0  ;;  %v947_v41 = vmul.f32 0.2, %v889_v37  ;;  %vm941_vm15 = vcmp.gt.f32.partialorder %v932_v38, 0.0  ;;  %v949_v42 = vmul.f32 0.2, %v932_v38 }
 0x36f   :  { %v954_v48 = vsel %vm938_vm12, %v887_v31, %v946_v39  ;;  %v956_v49 = vsel %vm940_vm13, %v930_v32, %v948_v40  ;;  %v7030_v13 = vcombine.high %v1107_v0, %v1111_v1  ;;  %v7036_v4 = vcombine.high %v1114_v14, %v1118_v15  ;;  %v1130_v24 = vld [vmem:[#allocation14 + $0x540] sm:$0xff]  ;;  %v1131_v26 = vld [vmem:[#allocation14 + $0x548] sm:$0xff] }
 0x370   :  { %v8497_v51 = vpack.c.bf16 %v954_v48, %v950_v35  ;;  %v8499_v52 = vpack.c.bf16 %v956_v49, %v952_v36  ;;  %v955_v53 = vsel %vm939_vm14, %v889_v37, %v947_v41  ;;  %v957_v54 = vsel %vm941_vm15, %v932_v38, %v949_v42  ;;  %v1134_v25 = vld [vmem:[#allocation14 + $0x560] sm:$0xff]  ;;  %v1135_v27 = vld [vmem:[#allocation14 + $0x568] sm:$0xff] }
 0x371   :  { %v8501_v58 = vpack.c.bf16 %v955_v53, %v951_v43  ;;  %v8503_v59 = vpack.c.bf16 %v957_v54, %v953_v46  ;;  %v7038_v6 = vcombine.high %v1115_v16, %v1119_v17  ;;  %v7035_v20 = vcombine.low %v1114_v14, %v1118_v15  ;;  %v1138_v32 = vld [vmem:[#allocation14 + $0x580] sm:$0xff]  ;;  %v1139_v34 = vld [vmem:[#allocation14 + $0x588] sm:$0xff] }
 0x372   :  { %v7037_v21 = vcombine.low %v1115_v16, %v1119_v17  ;;  %v7046_v23 = vcombine.high %v1123_v18, %v1127_v19  ;;  %v7045_v29 = vcombine.low %v1123_v18, %v1127_v19  ;;  %v7052_v30 = vcombine.high %v1130_v24, %v1134_v25  ;;  %v1142_v33 = vld [vmem:[#allocation14 + $0x5a0] sm:$0xff]  ;;  %v1143_v35 = vld [vmem:[#allocation14 + $0x5a8] sm:$0xff] }
 0x373   :  { %2572 = vmatprep.mubr.bf16.mxu0 %v8501_v58  ;;  %2658 = vmatprep.mubr.bf16.mxu1 %v8501_v58  ;;  %v7054_v31 = vcombine.high %v1131_v26, %v1135_v27  ;;  %v7051_v36 = vcombine.low %v1130_v24, %v1134_v25  ;;  %v7053_v37 = vcombine.low %v1131_v26, %v1135_v27  ;;  %v1146_v40 = vld [vmem:[#allocation14 + $0x5c0] sm:$0xff]  ;;  %v1147_v42 = vld [vmem:[#allocation14 + $0x5c8] sm:$0xff] }
 0x374   :  { %2573 = vmatmul.mubr.bf16.vlgmr.msra.gmra.mrb[8].mxu0 %v8497_v51  ;;  %2659 = vmatmul.mubr.bf16.vlgmr.msra.gmra.mrb[8].mxu1 %v8497_v51  ;;  %v7060_v38 = vcombine.high %v1138_v32, %v1142_v33  ;;  %v7062_v39 = vcombine.high %v1139_v34, %v1143_v35  ;;  %v1150_v41 = vld [vmem:[#allocation14 + $0x5e0] sm:$0xff]  ;;  %v1151_v43 = vld [vmem:[#allocation14 + $0x5e8] sm:$0xff]  ;;  %v7059_v46 = vcombine.low %v1138_v32, %v1142_v33 }
 0x375   :  { %2584 = vmatpush1.bf16.msra.mxu0 %v7011_v7  ;;  %2670 = vmatpush1.bf16.msra.mxu1 %v7013_v8  ;;  %v1122_v7 = vld [vmem:[#allocation14 + $0x500] sm:$0xff]  ;;  %v7061_v48 = vcombine.low %v1139_v34, %v1143_v35  ;;  %v7068_v49 = vcombine.high %v1146_v40, %v1150_v41  ;;  %v7070_v50 = vcombine.high %v1147_v42, %v1151_v43  ;;  %v1163_v1 = vld [vmem:[#allocation14 + $0x648] sm:$0xff] }
 0x376   :  { %2615 = vmatprep.mubr.bf16.mxu0 %v8503_v59  ;;  %2701 = vmatprep.mubr.bf16.mxu1 %v8503_v59  ;;  %v1126_v8 = vld [vmem:[#allocation14 + $0x520] sm:$0xff]  ;;  %v7067_v57 = vcombine.low %v1146_v40, %v1150_v41  ;;  %v7069_v60 = vcombine.low %v1147_v42, %v1151_v43  ;;  %v1171_v17 = vld [vmem:[#allocation14 + $0x688] sm:$0xff] }
 0x377   :  { %2585 = vmatprep.subr.bf16.mxu0 %v7020_v61  ;;  %2671 = vmatprep.subr.bf16.mxu1 %v7022_v62  ;;  %v7044_v22 = vcombine.high %v1122_v7, %v1126_v8  ;;  %v7043_v28 = vcombine.low %v1122_v7, %v1126_v8  ;;  %v1154_v53 = vld [vmem:[#allocation14 + $0x600] sm:$0xff]  ;;  %v7078_v62 = vcombine.high %v1155_v55, %v1159_v56  ;;  %v1179_v19 = vld [vmem:[#allocation14 + $0x6c8] sm:$0xff] }
 0x378   :  { %v1158_v54 = vld [vmem:[#allocation14 + $0x620] sm:$0xff]  ;;  %v1187_v27 = vld [vmem:[#allocation14 + $0x708] sm:$0xff] }
 0x379   :  { %2586 = vmatpush1.bf16.msra.mxu0 %v7019_v5  ;;  %2672 = vmatpush1.bf16.msra.mxu1 %v7021_v9  ;;  %v7076_v61 = vcombine.high %v1154_v53, %v1158_v54  ;;  %v1166_v0 = vld [vmem:[#allocation14 + $0x660] sm:$0xff]  ;;  %v1167_v5 = vld [vmem:[#allocation14 + $0x668] sm:$0xff]  ;;  %v7075_v9 = vcombine.low %v1154_v53, %v1158_v54 }
 0x37a   :  { %2587 = vmatprep.subr.bf16.mxu0 %v7028_v11  ;;  %2673 = vmatprep.subr.bf16.mxu1 %v7030_v13  ;;  %v7077_v11 = vcombine.low %v1155_v55, %v1159_v56  ;;  %v7084_v13 = vcombine.high %v1162_v63, %v1166_v0  ;;  %v7086_v14 = vcombine.high %v1163_v1, %v1167_v5  ;;  %v1170_v15 = vld [vmem:[#allocation14 + $0x680] sm:$0xff]  ;;  %v1195_v35 = vld [vmem:[#allocation14 + $0x748] sm:$0xff] }
 0x37b   :  { %v1174_v16 = vld [vmem:[#allocation14 + $0x6a0] sm:$0xff]  ;;  %v1203_v43 = vld [vmem:[#allocation14 + $0x788] sm:$0xff] }
 0x37c   :  { %v1178_v8 = vld [vmem:[#allocation14 + $0x6c0] sm:$0xff]  ;;  %v1211_v56 = vld [vmem:[#allocation14 + $0x7c8] sm:$0xff] }
 0x37d   :  { %2588 = vmatpush1.bf16.msra.mxu0 %v7027_v2  ;;  %2674 = vmatpush1.bf16.msra.mxu1 %v7029_v3  ;;  %v1175_v2 = vld [vmem:[#allocation14 + $0x6a8] sm:$0xff]  ;;  %v7083_v3 = vcombine.low %v1162_v63, %v1166_v0  ;;  %v1182_v18 = vld [vmem:[#allocation14 + $0x6e0] sm:$0xff]  ;;  %v964_v0 = vld [vmem:[#allocation14 + $0x10] sm:$0xff] }
 0x37e   :  { %2589 = vmatprep.subr.bf16.mxu0 %v7036_v4  ;;  %2675 = vmatprep.subr.bf16.mxu1 %v7038_v6  ;;  %v7085_v4 = vcombine.low %v1163_v1, %v1167_v5  ;;  %v7092_v6 = vcombine.high %v1170_v15, %v1174_v16  ;;  %v7094_v7 = vcombine.high %v1171_v17, %v1175_v2  ;;  %v1186_v25 = vld [vmem:[#allocation14 + $0x700] sm:$0xff]  ;;  %v968_v1 = vld [vmem:[#allocation14 + $0x30] sm:$0xff]  ;;  %v965_v5 = vld [vmem:[#allocation14 + $0x18] sm:$0xff] }
 0x37f   :  { %v1190_v26 = vld [vmem:[#allocation14 + $0x720] sm:$0xff] }
 0x380   :  { %v1194_v33 = vld [vmem:[#allocation14 + $0x740] sm:$0xff] }
 0x381   :  { %2590 = vmatpush1.bf16.msra.mxu0 %v7035_v20  ;;  %2676 = vmatpush1.bf16.msra.mxu1 %v7037_v21  ;;  %v1183_v20 = vld [vmem:[#allocation14 + $0x6e8] sm:$0xff]  ;;  %v7091_v21 = vcombine.low %v1170_v15, %v1174_v16  ;;  %v1198_v34 = vld [vmem:[#allocation14 + $0x760] sm:$0xff]  ;;  %v972_v16 = vld [vmem:[#allocation14 + $0x50] sm:$0xff] }
 0x382   :  { %2591 = vmatprep.subr.bf16.mxu0 %v7044_v22  ;;  %2677 = vmatprep.subr.bf16.mxu1 %v7046_v23  ;;  %v7093_v22 = vcombine.low %v1171_v17, %v1175_v2  ;;  %v7100_v23 = vcombine.high %v1178_v8, %v1182_v18  ;;  %v7102_v24 = vcombine.high %v1179_v19, %v1183_v20  ;;  %v1202_v41 = vld [vmem:[#allocation14 + $0x780] sm:$0xff]  ;;  %v976_v17 = vld [vmem:[#allocation14 + $0x70] sm:$0xff]  ;;  %v973_v2 = vld [vmem:[#allocation14 + $0x58] sm:$0xff] }
 0x383   :  { %v1206_v42 = vld [vmem:[#allocation14 + $0x7a0] sm:$0xff] }
 0x384   :  { %v1210_v54 = vld [vmem:[#allocation14 + $0x7c0] sm:$0xff] }
 0x385   :  { %2592 = vmatpush1.bf16.msra.mxu0 %v7043_v28  ;;  %2678 = vmatpush1.bf16.msra.mxu1 %v7045_v29  ;;  %v1191_v28 = vld [vmem:[#allocation14 + $0x728] sm:$0xff]  ;;  %v7099_v29 = vcombine.low %v1178_v8, %v1182_v18  ;;  %v1214_v55 = vld [vmem:[#allocation14 + $0x7e0] sm:$0xff]  ;;  %v980_v18 = vld [vmem:[#allocation14 + $0x90] sm:$0xff] }
 0x386   :  { %2593 = vmatprep.subr.bf16.mxu0 %v7052_v30  ;;  %2679 = vmatprep.subr.bf16.mxu1 %v7054_v31  ;;  %v7101_v30 = vcombine.low %v1179_v19, %v1183_v20  ;;  %v7108_v31 = vcombine.high %v1186_v25, %v1190_v26  ;;  %v7110_v32 = vcombine.high %v1187_v27, %v1191_v28  ;;  %v984_v19 = vld [vmem:[#allocation14 + $0xb0] sm:$0xff]  ;;  %v981_v20 = vld [vmem:[#allocation14 + $0x98] sm:$0xff] }
 0x389   :  { %2594 = vmatpush1.bf16.msra.mxu0 %v7051_v36  ;;  %2680 = vmatpush1.bf16.msra.mxu1 %v7053_v37  ;;  %v1199_v36 = vld [vmem:[#allocation14 + $0x768] sm:$0xff]  ;;  %v7107_v37 = vcombine.low %v1186_v25, %v1190_v26  ;;  %v988_v26 = vld [vmem:[#allocation14 + $0xd0] sm:$0xff] }
 0x38a   :  { %2595 = vmatprep.subr.bf16.mxu0 %v7060_v38  ;;  %2681 = vmatprep.subr.bf16.mxu1 %v7062_v39  ;;  %v7109_v38 = vcombine.low %v1187_v27, %v1191_v28  ;;  %v7116_v39 = vcombine.high %v1194_v33, %v1198_v34  ;;  %v7118_v40 = vcombine.high %v1195_v35, %v1199_v36  ;;  %v992_v27 = vld [vmem:[#allocation14 + $0xf0] sm:$0xff]  ;;  %v989_v28 = vld [vmem:[#allocation14 + $0xd8] sm:$0xff] }
 0x38d   :  { %2596 = vmatpush1.bf16.msra.mxu0 %v7059_v46  ;;  %2682 = vmatpush1.bf16.msra.mxu1 %v7061_v48  ;;  %v1207_v46 = vld [vmem:[#allocation14 + $0x7a8] sm:$0xff]  ;;  %v7115_v48 = vcombine.low %v1194_v33, %v1198_v34  ;;  %v996_v34 = vld [vmem:[#allocation14 + $0x110] sm:$0xff] }
 0x38e   :  { %2597 = vmatprep.subr.bf16.mxu0 %v7068_v49  ;;  %2683 = vmatprep.subr.bf16.mxu1 %v7070_v50  ;;  %v7117_v49 = vcombine.low %v1195_v35, %v1199_v36  ;;  %v7124_v50 = vcombine.high %v1202_v41, %v1206_v42  ;;  %v7126_v53 = vcombine.high %v1203_v43, %v1207_v46  ;;  %v1000_v35 = vld [vmem:[#allocation14 + $0x130] sm:$0xff]  ;;  %v1001_v36 = vld [vmem:[#allocation14 + $0x138] sm:$0xff] }
 0x391   :  { %2598 = vmatpush1.bf16.msra.mxu0 %v7067_v57  ;;  %2684 = vmatpush1.bf16.msra.mxu1 %v7069_v60  ;;  %v1215_v57 = vld [vmem:[#allocation14 + $0x7e8] sm:$0xff]  ;;  %v7123_v60 = vcombine.low %v1202_v41, %v1206_v42  ;;  %v1004_v41 = vld [vmem:[#allocation14 + $0x150] sm:$0xff] }
 0x392   :  { %2599 = vmatprep.subr.bf16.mxu0 %v7076_v61  ;;  %2685 = vmatprep.subr.bf16.mxu1 %v7078_v62  ;;  %v7125_v61 = vcombine.low %v1203_v43, %v1207_v46  ;;  %v7132_v62 = vcombine.high %v1210_v54, %v1214_v55  ;;  %v7134_v63 = vcombine.high %v1211_v56, %v1215_v57  ;;  %v1008_v42 = vld [vmem:[#allocation14 + $0x170] sm:$0xff]  ;;  %v1005_v43 = vld [vmem:[#allocation14 + $0x158] sm:$0xff] }
 0x393   :  { %v1009_v46 = vld [vmem:[#allocation14 + $0x178] sm:$0xff] }
 0x395   :  { %2600 = vmatpush1.bf16.msra.mxu0 %v7075_v9  ;;  %2686 = vmatpush1.bf16.msra.mxu1 %v7077_v11  ;;  %v969_v9 = vld [vmem:[#allocation14 + $0x38] sm:$0xff]  ;;  %v7131_v11 = vcombine.low %v1210_v54, %v1214_v55  ;;  %v1012_v54 = vld [vmem:[#allocation14 + $0x190] sm:$0xff] }
 0x396   :  { %2601 = vmatprep.subr.bf16.mxu0 %v7084_v13  ;;  %2687 = vmatprep.subr.bf16.mxu1 %v7086_v14  ;;  %v7133_v13 = vcombine.low %v1211_v56, %v1215_v57  ;;  %v6888_v14 = vcombine.high %v964_v0, %v968_v1  ;;  %v6890_v15 = vcombine.high %v965_v5, %v969_v9  ;;  %v1016_v55 = vld [vmem:[#allocation14 + $0x1b0] sm:$0xff]  ;;  %v1013_v56 = vld [vmem:[#allocation14 + $0x198] sm:$0xff] }
 0x397   :  { %v1017_v57 = vld [vmem:[#allocation14 + $0x1b8] sm:$0xff] }
 0x399   :  { %2602 = vmatpush1.bf16.msra.mxu0 %v7083_v3  ;;  %2688 = vmatpush1.bf16.msra.mxu1 %v7085_v4  ;;  %v977_v3 = vld [vmem:[#allocation14 + $0x78] sm:$0xff]  ;;  %v6887_v4 = vcombine.low %v964_v0, %v968_v1  ;;  %v1020_v0 = vld [vmem:[#allocation14 + $0x1d0] sm:$0xff] }
 0x39a   :  { %2603 = vmatprep.subr.bf16.mxu0 %v7092_v6  ;;  %2689 = vmatprep.subr.bf16.mxu1 %v7094_v7  ;;  %v6889_v6 = vcombine.low %v965_v5, %v969_v9  ;;  %v6896_v7 = vcombine.high %v972_v16, %v976_v17  ;;  %v6898_v8 = vcombine.high %v973_v2, %v977_v3  ;;  %v1024_v1 = vld [vmem:[#allocation14 + $0x1f0] sm:$0xff]  ;;  %v1021_v5 = vld [vmem:[#allocation14 + $0x1d8] sm:$0xff] }
 0x39b   :  { %v1025_v9 = vld [vmem:[#allocation14 + $0x1f8] sm:$0xff] }
 0x39d   :  { %2604 = vmatpush1.bf16.msra.mxu0 %v7091_v21  ;;  %2690 = vmatpush1.bf16.msra.mxu1 %v7093_v22  ;;  %v985_v21 = vld [vmem:[#allocation14 + $0xb8] sm:$0xff]  ;;  %v6895_v22 = vcombine.low %v972_v16, %v976_v17  ;;  %v1028_v16 = vld [vmem:[#allocation14 + $0x210] sm:$0xff] }
 0x39e   :  { %2605 = vmatprep.subr.bf16.mxu0 %v7100_v23  ;;  %2691 = vmatprep.subr.bf16.mxu1 %v7102_v24  ;;  %v6897_v23 = vcombine.low %v973_v2, %v977_v3  ;;  %v6904_v24 = vcombine.high %v980_v18, %v984_v19  ;;  %v6906_v25 = vcombine.high %v981_v20, %v985_v21  ;;  %v1032_v17 = vld [vmem:[#allocation14 + $0x230] sm:$0xff]  ;;  %v1029_v2 = vld [vmem:[#allocation14 + $0x218] sm:$0xff] }
 0x39f   :  { %v1033_v3 = vld [vmem:[#allocation14 + $0x238] sm:$0xff] }
 0x3a1   :  { %2606 = vmatpush1.bf16.msra.mxu0 %v7099_v29  ;;  %2692 = vmatpush1.bf16.msra.mxu1 %v7101_v30  ;;  %v993_v29 = vld [vmem:[#allocation14 + $0xf8] sm:$0xff]  ;;  %v6903_v30 = vcombine.low %v980_v18, %v984_v19  ;;  %v1036_v18 = vld [vmem:[#allocation14 + $0x250] sm:$0xff] }
 0x3a2   :  { %2607 = vmatprep.subr.bf16.mxu0 %v7108_v31  ;;  %2693 = vmatprep.subr.bf16.mxu1 %v7110_v32  ;;  %v6905_v31 = vcombine.low %v981_v20, %v985_v21  ;;  %v6912_v32 = vcombine.high %v988_v26, %v992_v27  ;;  %v6914_v33 = vcombine.high %v989_v28, %v993_v29  ;;  %v1040_v19 = vld [vmem:[#allocation14 + $0x270] sm:$0xff]  ;;  %v1037_v20 = vld [vmem:[#allocation14 + $0x258] sm:$0xff] }
 0x3a3   :  { %v1041_v21 = vld [vmem:[#allocation14 + $0x278] sm:$0xff] }
 0x3a5   :  { %2608 = vmatpush1.bf16.msra.mxu0 %v7107_v37  ;;  %2694 = vmatpush1.bf16.msra.mxu1 %v7109_v38  ;;  %v6911_v37 = vcombine.low %v988_v26, %v992_v27  ;;  %v6913_v38 = vcombine.low %v989_v28, %v993_v29  ;;  %v1044_v26 = vld [vmem:[#allocation14 + $0x290] sm:$0xff]  ;;  %v1045_v28 = vld [vmem:[#allocation14 + $0x298] sm:$0xff] }
 0x3a6   :  { %2609 = vmatprep.subr.bf16.mxu0 %v7116_v39  ;;  %2695 = vmatprep.subr.bf16.mxu1 %v7118_v40  ;;  %v6920_v39 = vcombine.high %v996_v34, %v1000_v35  ;;  %v1048_v27 = vld [vmem:[#allocation14 + $0x2b0] sm:$0xff]  ;;  %v1049_v29 = vld [vmem:[#allocation14 + $0x2b8] sm:$0xff] }
 0x3a9   :  { %2610 = vmatpush1.bf16.msra.mxu0 %v7115_v48  ;;  %2696 = vmatpush1.bf16.msra.mxu1 %v7117_v49  ;;  %v6919_v48 = vcombine.low %v996_v34, %v1000_v35  ;;  %v1052_v34 = vld [vmem:[#allocation14 + $0x2d0] sm:$0xff] }
 0x3aa   :  { %2611 = vmatprep.subr.bf16.mxu0 %v7124_v50  ;;  %2697 = vmatprep.subr.bf16.mxu1 %v7126_v53  ;;  %v6928_v50 = vcombine.high %v1004_v41, %v1008_v42  ;;  %v6930_v53 = vcombine.high %v1005_v43, %v1009_v46  ;;  %v1056_v35 = vld [vmem:[#allocation14 + $0x2f0] sm:$0xff] }
 0x3ad   :  { %2612 = vmatpush1.bf16.msra.mxu0 %v7123_v60  ;;  %2698 = vmatpush1.bf16.msra.mxu1 %v7125_v61  ;;  %v6927_v60 = vcombine.low %v1004_v41, %v1008_v42  ;;  %v6929_v61 = vcombine.low %v1005_v43, %v1009_v46  ;;  %v1060_v41 = vld [vmem:[#allocation14 + $0x310] sm:$0xff]  ;;  %v1061_v43 = vld [vmem:[#allocation14 + $0x318] sm:$0xff] }
 0x3ae   :  { %2613 = vmatprep.subr.bf16.mxu0 %v7132_v62  ;;  %2699 = vmatprep.subr.bf16.mxu1 %v7134_v63  ;;  %v6936_v62 = vcombine.high %v1012_v54, %v1016_v55  ;;  %v6938_v63 = vcombine.high %v1013_v56, %v1017_v57  ;;  %v1064_v42 = vld [vmem:[#allocation14 + $0x330] sm:$0xff]  ;;  %v1065_v46 = vld [vmem:[#allocation14 + $0x338] sm:$0xff] }
 0x3b1   :  { %2614 = vmatpush1.bf16.msra.mxu0 %v7131_v11  ;;  %2700 = vmatpush1.bf16.msra.mxu1 %v7133_v13  ;;  %v6935_v11 = vcombine.low %v1012_v54, %v1016_v55  ;;  %v6937_v13 = vcombine.low %v1013_v56, %v1017_v57  ;;  %v1068_v54 = vld [vmem:[#allocation14 + $0x350] sm:$0xff]  ;;  %v1069_v56 = vld [vmem:[#allocation14 + $0x358] sm:$0xff] }
 0x3b2   :  { %2712 = vmatprep.subr.bf16.mxu0 %v6888_v14  ;;  %2798 = vmatprep.subr.bf16.mxu1 %v6890_v15  ;;  %v6944_v14 = vcombine.high %v1020_v0, %v1024_v1  ;;  %v6946_v15 = vcombine.high %v1021_v5, %v1025_v9  ;;  %v1072_v55 = vld [vmem:[#allocation14 + $0x370] sm:$0xff]  ;;  %v1073_v57 = vld [vmem:[#allocation14 + $0x378] sm:$0xff] }
 0x3b4   :  { %2616 = vmatmul.mubr.bf16.vlgmr.msra.gmra.mrb[8].mxu0 %v8499_v52  ;;  %2702 = vmatmul.mubr.bf16.vlgmr.msra.gmra.mrb[8].mxu1 %v8499_v52 }
 0x3b5   :  { %2713 = vmatpush1.bf16.msra.mxu0 %v6887_v4  ;;  %2744 = vmatprep.mubr.bf16.mxu0 %v8501_v58  ;;  %v6943_v4 = vcombine.low %v1020_v0, %v1024_v1  ;;  %v1076_v0 = vld [vmem:[#allocation14 + $0x390] sm:$0xff] }
 0x3b6   :  { %2799 = vmatpush1.bf16.msra.mxu1 %v6889_v6  ;;  %2830 = vmatprep.mubr.bf16.mxu1 %v8501_v58  ;;  %v997_v58 = vld [vmem:[#allocation14 + $0x118] sm:$0xff]  ;;  %v6945_v6 = vcombine.low %v1021_v5, %v1025_v9  ;;  %v1080_v1 = vld [vmem:[#allocation14 + $0x3b0] sm:$0xff] }
 0x3b7   :  { %2714 = vmatprep.subr.bf16.mxu0 %v6896_v7  ;;  %2800 = vmatprep.subr.bf16.mxu1 %v6898_v8  ;;  %v6922_v40 = vcombine.high %v997_v58, %v1001_v36  ;;  %v6921_v49 = vcombine.low %v997_v58, %v1001_v36  ;;  %v6952_v7 = vcombine.high %v1028_v16, %v1032_v17  ;;  %v1053_v58 = vld [vmem:[#allocation14 + $0x2d8] sm:$0xff] }
 0x3b8   :  { %v6954_v8 = vcombine.high %v1029_v2, %v1033_v3  ;;  %v1057_v36 = vld [vmem:[#allocation14 + $0x2f8] sm:$0xff] }
 0x3b9   :  { %2715 = vmatpush1.bf16.msra.mxu0 %v6895_v22  ;;  %v6951_v22 = vcombine.low %v1028_v16, %v1032_v17  ;;  %v1077_v5 = vld [vmem:[#allocation14 + $0x398] sm:$0xff]  ;;  %v1084_v16 = vld [vmem:[#allocation14 + $0x3d0] sm:$0xff] }
 0x3ba   :  { %2801 = vmatpush1.bf16.msra.mxu1 %v6897_v23  ;;  %2716 = vmatprep.subr.bf16.mxu0 %v6904_v24  ;;  %v6953_v23 = vcombine.low %v1029_v2, %v1033_v3  ;;  %v6960_v24 = vcombine.high %v1036_v18, %v1040_v19  ;;  %v1081_v9 = vld [vmem:[#allocation14 + $0x3b8] sm:$0xff]  ;;  %v1088_v17 = vld [vmem:[#allocation14 + $0x3f0] sm:$0xff] }
 0x3bb   :  { %2802 = vmatprep.subr.bf16.mxu1 %v6906_v25  ;;  %v6962_v25 = vcombine.high %v1037_v20, %v1041_v21  ;;  %v1085_v2 = vld [vmem:[#allocation14 + $0x3d8] sm:$0xff] }
 0x3bc   :  { %v1089_v3 = vld [vmem:[#allocation14 + $0x3f8] sm:$0xff] }
 0x3bd   :  { %2717 = vmatpush1.bf16.msra.mxu0 %v6903_v30  ;;  %v6959_v30 = vcombine.low %v1036_v18, %v1040_v19  ;;  %v1092_v18 = vld [vmem:[#allocation14 + $0x410] sm:$0xff] }
 0x3be   :  { %2803 = vmatpush1.bf16.msra.mxu1 %v6905_v31  ;;  %2718 = vmatprep.subr.bf16.mxu0 %v6912_v32  ;;  %v6961_v31 = vcombine.low %v1037_v20, %v1041_v21  ;;  %v6968_v32 = vcombine.high %v1044_v26, %v1048_v27  ;;  %v1096_v19 = vld [vmem:[#allocation14 + $0x430] sm:$0xff]  ;;  %v1093_v20 = vld [vmem:[#allocation14 + $0x418] sm:$0xff] }
 0x3bf   :  { %2804 = vmatprep.subr.bf16.mxu1 %v6914_v33  ;;  %v6970_v33 = vcombine.high %v1045_v28, %v1049_v29  ;;  %v1097_v21 = vld [vmem:[#allocation14 + $0x438] sm:$0xff] }
 0x3c1   :  { %2719 = vmatpush1.bf16.msra.mxu0 %v6911_v37  ;;  %v6967_v37 = vcombine.low %v1044_v26, %v1048_v27  ;;  %v1100_v26 = vld [vmem:[#allocation14 + $0x450] sm:$0xff] }
 0x3c2   :  { %2805 = vmatpush1.bf16.msra.mxu1 %v6913_v38  ;;  %2720 = vmatprep.subr.bf16.mxu0 %v6920_v39  ;;  %v6969_v38 = vcombine.low %v1045_v28, %v1049_v29  ;;  %v6976_v39 = vcombine.high %v1052_v34, %v1056_v35  ;;  %v1104_v27 = vld [vmem:[#allocation14 + $0x470] sm:$0xff]  ;;  %v7015_v28 = vcombine.low %v1092_v18, %v1096_v19  ;;  %v1101_v29 = vld [vmem:[#allocation14 + $0x458] sm:$0xff] }
 0x3c3   :  { %2806 = vmatprep.subr.bf16.mxu1 %v6922_v40  ;;  %v6978_v40 = vcombine.high %v1053_v58, %v1057_v36 }
 0x3c5   :  { %2721 = vmatpush1.bf16.msra.mxu0 %v6919_v48  ;;  %v6975_v48 = vcombine.low %v1052_v34, %v1056_v35  ;;  %v1112_v34 = vld [vmem:[#allocation14 + $0x4b0] sm:$0xff] }
 0x3c6   :  { %2807 = vmatpush1.bf16.msra.mxu1 %v6921_v49  ;;  %2722 = vmatprep.subr.bf16.mxu0 %v6928_v50  ;;  %v6977_v49 = vcombine.low %v1053_v58, %v1057_v36  ;;  %v6984_v50 = vcombine.high %v1060_v41, %v1064_v42  ;;  %v1109_v58 = vld [vmem:[#allocation14 + $0x498] sm:$0xff] }
 0x3c7   :  { %2808 = vmatprep.subr.bf16.mxu1 %v6930_v53  ;;  %v6986_v53 = vcombine.high %v1061_v43, %v1065_v46  ;;  %v1113_v36 = vld [vmem:[#allocation14 + $0x4b8] sm:$0xff] }
 0x3c9   :  { %2723 = vmatpush1.bf16.msra.mxu0 %v6927_v60  ;;  %v6983_v60 = vcombine.low %v1060_v41, %v1064_v42  ;;  %v1116_v41 = vld [vmem:[#allocation14 + $0x4d0] sm:$0xff] }
 0x3ca   :  { %2809 = vmatpush1.bf16.msra.mxu1 %v6929_v61  ;;  %2724 = vmatprep.subr.bf16.mxu0 %v6936_v62  ;;  %v6985_v61 = vcombine.low %v1061_v43, %v1065_v46  ;;  %v6992_v62 = vcombine.high %v1068_v54, %v1072_v55  ;;  %v1120_v42 = vld [vmem:[#allocation14 + $0x4f0] sm:$0xff]  ;;  %v1117_v43 = vld [vmem:[#allocation14 + $0x4d8] sm:$0xff] }
 0x3cb   :  { %2810 = vmatprep.subr.bf16.mxu1 %v6938_v63  ;;  %v6994_v63 = vcombine.high %v1069_v56, %v1073_v57  ;;  %v1121_v46 = vld [vmem:[#allocation14 + $0x4f8] sm:$0xff] }
 0x3cd   :  { %2725 = vmatpush1.bf16.msra.mxu0 %v6935_v11  ;;  %v6991_v11 = vcombine.low %v1068_v54, %v1072_v55  ;;  %v1128_v54 = vld [vmem:[#allocation14 + $0x530] sm:$0xff]  ;;  %v1125_v55 = vld [vmem:[#allocation14 + $0x518] sm:$0xff] }
 0x3ce   :  { %2811 = vmatpush1.bf16.msra.mxu1 %v6937_v13  ;;  %2726 = vmatprep.subr.bf16.mxu0 %v6944_v14  ;;  %v6993_v13 = vcombine.low %v1069_v56, %v1073_v57  ;;  %v7000_v14 = vcombine.high %v1076_v0, %v1080_v1  ;;  %v1129_v56 = vld [vmem:[#allocation14 + $0x538] sm:$0xff]  ;;  %v7041_v57 = vcombine.low %v1117_v43, %v1121_v46 }
 0x3cf   :  { %2812 = vmatprep.subr.bf16.mxu1 %v6946_v15  ;;  %v7002_v15 = vcombine.high %v1077_v5, %v1081_v9 }
 0x3d1   :  { %2727 = vmatpush1.bf16.msra.mxu0 %v6943_v4  ;;  %v6999_v4 = vcombine.low %v1076_v0, %v1080_v1  ;;  %v1133_v0 = vld [vmem:[#allocation14 + $0x558] sm:$0xff] }
 0x3d2   :  { %2813 = vmatpush1.bf16.msra.mxu1 %v6945_v6  ;;  %2728 = vmatprep.subr.bf16.mxu0 %v6952_v7  ;;  %v7001_v6 = vcombine.low %v1077_v5, %v1081_v9  ;;  %v7008_v7 = vcombine.high %v1084_v16, %v1088_v17  ;;  %v1137_v1 = vld [vmem:[#allocation14 + $0x578] sm:$0xff]  ;;  %v7049_v9 = vcombine.low %v1125_v55, %v1129_v56 }
 0x3d3   :  { %2814 = vmatprep.subr.bf16.mxu1 %v6954_v8  ;;  %v7010_v8 = vcombine.high %v1085_v2, %v1089_v3 }
 0x3d5   :  { %2729 = vmatpush1.bf16.msra.mxu0 %v6951_v22  ;;  %v7007_v22 = vcombine.low %v1084_v16, %v1088_v17  ;;  %v1141_v16 = vld [vmem:[#allocation14 + $0x598] sm:$0xff] }
 0x3d6   :  { %2815 = vmatpush1.bf16.msra.mxu1 %v6953_v23  ;;  %2730 = vmatprep.subr.bf16.mxu0 %v6960_v24  ;;  %v7009_v23 = vcombine.low %v1085_v2, %v1089_v3  ;;  %v7016_v24 = vcombine.high %v1092_v18, %v1096_v19  ;;  %v1145_v17 = vld [vmem:[#allocation14 + $0x5b8] sm:$0xff]  ;;  %v7057_v3 = vcombine.low %v1133_v0, %v1137_v1 }
 0x3d7   :  { %2816 = vmatprep.subr.bf16.mxu1 %v6962_v25  ;;  %v7018_v25 = vcombine.high %v1093_v20, %v1097_v21  ;;  %v1149_v18 = vld [vmem:[#allocation14 + $0x5d8] sm:$0xff] }
 0x3d8   :  { %v1153_v19 = vld [vmem:[#allocation14 + $0x5f8] sm:$0xff] }
 0x3d9   :  { %2731 = vmatpush1.bf16.msra.mxu0 %v6959_v30  ;;  %v1105_v30 = vld [vmem:[#allocation14 + $0x478] sm:$0xff] }
 0x3da   :  { %2817 = vmatpush1.bf16.msra.mxu1 %v6961_v31  ;;  %2732 = vmatprep.subr.bf16.mxu0 %v6968_v32  ;;  %v7017_v31 = vcombine.low %v1093_v20, %v1097_v21  ;;  %v7024_v32 = vcombine.high %v1100_v26, %v1104_v27  ;;  %v7026_v35 = vcombine.high %v1101_v29, %v1105_v30 }
 0x3db   :  { %2818 = vmatprep.subr.bf16.mxu1 %v6970_v33  ;;  %v1108_v33 = vld [vmem:[#allocation14 + $0x490] sm:$0xff]  ;;  %v7065_v21 = vcombine.low %v1141_v16, %v1145_v17 }
 0x3dd   :  { %2733 = vmatpush1.bf16.msra.mxu0 %v6967_v37  ;;  %v7023_v37 = vcombine.low %v1100_v26, %v1104_v27  ;;  %v1157_v26 = vld [vmem:[#allocation14 + $0x618] sm:$0xff] }
 0x3de   :  { %2819 = vmatpush1.bf16.msra.mxu1 %v6969_v38  ;;  %2734 = vmatprep.subr.bf16.mxu0 %v6976_v39  ;;  %v7025_v38 = vcombine.low %v1101_v29, %v1105_v30  ;;  %v7032_v39 = vcombine.high %v1108_v33, %v1112_v34  ;;  %v1161_v27 = vld [vmem:[#allocation14 + $0x638] sm:$0xff]  ;;  %v7073_v29 = vcombine.low %v1149_v18, %v1153_v19 }
 0x3df   :  { %2820 = vmatprep.subr.bf16.mxu1 %v6978_v40  ;;  %v7034_v40 = vcombine.high %v1109_v58, %v1113_v36 }
 0x3e1   :  { %2735 = vmatpush1.bf16.msra.mxu0 %v6975_v48  ;;  %v7031_v48 = vcombine.low %v1108_v33, %v1112_v34  ;;  %v1168_v33 = vld [vmem:[#allocation14 + $0x670] sm:$0xff]  ;;  %v1165_v34 = vld [vmem:[#allocation14 + $0x658] sm:$0xff] }
 0x3e2   :  { %2821 = vmatpush1.bf16.msra.mxu1 %v6977_v49  ;;  %2736 = vmatprep.subr.bf16.mxu0 %v6984_v50  ;;  %v7040_v49 = vcombine.high %v1116_v41, %v1120_v42  ;;  %v7042_v50 = vcombine.high %v1117_v43, %v1121_v46 }
 0x3e3   :  { %2822 = vmatprep.subr.bf16.mxu1 %v6986_v53  ;;  %v1124_v53 = vld [vmem:[#allocation14 + $0x510] sm:$0xff] }
 0x3e4   :  { %v7047_v5 = vcombine.low %v1124_v53, %v1128_v54 }
 0x3e5   :  { %2737 = vmatpush1.bf16.msra.mxu0 %v6983_v60  ;;  %v7048_v60 = vcombine.high %v1124_v53, %v1128_v54  ;;  %v1181_v53 = vld [vmem:[#allocation14 + $0x6d8] sm:$0xff] }
 0x3e6   :  { %2823 = vmatpush1.bf16.msra.mxu1 %v6985_v61  ;;  %2738 = vmatprep.subr.bf16.mxu0 %v6992_v62  ;;  %v7050_v61 = vcombine.high %v1125_v55, %v1129_v56  ;;  %v1132_v62 = vld [vmem:[#allocation14 + $0x550] sm:$0xff]  ;;  %v1185_v54 = vld [vmem:[#allocation14 + $0x6f8] sm:$0xff] }
 0x3e7   :  { %2824 = vmatprep.subr.bf16.mxu1 %v6994_v63  ;;  %v1136_v63 = vld [vmem:[#allocation14 + $0x570] sm:$0xff] }
 0x3e8   :  { %v7055_v2 = vcombine.low %v1132_v62, %v1136_v63 }
 0x3e9   :  { %2739 = vmatpush1.bf16.msra.mxu0 %v6991_v11  ;;  %v7056_v11 = vcombine.high %v1132_v62, %v1136_v63  ;;  %v1189_v62 = vld [vmem:[#allocation14 + $0x718] sm:$0xff] }
 0x3ea   :  { %2825 = vmatpush1.bf16.msra.mxu1 %v6993_v13  ;;  %2740 = vmatprep.subr.bf16.mxu0 %v7000_v14  ;;  %v7058_v13 = vcombine.high %v1133_v0, %v1137_v1  ;;  %v1140_v14 = vld [vmem:[#allocation14 + $0x590] sm:$0xff]  ;;  %v1193_v63 = vld [vmem:[#allocation14 + $0x738] sm:$0xff]  ;;  %v7105_v1 = vcombine.low %v1181_v53, %v1185_v54 }
 0x3eb   :  { %2826 = vmatprep.subr.bf16.mxu1 %v7002_v15  ;;  %v1144_v15 = vld [vmem:[#allocation14 + $0x5b0] sm:$0xff] }
 0x3ec   :  { %v7063_v20 = vcombine.low %v1140_v14, %v1144_v15 }
 0x3ed   :  { %2741 = vmatpush1.bf16.msra.mxu0 %v6999_v4  ;;  %v7064_v4 = vcombine.high %v1140_v14, %v1144_v15  ;;  %v1197_v14 = vld [vmem:[#allocation14 + $0x758] sm:$0xff] }
 0x3ee   :  { %2827 = vmatpush1.bf16.msra.mxu1 %v7001_v6  ;;  %2742 = vmatprep.subr.bf16.mxu0 %v7008_v7  ;;  %v7066_v6 = vcombine.high %v1141_v16, %v1145_v17  ;;  %v1148_v7 = vld [vmem:[#allocation14 + $0x5d0] sm:$0xff]  ;;  %v1201_v15 = vld [vmem:[#allocation14 + $0x778] sm:$0xff]  ;;  %v7113_v17 = vcombine.low %v1189_v62, %v1193_v63 }
 0x3ef   :  { %2828 = vmatprep.subr.bf16.mxu1 %v7010_v8  ;;  %v1152_v8 = vld [vmem:[#allocation14 + $0x5f0] sm:$0xff] }
 0x3f1   :  { %2743 = vmatpush1.bf16.msra.mxu0 %v7007_v22  ;;  %v7072_v22 = vcombine.high %v1148_v7, %v1152_v8 }
 0x3f2   :  { %2829 = vmatpush1.bf16.msra.mxu1 %v7009_v23  ;;  %2755 = vmatprep.subr.bf16.mxu0 %v7016_v24  ;;  %v7074_v23 = vcombine.high %v1149_v18, %v1153_v19  ;;  %v1156_v24 = vld [vmem:[#allocation14 + $0x610] sm:$0xff]  ;;  %v7121_v19 = vcombine.low %v1197_v14, %v1201_v15 }
 0x3f3   :  { %2841 = vmatprep.subr.bf16.mxu1 %v7018_v25  ;;  %v1160_v25 = vld [vmem:[#allocation14 + $0x630] sm:$0xff] }
 0x3f4   :  { %2745 = vmatmul.mubr.bf16.vlgmr.msra.gmra.mrb[12].mxu0 %v8497_v51  ;;  %v7080_v30 = vcombine.high %v1156_v24, %v1160_v25 }
 0x3f5   :  { %2831 = vmatmul.mubr.bf16.vlgmr.msra.gmra.mrb[12].mxu1 %v8497_v51  ;;  %2756 = vmatpush1.bf16.msra.mxu0 %v7015_v28  ;;  %v7033_v51 = vcombine.low %v1109_v58, %v1113_v36  ;;  %v7071_v28 = vcombine.low %v1148_v7, %v1152_v8  ;;  %v7079_v58 = vcombine.low %v1156_v24, %v1160_v25  ;;  %v1205_v7 = vld [vmem:[#allocation14 + $0x798] sm:$0xff] }
 0x3f6   :  { %2787 = vmatprep.mubr.bf16.mxu0 %v8503_v59  ;;  %2842 = vmatpush1.bf16.msra.mxu1 %v7017_v31  ;;  %v7082_v31 = vcombine.high %v1157_v26, %v1161_v27  ;;  %v7081_v36 = vcombine.low %v1157_v26, %v1161_v27  ;;  %v1209_v8 = vld [vmem:[#allocation14 + $0x7b8] sm:$0xff] }
 0x3f7   :  { %2873 = vmatprep.mubr.bf16.mxu1 %v8503_v59  ;;  %2757 = vmatprep.subr.bf16.mxu0 %v7024_v32  ;;  %v7039_v59 = vcombine.low %v1116_v41, %v1120_v42  ;;  %v1164_v32 = vld [vmem:[#allocation14 + $0x650] sm:$0xff]  ;;  %v1173_v41 = vld [vmem:[#allocation14 + $0x698] sm:$0xff]  ;;  %v7129_v27 = vcombine.low %v1205_v7, %v1209_v8 }
 0x3f8   :  { %2843 = vmatprep.subr.bf16.mxu1 %v7026_v35  ;;  %v1169_v35 = vld [vmem:[#allocation14 + $0x678] sm:$0xff]  ;;  %v7087_v43 = vcombine.low %v1164_v32, %v1168_v33 }
 0x3f9   :  { %2758 = vmatpush1.bf16.msra.mxu0 %v7023_v37  ;;  %v7088_v37 = vcombine.high %v1164_v32, %v1168_v33  ;;  %v1177_v42 = vld [vmem:[#allocation14 + $0x6b8] sm:$0xff]  ;;  %v7089_v46 = vcombine.low %v1165_v34, %v1169_v35  ;;  %v2941_v32 = vld [vmem:[#allocation17 + $0x8] sm:$0xff] }
 0x3fa   :  { %2844 = vmatpush1.bf16.msra.mxu1 %v7025_v38  ;;  %2759 = vmatprep.subr.bf16.mxu0 %v7032_v39  ;;  %v7090_v38 = vcombine.high %v1165_v34, %v1169_v35  ;;  %v1172_v39 = vld [vmem:[#allocation14 + $0x690] sm:$0xff]  ;;  %v7097_v56 = vcombine.low %v1173_v41, %v1177_v42  ;;  %v1213_v24 = vld [vmem:[#allocation14 + $0x7d8] sm:$0xff] }
 0x3fb   :  { %2845 = vmatprep.subr.bf16.mxu1 %v7034_v40  ;;  %v1176_v40 = vld [vmem:[#allocation14 + $0x6b0] sm:$0xff]  ;;  %v1217_v25 = vld [vmem:[#allocation14 + $0x7f8] sm:$0xff] }
 0x3fc   :  { %v7095_v55 = vcombine.low %v1172_v39, %v1176_v40  ;;  %v2945_v33 = vld [vmem:[#allocation17 + $0x28] sm:$0xff]  ;;  %v7137_v35 = vcombine.low %v1213_v24, %v1217_v25 }
 0x3fd   :  { %2760 = vmatpush1.bf16.msra.mxu0 %v7031_v48  ;;  %v7096_v48 = vcombine.high %v1172_v39, %v1176_v40  ;;  %v2949_v39 = vld [vmem:[#allocation17 + $0x48] sm:$0xff] }
 0x3fe   :  { %2846 = vmatpush1.bf16.msra.mxu1 %v7033_v51  ;;  %2761 = vmatprep.subr.bf16.mxu0 %v7040_v49  ;;  %v7098_v51 = vcombine.high %v1173_v41, %v1177_v42  ;;  %v1180_v49 = vld [vmem:[#allocation14 + $0x6d0] sm:$0xff]  ;;  %v7141_v42 = vcombine.low %v2941_v32, %v2945_v33 }
 0x3ff   :  { %2847 = vmatprep.subr.bf16.mxu1 %v7042_v50  ;;  %v1184_v50 = vld [vmem:[#allocation14 + $0x6f0] sm:$0xff] }
 0x400   :  { %v7103_v0 = vcombine.low %v1180_v49, %v1184_v50  ;;  %v2953_v40 = vld [vmem:[#allocation17 + $0x68] sm:$0xff] }
 0x401   :  { %2762 = vmatpush1.bf16.msra.mxu0 %v7039_v59  ;;  %v7104_v59 = vcombine.high %v1180_v49, %v1184_v50  ;;  %v2957_v49 = vld [vmem:[#allocation17 + $0x88] sm:$0xff] }
 0x402   :  { %2848 = vmatpush1.bf16.msra.mxu1 %v7041_v57  ;;  %2763 = vmatprep.subr.bf16.mxu0 %v7048_v60  ;;  %v7106_v57 = vcombine.high %v1181_v53, %v1185_v54  ;;  %v1188_v60 = vld [vmem:[#allocation14 + $0x710] sm:$0xff]  ;;  %v7149_v54 = vcombine.low %v2949_v39, %v2953_v40 }
 0x403   :  { %2849 = vmatprep.subr.bf16.mxu1 %v7050_v61  ;;  %v1192_v61 = vld [vmem:[#allocation14 + $0x730] sm:$0xff] }
 0x404   :  { %v7111_v16 = vcombine.low %v1188_v60, %v1192_v61  ;;  %v2961_v50 = vld [vmem:[#allocation17 + $0xa8] sm:$0xff] }
 0x405   :  { %2764 = vmatpush1.bf16.msra.mxu0 %v7047_v5  ;;  %v7112_v5 = vcombine.high %v1188_v60, %v1192_v61  ;;  %v2965_v60 = vld [vmem:[#allocation17 + $0xc8] sm:$0xff] }
 0x406   :  { %2850 = vmatpush1.bf16.msra.mxu1 %v7049_v9  ;;  %2765 = vmatprep.subr.bf16.mxu0 %v7056_v11  ;;  %v7114_v9 = vcombine.high %v1189_v62, %v1193_v63  ;;  %v1196_v11 = vld [vmem:[#allocation14 + $0x750] sm:$0xff]  ;;  %v7157_v63 = vcombine.low %v2957_v49, %v2961_v50 }
 0x407   :  { %2851 = vmatprep.subr.bf16.mxu1 %v7058_v13  ;;  %v1200_v13 = vld [vmem:[#allocation14 + $0x770] sm:$0xff] }
 0x408   :  { %v7119_v18 = vcombine.low %v1196_v11, %v1200_v13  ;;  %v2969_v61 = vld [vmem:[#allocation17 + $0xe8] sm:$0xff] }
 0x409   :  { %2766 = vmatpush1.bf16.msra.mxu0 %v7055_v2  ;;  %v7120_v2 = vcombine.high %v1196_v11, %v1200_v13  ;;  %v2977_v11 = vld [vmem:[#allocation17 + $0x128] sm:$0xff] }
 0x40a   :  { %2852 = vmatpush1.bf16.msra.mxu1 %v7057_v3  ;;  %2767 = vmatprep.subr.bf16.mxu0 %v7064_v4  ;;  %v7122_v3 = vcombine.high %v1197_v14, %v1201_v15  ;;  %v1204_v4 = vld [vmem:[#allocation14 + $0x790] sm:$0xff]  ;;  %v7165_v14 = vcombine.low %v2965_v60, %v2969_v61 }
 0x40b   :  { %2853 = vmatprep.subr.bf16.mxu1 %v7066_v6  ;;  %v1208_v6 = vld [vmem:[#allocation14 + $0x7b0] sm:$0xff] }
 0x40c   :  { %v7127_v26 = vcombine.low %v1204_v4, %v1208_v6 }
 0x40d   :  { %2768 = vmatpush1.bf16.msra.mxu0 %v7063_v20  ;;  %v7128_v20 = vcombine.high %v1204_v4, %v1208_v6  ;;  %v2985_v4 = vld [vmem:[#allocation17 + $0x168] sm:$0xff] }
 0x40e   :  { %2854 = vmatpush1.bf16.msra.mxu1 %v7065_v21  ;;  %2769 = vmatprep.subr.bf16.mxu0 %v7072_v22  ;;  %v7130_v21 = vcombine.high %v1205_v7, %v1209_v8  ;;  %v1212_v22 = vld [vmem:[#allocation14 + $0x7d0] sm:$0xff] }
 0x40f   :  { %2855 = vmatprep.subr.bf16.mxu1 %v7074_v23  ;;  %v1216_v23 = vld [vmem:[#allocation14 + $0x7f0] sm:$0xff] }
 0x410   :  { %v7135_v34 = vcombine.low %v1212_v22, %v1216_v23 }
 0x411   :  { %2770 = vmatpush1.bf16.msra.mxu0 %v7071_v28  ;;  %v7136_v28 = vcombine.high %v1212_v22, %v1216_v23  ;;  %v2993_v22 = vld [vmem:[#allocation17 + $0x1a8] sm:$0xff] }
 0x412   :  { %2856 = vmatpush1.bf16.msra.mxu1 %v7073_v29  ;;  %2771 = vmatprep.subr.bf16.mxu0 %v7080_v30  ;;  %v7138_v29 = vcombine.high %v1213_v24, %v1217_v25  ;;  %v2940_v30 = vld [vmem:[#allocation17] sm:$0xff] }
 0x413   :  { %2857 = vmatprep.subr.bf16.mxu1 %v7082_v31  ;;  %v2944_v31 = vld [vmem:[#allocation17 + $0x20] sm:$0xff] }
 0x414   :  { %v7139_v41 = vcombine.low %v2940_v30, %v2944_v31 }
 0x415   :  { %2772 = vmatpush1.bf16.msra.mxu0 %v7079_v58  ;;  %v7140_v58 = vcombine.high %v2940_v30, %v2944_v31  ;;  %v3001_v30 = vld [vmem:[#allocation17 + $0x1e8] sm:$0xff] }
 0x416   :  { %2858 = vmatpush1.bf16.msra.mxu1 %v7081_v36  ;;  %2773 = vmatprep.subr.bf16.mxu0 %v7088_v37  ;;  %v7142_v36 = vcombine.high %v2941_v32, %v2945_v33  ;;  %v2948_v37 = vld [vmem:[#allocation17 + $0x40] sm:$0xff] }
 0x417   :  { %2859 = vmatprep.subr.bf16.mxu1 %v7090_v38  ;;  %v2952_v38 = vld [vmem:[#allocation17 + $0x60] sm:$0xff] }
 0x418   :  { %v7147_v53 = vcombine.low %v2948_v37, %v2952_v38 }
 0x419   :  { %2774 = vmatpush1.bf16.msra.mxu0 %v7087_v43  ;;  %v7148_v43 = vcombine.high %v2948_v37, %v2952_v38  ;;  %v3009_v37 = vld [vmem:[#allocation17 + $0x228] sm:$0xff] }
 0x41a   :  { %2860 = vmatpush1.bf16.msra.mxu1 %v7089_v46  ;;  %2775 = vmatprep.subr.bf16.mxu0 %v7096_v48  ;;  %v7150_v46 = vcombine.high %v2949_v39, %v2953_v40  ;;  %v2956_v48 = vld [vmem:[#allocation17 + $0x80] sm:$0xff] }
 0x41b   :  { %2861 = vmatprep.subr.bf16.mxu1 %v7098_v51  ;;  %v2960_v51 = vld [vmem:[#allocation17 + $0xa0] sm:$0xff] }
 0x41c   :  { %v7155_v62 = vcombine.low %v2956_v48, %v2960_v51 }
 0x41d   :  { %2776 = vmatpush1.bf16.msra.mxu0 %v7095_v55  ;;  %v7156_v55 = vcombine.high %v2956_v48, %v2960_v51  ;;  %v3017_v48 = vld [vmem:[#allocation17 + $0x268] sm:$0xff] }
 0x41e   :  { %2862 = vmatpush1.bf16.msra.mxu1 %v7097_v56  ;;  %2777 = vmatprep.subr.bf16.mxu0 %v7104_v59  ;;  %v7158_v56 = vcombine.high %v2957_v49, %v2961_v50  ;;  %v2964_v59 = vld [vmem:[#allocation17 + $0xc0] sm:$0xff] }
 0x41f   :  { %2863 = vmatprep.subr.bf16.mxu1 %v7106_v57  ;;  %v2968_v57 = vld [vmem:[#allocation17 + $0xe0] sm:$0xff] }
 0x420   :  { %v7163_v13 = vcombine.low %v2964_v59, %v2968_v57 }
 0x421   :  { %2778 = vmatpush1.bf16.msra.mxu0 %v7103_v0  ;;  %v7164_v0 = vcombine.high %v2964_v59, %v2968_v57  ;;  %v3025_v59 = vld [vmem:[#allocation17 + $0x2a8] sm:$0xff] }
 0x422   :  { %2864 = vmatpush1.bf16.msra.mxu1 %v7105_v1  ;;  %2779 = vmatprep.subr.bf16.mxu0 %v7112_v5  ;;  %v2972_v1 = vld [vmem:[#allocation17 + $0x100] sm:$0xff] }
 0x423   :  { %2865 = vmatprep.subr.bf16.mxu1 %v7114_v9  ;;  %v2976_v5 = vld [vmem:[#allocation17 + $0x120] sm:$0xff]  ;;  %v2973_v9 = vld [vmem:[#allocation17 + $0x108] sm:$0xff] }
 0x424   :  { %v7172_v15 = vcombine.high %v2972_v1, %v2976_v5  ;;  %v7171_v6 = vcombine.low %v2972_v1, %v2976_v5  ;;  %v7173_v7 = vcombine.low %v2973_v9, %v2977_v11  ;;  %v3033_v1 = vld [vmem:[#allocation17 + $0x2e8] sm:$0xff] }
 0x425   :  { %2780 = vmatpush1.bf16.msra.mxu0 %v7111_v16  ;;  %v7174_v16 = vcombine.high %v2973_v9, %v2977_v11 }
 0x426   :  { %2866 = vmatpush1.bf16.msra.mxu1 %v7113_v17  ;;  %2781 = vmatprep.subr.bf16.mxu0 %v7120_v2  ;;  %v2980_v17 = vld [vmem:[#allocation17 + $0x140] sm:$0xff] }
 0x427   :  { %2867 = vmatprep.subr.bf16.mxu1 %v7122_v3  ;;  %v2984_v2 = vld [vmem:[#allocation17 + $0x160] sm:$0xff]  ;;  %v2981_v3 = vld [vmem:[#allocation17 + $0x148] sm:$0xff] }
 0x428   :  { %v7180_v8 = vcombine.high %v2980_v17, %v2984_v2  ;;  %v7179_v23 = vcombine.low %v2980_v17, %v2984_v2  ;;  %v7181_v24 = vcombine.low %v2981_v3, %v2985_v4  ;;  %v3041_v17 = vld [vmem:[#allocation17 + $0x328] sm:$0xff] }
 0x429   :  { %2782 = vmatpush1.bf16.msra.mxu0 %v7119_v18  ;;  %v7182_v18 = vcombine.high %v2981_v3, %v2985_v4 }
 0x42a   :  { %2868 = vmatpush1.bf16.msra.mxu1 %v7121_v19  ;;  %2783 = vmatprep.subr.bf16.mxu0 %v7128_v20  ;;  %v2988_v19 = vld [vmem:[#allocation17 + $0x180] sm:$0xff] }
 0x42b   :  { %2869 = vmatprep.subr.bf16.mxu1 %v7130_v21  ;;  %v2992_v20 = vld [vmem:[#allocation17 + $0x1a0] sm:$0xff]  ;;  %v2989_v21 = vld [vmem:[#allocation17 + $0x188] sm:$0xff] }
 0x42c   :  { %v7188_v25 = vcombine.high %v2988_v19, %v2992_v20  ;;  %v7187_v31 = vcombine.low %v2988_v19, %v2992_v20  ;;  %v7189_v32 = vcombine.low %v2989_v21, %v2993_v22  ;;  %v3049_v19 = vld [vmem:[#allocation17 + $0x368] sm:$0xff] }
 0x42d   :  { %2784 = vmatpush1.bf16.msra.mxu0 %v7127_v26  ;;  %v7190_v26 = vcombine.high %v2989_v21, %v2993_v22 }
 0x42e   :  { %2870 = vmatpush1.bf16.msra.mxu1 %v7129_v27  ;;  %2785 = vmatprep.subr.bf16.mxu0 %v7136_v28  ;;  %v2996_v27 = vld [vmem:[#allocation17 + $0x1c0] sm:$0xff] }
 0x42f   :  { %2871 = vmatprep.subr.bf16.mxu1 %v7138_v29  ;;  %v3000_v28 = vld [vmem:[#allocation17 + $0x1e0] sm:$0xff]  ;;  %v2997_v29 = vld [vmem:[#allocation17 + $0x1c8] sm:$0xff] }
 0x430   :  { %v7196_v33 = vcombine.high %v2996_v27, %v3000_v28  ;;  %v7195_v38 = vcombine.low %v2996_v27, %v3000_v28  ;;  %v7197_v39 = vcombine.low %v2997_v29, %v3001_v30  ;;  %v3057_v27 = vld [vmem:[#allocation17 + $0x3a8] sm:$0xff] }
 0x431   :  { %2786 = vmatpush1.bf16.msra.mxu0 %v7135_v34  ;;  %v7198_v34 = vcombine.high %v2997_v29, %v3001_v30 }
 0x432   :  { %2872 = vmatpush1.bf16.msra.mxu1 %v7137_v35  ;;  %6054 = vmatprep.subr.bf16.mxu0 %v7140_v58  ;;  %v3004_v35 = vld [vmem:[#allocation17 + $0x200] sm:$0xff] }
 0x433   :  { %6226 = vmatprep.subr.bf16.mxu1 %v7142_v36  ;;  %v3008_v58 = vld [vmem:[#allocation17 + $0x220] sm:$0xff]  ;;  %v3005_v36 = vld [vmem:[#allocation17 + $0x208] sm:$0xff] }
 0x434   :  { %2788 = vmatmul.mubr.bf16.vlgmr.msra.gmra.mrb[12].mxu0 %v8499_v52  ;;  %v7204_v40 = vcombine.high %v3004_v35, %v3008_v58  ;;  %v7203_v51 = vcombine.low %v3004_v35, %v3008_v58  ;;  %v7205_v49 = vcombine.low %v3005_v36, %v3009_v37  ;;  %v3065_v35 = vld [vmem:[#allocation17 + $0x3e8] sm:$0xff] }
 0x435   :  { %2874 = vmatmul.mubr.bf16.vlgmr.msra.gmra.mrb[12].mxu1 %v8499_v52  ;;  %6055 = vmatpush1.bf16.msra.mxu0 %v7139_v41  ;;  %v7166_v52 = vcombine.high %v2965_v60, %v2969_v61  ;;  %v7206_v41 = vcombine.high %v3005_v36, %v3009_v37 }
 0x436   :  { %6227 = vmatpush1.bf16.msra.mxu1 %v7141_v42  ;;  %6056 = vmatprep.subr.bf16.mxu0 %v7148_v43  ;;  %v3012_v42 = vld [vmem:[#allocation17 + $0x240] sm:$0xff] }
 0x437   :  { %6228 = vmatprep.subr.bf16.mxu1 %v7150_v46  ;;  %v3016_v43 = vld [vmem:[#allocation17 + $0x260] sm:$0xff]  ;;  %v3013_v46 = vld [vmem:[#allocation17 + $0x248] sm:$0xff] }
 0x438   :  { %v7212_v50 = vcombine.high %v3012_v42, %v3016_v43  ;;  %v7211_v57 = vcombine.low %v3012_v42, %v3016_v43  ;;  %v7213_v60 = vcombine.low %v3013_v46, %v3017_v48  ;;  %v8533_v42 = vld [vmem:[#allocation17 + $0x428] sm:$0xff] }
 0x439   :  { %6057 = vmatpush1.bf16.msra.mxu0 %v7147_v53  ;;  %v7214_v53 = vcombine.high %v3013_v46, %v3017_v48 }
 0x43a   :  { %6229 = vmatpush1.bf16.msra.mxu1 %v7149_v54  ;;  %6058 = vmatprep.subr.bf16.mxu0 %v7156_v55  ;;  %v3020_v54 = vld [vmem:[#allocation17 + $0x280] sm:$0xff] }
 0x43b   :  { %6230 = vmatprep.subr.bf16.mxu1 %v7158_v56  ;;  %v3024_v55 = vld [vmem:[#allocation17 + $0x2a0] sm:$0xff]  ;;  %v3021_v56 = vld [vmem:[#allocation17 + $0x288] sm:$0xff] }
 0x43c   :  { %v7220_v61 = vcombine.high %v3020_v54, %v3024_v55  ;;  %v7219_v5 = vcombine.low %v3020_v54, %v3024_v55  ;;  %v7221_v9 = vcombine.low %v3021_v56, %v3025_v59 }
 0x43d   :  { %6059 = vmatpush1.bf16.msra.mxu0 %v7155_v62  ;;  %v7222_v62 = vcombine.high %v3021_v56, %v3025_v59 }
 0x43e   :  { %6231 = vmatpush1.bf16.msra.mxu1 %v7157_v63  ;;  %6060 = vmatprep.subr.bf16.mxu0 %v7164_v0  ;;  %v3028_v63 = vld [vmem:[#allocation17 + $0x2c0] sm:$0xff] }
 0x43f   :  { %6232 = vmatprep.subr.bf16.mxu1 %v7166_v52  ;;  %v3032_v0 = vld [vmem:[#allocation17 + $0x2e0] sm:$0xff]  ;;  %v3029_v52 = vld [vmem:[#allocation17 + $0x2c8] sm:$0xff] }
 0x440   :  { %v7228_v11 = vcombine.high %v3028_v63, %v3032_v0  ;;  %v7227_v2 = vcombine.low %v3028_v63, %v3032_v0  ;;  %v7229_v3 = vcombine.low %v3029_v52, %v3033_v1 }
 0x441   :  { %6061 = vmatpush1.bf16.msra.mxu0 %v7163_v13  ;;  %v7230_v13 = vcombine.high %v3029_v52, %v3033_v1 }
 0x442   :  { %6233 = vmatpush1.bf16.msra.mxu1 %v7165_v14  ;;  %6062 = vmatprep.subr.bf16.mxu0 %v7172_v15  ;;  %v3036_v14 = vld [vmem:[#allocation17 + $0x300] sm:$0xff] }
 0x443   :  { %6234 = vmatprep.subr.bf16.mxu1 %v7174_v16  ;;  %v3040_v15 = vld [vmem:[#allocation17 + $0x320] sm:$0xff]  ;;  %v3037_v16 = vld [vmem:[#allocation17 + $0x308] sm:$0xff] }
 0x444   :  { %v7236_v4 = vcombine.high %v3036_v14, %v3040_v15  ;;  %v7235_v20 = vcombine.low %v3036_v14, %v3040_v15  ;;  %v7237_v21 = vcombine.low %v3037_v16, %v3041_v17 }
 0x445   :  { %6063 = vmatpush1.bf16.msra.mxu0 %v7171_v6  ;;  %v7238_v6 = vcombine.high %v3037_v16, %v3041_v17 }
 0x446   :  { %6235 = vmatpush1.bf16.msra.mxu1 %v7173_v7  ;;  %6064 = vmatprep.subr.bf16.mxu0 %v7180_v8  ;;  %v3044_v7 = vld [vmem:[#allocation17 + $0x340] sm:$0xff] }
 0x447   :  { %6236 = vmatprep.subr.bf16.mxu1 %v7182_v18  ;;  %v3048_v8 = vld [vmem:[#allocation17 + $0x360] sm:$0xff]  ;;  %v3045_v18 = vld [vmem:[#allocation17 + $0x348] sm:$0xff] }
 0x448   :  { %v7244_v22 = vcombine.high %v3044_v7, %v3048_v8  ;;  %v7243_v28 = vcombine.low %v3044_v7, %v3048_v8  ;;  %v7245_v29 = vcombine.low %v3045_v18, %v3049_v19 }
 0x449   :  { %6065 = vmatpush1.bf16.msra.mxu0 %v7179_v23  ;;  %v7246_v23 = vcombine.high %v3045_v18, %v3049_v19 }
 0x44a   :  { %6237 = vmatpush1.bf16.msra.mxu1 %v7181_v24  ;;  %6066 = vmatprep.subr.bf16.mxu0 %v7188_v25  ;;  %v3052_v24 = vld [vmem:[#allocation17 + $0x380] sm:$0xff] }
 0x44b   :  { %6238 = vmatprep.subr.bf16.mxu1 %v7190_v26  ;;  %v3056_v25 = vld [vmem:[#allocation17 + $0x3a0] sm:$0xff]  ;;  %v3053_v26 = vld [vmem:[#allocation17 + $0x388] sm:$0xff] }
 0x44c   :  { %v7252_v30 = vcombine.high %v3052_v24, %v3056_v25  ;;  %v7251_v58 = vcombine.low %v3052_v24, %v3056_v25  ;;  %v7253_v36 = vcombine.low %v3053_v26, %v3057_v27  ;;  %v3076_v24 = vld [vmem:[#allocation17 + $0x440] sm:$0xff] }
 0x44d   :  { %6067 = vmatpush1.bf16.msra.mxu0 %v7187_v31  ;;  %v7254_v31 = vcombine.high %v3053_v26, %v3057_v27 }
 0x44e   :  { %6239 = vmatpush1.bf16.msra.mxu1 %v7189_v32  ;;  %6068 = vmatprep.subr.bf16.mxu0 %v7196_v33  ;;  %v3060_v32 = vld [vmem:[#allocation17 + $0x3c0] sm:$0xff] }
 0x44f   :  { %6240 = vmatprep.subr.bf16.mxu1 %v7198_v34  ;;  %v3064_v33 = vld [vmem:[#allocation17 + $0x3e0] sm:$0xff]  ;;  %v3061_v34 = vld [vmem:[#allocation17 + $0x3c8] sm:$0xff] }
 0x450   :  { %v7260_v37 = vcombine.high %v3060_v32, %v3064_v33  ;;  %v7259_v43 = vcombine.low %v3060_v32, %v3064_v33  ;;  %v7261_v46 = vcombine.low %v3061_v34, %v3065_v35 }
 0x451   :  { %6069 = vmatpush1.bf16.msra.mxu0 %v7195_v38  ;;  %v7262_v38 = vcombine.high %v3061_v34, %v3065_v35 }
 0x452   :  { %6241 = vmatpush1.bf16.msra.mxu1 %v7197_v39  ;;  %6070 = vmatprep.subr.bf16.mxu0 %v7204_v40  ;;  %v8527_v39 = vld [vmem:[#allocation17 + $0x400] sm:$0xff] }
 0x453   :  { %6242 = vmatprep.subr.bf16.mxu1 %v7206_v41  ;;  %v8529_v40 = vld [vmem:[#allocation17 + $0x420] sm:$0xff]  ;;  %v8531_v41 = vld [vmem:[#allocation17 + $0x408] sm:$0xff] }
 0x454   :  { %v7268_v48 = vcombine.high %v8527_v39, %v8529_v40  ;;  %v7267_v34 = vcombine.low %v8527_v39, %v8529_v40  ;;  %v7269_v35 = vcombine.low %v8531_v41, %v8533_v42 }
 0x455   :  { %6071 = vmatpush1.bf16.msra.mxu0 %v7203_v51  ;;  %v7270_v51 = vcombine.high %v8531_v41, %v8533_v42 }
 0x456   :  { %6243 = vmatpush1.bf16.msra.mxu1 %v7205_v49  ;;  %6072 = vmatprep.subr.bf16.mxu0 %v7212_v50  ;;  %v8539_v49 = vld [vmem:[#allocation16] sm:$0xff] }
 0x457   :  { %6244 = vmatprep.subr.bf16.mxu1 %v7214_v53  ;;  %v1223_v50 = vrot.slane %v8539_v49, %v8462_v45  ;;  %v1231_v53 = vrot.slane %v8539_v49, %v8486_v10  ;;  %v1227_v54 = vrot.slane %v8539_v49, %v8465_v47  ;;  %v1235_v55 = vrot.slane %v8539_v49, %v8489_v12 }
 0x459   :  { %6073 = vmatpush1.bf16.msra.mxu0 %v7211_v57 }
 0x45a   :  { %6245 = vmatpush1.bf16.msra.mxu1 %v7213_v60  ;;  %6074 = vmatprep.subr.bf16.mxu0 %v7220_v61 }
 0x45b   :  { %6246 = vmatprep.subr.bf16.mxu1 %v7222_v62 }
 0x45d   :  { %6075 = vmatpush1.bf16.msra.mxu0 %v7219_v5 }
 0x45e   :  { %6247 = vmatpush1.bf16.msra.mxu1 %v7221_v9  ;;  %6076 = vmatprep.subr.bf16.mxu0 %v7228_v11 }
 0x45f   :  { %6248 = vmatprep.subr.bf16.mxu1 %v7230_v13 }
 0x461   :  { %6077 = vmatpush1.bf16.msra.mxu0 %v7227_v2 }
 0x462   :  { %6249 = vmatpush1.bf16.msra.mxu1 %v7229_v3  ;;  %6078 = vmatprep.subr.bf16.mxu0 %v7236_v4 }
 0x463   :  { %6250 = vmatprep.subr.bf16.mxu1 %v7238_v6 }
 0x465   :  { %6079 = vmatpush1.bf16.msra.mxu0 %v7235_v20 }
 0x466   :  { %6251 = vmatpush1.bf16.msra.mxu1 %v7237_v21  ;;  %6080 = vmatprep.subr.bf16.mxu0 %v7244_v22 }
 0x467   :  { %6252 = vmatprep.subr.bf16.mxu1 %v7246_v23 }
 0x469   :  { %6081 = vmatpush1.bf16.msra.mxu0 %v7243_v28 }
 0x46a   :  { %6253 = vmatpush1.bf16.msra.mxu1 %v7245_v29  ;;  %6082 = vmatprep.subr.bf16.mxu0 %v7252_v30  ;;  %v3080_v29 = vld [vmem:[#allocation17 + $0x460] sm:$0xff]  ;;  %v3077_v30 = vld [vmem:[#allocation17 + $0x448] sm:$0xff] }
 0x46b   :  { %6254 = vmatprep.subr.bf16.mxu1 %v7254_v31  ;;  %v3081_v31 = vld [vmem:[#allocation17 + $0x468] sm:$0xff]  ;;  %v7275_v39 = vcombine.low %v3076_v24, %v3080_v29 }
 0x46c   :  { %v7277_v40 = vcombine.low %v3077_v30, %v3081_v31 }
 0x46d   :  { %6083 = vmatpush1.bf16.msra.mxu0 %v7251_v58  ;;  %v3084_v58 = vld [vmem:[#allocation17 + $0x480] sm:$0xff] }
 0x46e   :  { %6255 = vmatpush1.bf16.msra.mxu1 %v7253_v36  ;;  %6084 = vmatprep.subr.bf16.mxu0 %v7260_v37  ;;  %v7276_v36 = vcombine.high %v3076_v24, %v3080_v29  ;;  %v7278_v37 = vcombine.high %v3077_v30, %v3081_v31  ;;  %v3132_v30 = vld [vmem:[#allocation17 + $0x600] sm:$0xff] }
 0x46f   :  { %6256 = vmatprep.subr.bf16.mxu1 %v7262_v38  ;;  %v3088_v38 = vld [vmem:[#allocation17 + $0x4a0] sm:$0xff] }
 0x470   :  { %v7284_v41 = vcombine.high %v3084_v58, %v3088_v38  ;;  %v3136_v31 = vld [vmem:[#allocation17 + $0x620] sm:$0xff] }
 0x471   :  { %6085 = vmatpush1.bf16.msra.mxu0 %v7259_v43  ;;  %v3085_v43 = vld [vmem:[#allocation17 + $0x488] sm:$0xff] }
 0x472   :  { %6257 = vmatpush1.bf16.msra.mxu1 %v7261_v46  ;;  %6097 = vmatprep.subr.bf16.mxu0 %v7268_v48  ;;  %v3089_v46 = vld [vmem:[#allocation17 + $0x4a8] sm:$0xff]  ;;  %v3092_v48 = vld [vmem:[#allocation17 + $0x4c0] sm:$0xff] }
 0x473   :  { %6269 = vmatprep.subr.bf16.mxu1 %v7270_v51  ;;  %v7286_v42 = vcombine.high %v3085_v43, %v3089_v46  ;;  %v3096_v51 = vld [vmem:[#allocation17 + $0x4e0] sm:$0xff] }
 0x487   :  { %v2617_v56 = vpop.f32.mrb[8].mxu0  ;;  %v2703_v59 = vpop.f32.mrb[8].mxu1 }
 0x488   :  { %v7668_v57 = vadd.f32 %v2617_v56, %v1223_v50  ;;  %v7672_v60 = vadd.f32 %v2703_v59, %v1231_v53  ;;  %v2619_v61 = vpop.f32.mrb[9].mxu0  ;;  %v2705_v62 = vpop.f32.mrb[9].mxu1  ;;  %v7292_v56 = vcombine.high %v3092_v48, %v3096_v51 }
 0x489   :  { %v7669_v63 = vadd.f32 %v2619_v61, %v1227_v54  ;;  %v7673_v0 = vadd.f32 %v2705_v62, %v1235_v55  ;;  %v2621_v52 = vpop.f32.mrb[10].mxu0  ;;  %v2707_v1 = vpop.f32.mrb[10].mxu1  ;;  %v3101_v61 = vld [vmem:[#allocation17 + $0x508] sm:$0xff] }
 0x48a   :  { %vm2884_vm0 = vcmp.gt.f32.partialorder %v7668_v57, 0.0  ;;  %v2900_v5 = vmul.f32 0.2, %v7668_v57  ;;  %vm2886_vm1 = vcmp.gt.f32.partialorder %v7672_v60, 0.0  ;;  %v2902_v9 = vmul.f32 0.2, %v7672_v60 }
 0x48b   :  { %vm2885_vm2 = vcmp.gt.f32.partialorder %v7669_v63, 0.0  ;;  %v2901_v11 = vmul.f32 0.2, %v7669_v63  ;;  %vm2887_vm3 = vcmp.gt.f32.partialorder %v7673_v0, 0.0  ;;  %v2903_v13 = vmul.f32 0.2, %v7673_v0 }
 0x48c   :  { %v7670_v14 = vadd.f32 %v2621_v52, %v1223_v50  ;;  %v7674_v15 = vadd.f32 %v2707_v1, %v1231_v53  ;;  %v2623_v16 = vpop.f32.mrb[11].mxu0  ;;  %v2709_v17 = vpop.f32.mrb[11].mxu1  ;;  %v2916_v2 = vsel %vm2884_vm0, %v7668_v57, %v2900_v5  ;;  %v2918_v3 = vsel %vm2886_vm1, %v7672_v60, %v2902_v9  ;;  %v3093_v50 = vld [vmem:[#allocation17 + $0x4c8] sm:$0xff]  ;;  %v3100_v57 = vld [vmem:[#allocation17 + $0x500] sm:$0xff] }
 0x48d   :  { %v7671_v4 = vadd.f32 %v2623_v16, %v1227_v54  ;;  %v7675_v6 = vadd.f32 %v2709_v17, %v1235_v55  ;;  %v2917_v20 = vsel %vm2885_vm2, %v7669_v63, %v2901_v11  ;;  %v2919_v21 = vsel %vm2887_vm3, %v7673_v0, %v2903_v13  ;;  %v3097_v53 = vld [vmem:[#allocation17 + $0x4e8] sm:$0xff]  ;;  %v3104_v60 = vld [vmem:[#allocation17 + $0x520] sm:$0xff] }
 0x48e   :  { %vm2892_vm4 = vcmp.gt.f32.partialorder %v7670_v14, 0.0  ;;  %v2908_v7 = vmul.f32 0.2, %v7670_v14  ;;  %vm2894_vm5 = vcmp.gt.f32.partialorder %v7674_v15, 0.0  ;;  %v2910_v8 = vmul.f32 0.2, %v7674_v15 }
 0x48f   :  { %vm2893_vm6 = vcmp.gt.f32.partialorder %v7671_v4, 0.0  ;;  %v2909_v18 = vmul.f32 0.2, %v7671_v4  ;;  %vm2895_vm7 = vcmp.gt.f32.partialorder %v7675_v6, 0.0  ;;  %v2911_v19 = vmul.f32 0.2, %v7675_v6 }
 0x490   :  { %v2924_v22 = vsel %vm2892_vm4, %v7670_v14, %v2908_v7  ;;  %v2926_v23 = vsel %vm2894_vm5, %v7674_v15, %v2910_v8  ;;  %v7283_v54 = vcombine.low %v3084_v58, %v3088_v38  ;;  %v7285_v55 = vcombine.low %v3085_v43, %v3089_v46  ;;  %v3105_v62 = vld [vmem:[#allocation17 + $0x528] sm:$0xff]  ;;  %v3108_v5 = vld [vmem:[#allocation17 + $0x540] sm:$0xff] }
 0x491   :  { %v8551_v25 = vpack.c.bf16 %v2924_v22, %v2916_v2  ;;  %v8553_v26 = vpack.c.bf16 %v2926_v23, %v2918_v3  ;;  %v2925_v27 = vsel %vm2893_vm6, %v7671_v4, %v2909_v18  ;;  %v2927_v28 = vsel %vm2895_vm7, %v7675_v6, %v2911_v19  ;;  %v3112_v9 = vld [vmem:[#allocation17 + $0x560] sm:$0xff]  ;;  %v3109_v11 = vld [vmem:[#allocation17 + $0x548] sm:$0xff] }
 0x492   :  { %v8555_v32 = vpack.c.bf16 %v2925_v27, %v2917_v20  ;;  %v8557_v33 = vpack.c.bf16 %v2927_v28, %v2919_v21  ;;  %v7294_v59 = vcombine.high %v3093_v50, %v3097_v53  ;;  %v7291_v63 = vcombine.low %v3092_v48, %v3096_v51  ;;  %v3113_v13 = vld [vmem:[#allocation17 + $0x568] sm:$0xff]  ;;  %v3116_v2 = vld [vmem:[#allocation17 + $0x580] sm:$0xff] }
 0x493   :  { %v7293_v0 = vcombine.low %v3093_v50, %v3097_v53  ;;  %v7300_v52 = vcombine.high %v3100_v57, %v3104_v60  ;;  %v7302_v1 = vcombine.high %v3101_v61, %v3105_v62  ;;  %v7299_v14 = vcombine.low %v3100_v57, %v3104_v60  ;;  %v3120_v3 = vld [vmem:[#allocation17 + $0x5a0] sm:$0xff]  ;;  %v3117_v4 = vld [vmem:[#allocation17 + $0x588] sm:$0xff] }
 0x494   :  { %6086 = vmatprep.mubr.bf16.mxu0 %v8555_v32  ;;  %6258 = vmatprep.mubr.bf16.mxu1 %v8555_v32  ;;  %v7301_v15 = vcombine.low %v3101_v61, %v3105_v62  ;;  %v7308_v16 = vcombine.high %v3108_v5, %v3112_v9  ;;  %v7310_v17 = vcombine.high %v3109_v11, %v3113_v13  ;;  %v3121_v6 = vld [vmem:[#allocation17 + $0x5a8] sm:$0xff]  ;;  %v3124_v20 = vld [vmem:[#allocation17 + $0x5c0] sm:$0xff] }
 0x495   :  { %6087 = vmatmul.mubr.bf16.vlgmr.msra.gmra.mrb[16].mxu0 %v8551_v25  ;;  %6259 = vmatmul.mubr.bf16.vlgmr.msra.gmra.mrb[16].mxu1 %v8551_v25  ;;  %v7307_v7 = vcombine.low %v3108_v5, %v3112_v9  ;;  %v7309_v8 = vcombine.low %v3109_v11, %v3113_v13  ;;  %v7316_v18 = vcombine.high %v3116_v2, %v3120_v3  ;;  %v3128_v21 = vld [vmem:[#allocation17 + $0x5e0] sm:$0xff]  ;;  %v3125_v22 = vld [vmem:[#allocation17 + $0x5c8] sm:$0xff] }
 0x496   :  { %6098 = vmatpush1.bf16.msra.mxu0 %v7267_v34  ;;  %6270 = vmatpush1.bf16.msra.mxu1 %v7269_v35  ;;  %v7318_v19 = vcombine.high %v3117_v4, %v3121_v6  ;;  %v3129_v23 = vld [vmem:[#allocation17 + $0x5e8] sm:$0xff]  ;;  %v7315_v24 = vcombine.low %v3116_v2, %v3120_v3  ;;  %v7317_v27 = vcombine.low %v3117_v4, %v3121_v6  ;;  %v3140_v43 = vld [vmem:[#allocation17 + $0x640] sm:$0xff] }
 0x497   :  { %6129 = vmatprep.mubr.bf16.mxu0 %v8557_v33  ;;  %6301 = vmatprep.mubr.bf16.mxu1 %v8557_v33  ;;  %v7324_v28 = vcombine.high %v3124_v20, %v3128_v21  ;;  %v7326_v29 = vcombine.high %v3125_v22, %v3129_v23  ;;  %v3133_v34 = vld [vmem:[#allocation17 + $0x608] sm:$0xff]  ;;  %v7323_v58 = vcombine.low %v3124_v20, %v3128_v21  ;;  %v3144_v46 = vld [vmem:[#allocation17 + $0x660] sm:$0xff] }
 0x498   :  { %6099 = vmatprep.subr.bf16.mxu0 %v7276_v36  ;;  %6271 = vmatprep.subr.bf16.mxu1 %v7278_v37  ;;  %v3137_v35 = vld [vmem:[#allocation17 + $0x628] sm:$0xff]  ;;  %v7325_v36 = vcombine.low %v3125_v22, %v3129_v23  ;;  %v7332_v37 = vcombine.high %v3132_v30, %v3136_v31  ;;  %v7340_v48 = vcombine.high %v3140_v43, %v3144_v46  ;;  %v3148_v50 = vld [vmem:[#allocation17 + $0x680] sm:$0xff] }
 0x499   :  { %v7334_v38 = vcombine.high %v3133_v34, %v3137_v35  ;;  %v3152_v53 = vld [vmem:[#allocation17 + $0x6a0] sm:$0xff] }
 0x49a   :  { %6100 = vmatpush1.bf16.msra.mxu0 %v7275_v39  ;;  %6272 = vmatpush1.bf16.msra.mxu1 %v7277_v40  ;;  %v3141_v39 = vld [vmem:[#allocation17 + $0x648] sm:$0xff]  ;;  %v7348_v57 = vcombine.high %v3148_v50, %v3152_v53  ;;  %v3156_v61 = vld [vmem:[#allocation17 + $0x6c0] sm:$0xff] }
 0x49b   :  { %6101 = vmatprep.subr.bf16.mxu0 %v7284_v41  ;;  %6273 = vmatprep.subr.bf16.mxu1 %v7286_v42  ;;  %v3145_v40 = vld [vmem:[#allocation17 + $0x668] sm:$0xff]  ;;  %v7331_v41 = vcombine.low %v3132_v30, %v3136_v31  ;;  %v7333_v42 = vcombine.low %v3133_v34, %v3137_v35  ;;  %v3160_v62 = vld [vmem:[#allocation17 + $0x6e0] sm:$0xff] }
 0x49c   :  { %v7342_v51 = vcombine.high %v3141_v39, %v3145_v40  ;;  %v7356_v5 = vcombine.high %v3156_v61, %v3160_v62  ;;  %v3164_v11 = vld [vmem:[#allocation17 + $0x700] sm:$0xff] }
 0x49d   :  { %v3168_v13 = vld [vmem:[#allocation17 + $0x720] sm:$0xff] }
 0x49e   :  { %6102 = vmatpush1.bf16.msra.mxu0 %v7283_v54  ;;  %6274 = vmatpush1.bf16.msra.mxu1 %v7285_v55  ;;  %v3149_v54 = vld [vmem:[#allocation17 + $0x688] sm:$0xff]  ;;  %v7364_v2 = vcombine.high %v3164_v11, %v3168_v13  ;;  %v3172_v4 = vld [vmem:[#allocation17 + $0x740] sm:$0xff] }
 0x49f   :  { %6103 = vmatprep.subr.bf16.mxu0 %v7292_v56  ;;  %6275 = vmatprep.subr.bf16.mxu1 %v7294_v59  ;;  %v3153_v55 = vld [vmem:[#allocation17 + $0x6a8] sm:$0xff]  ;;  %v7339_v56 = vcombine.low %v3140_v43, %v3144_v46  ;;  %v7341_v59 = vcombine.low %v3141_v39, %v3145_v40  ;;  %v3176_v6 = vld [vmem:[#allocation17 + $0x760] sm:$0xff] }
 0x4a0   :  { %v7350_v60 = vcombine.high %v3149_v54, %v3153_v55  ;;  %v7372_v20 = vcombine.high %v3172_v4, %v3176_v6  ;;  %v3180_v22 = vld [vmem:[#allocation17 + $0x780] sm:$0xff] }
 0x4a1   :  { %v3184_v23 = vld [vmem:[#allocation17 + $0x7a0] sm:$0xff] }
 0x4a2   :  { %6104 = vmatpush1.bf16.msra.mxu0 %v7291_v63  ;;  %6276 = vmatpush1.bf16.msra.mxu1 %v7293_v0  ;;  %v3157_v63 = vld [vmem:[#allocation17 + $0x6c8] sm:$0xff]  ;;  %v7380_v30 = vcombine.high %v3180_v22, %v3184_v23  ;;  %v3188_v34 = vld [vmem:[#allocation17 + $0x7c0] sm:$0xff] }
 0x4a3   :  { %6105 = vmatprep.subr.bf16.mxu0 %v7300_v52  ;;  %6277 = vmatprep.subr.bf16.mxu1 %v7302_v1  ;;  %v3161_v0 = vld [vmem:[#allocation17 + $0x6e8] sm:$0xff]  ;;  %v7347_v52 = vcombine.low %v3148_v50, %v3152_v53  ;;  %v7349_v1 = vcombine.low %v3149_v54, %v3153_v55  ;;  %v3192_v35 = vld [vmem:[#allocation17 + $0x7e0] sm:$0xff] }
 0x4a4   :  { %v7358_v9 = vcombine.high %v3157_v63, %v3161_v0  ;;  %v7388_v43 = vcombine.high %v3188_v34, %v3192_v35  ;;  %v3196_v39 = vld [vmem:[#allocation17 + $0x800] sm:$0xff] }
 0x4a5   :  { %v3200_v40 = vld [vmem:[#allocation17 + $0x820] sm:$0xff] }
 0x4a6   :  { %6106 = vmatpush1.bf16.msra.mxu0 %v7299_v14  ;;  %6278 = vmatpush1.bf16.msra.mxu1 %v7301_v15  ;;  %v3165_v14 = vld [vmem:[#allocation17 + $0x708] sm:$0xff]  ;;  %v7396_v50 = vcombine.high %v3196_v39, %v3200_v40  ;;  %v3204_v54 = vld [vmem:[#allocation17 + $0x840] sm:$0xff] }
 0x4a7   :  { %6107 = vmatprep.subr.bf16.mxu0 %v7308_v16  ;;  %6279 = vmatprep.subr.bf16.mxu1 %v7310_v17  ;;  %v3169_v15 = vld [vmem:[#allocation17 + $0x728] sm:$0xff]  ;;  %v7355_v16 = vcombine.low %v3156_v61, %v3160_v62  ;;  %v7357_v17 = vcombine.low %v3157_v63, %v3161_v0  ;;  %v3208_v55 = vld [vmem:[#allocation17 + $0x860] sm:$0xff] }
 0x4a8   :  { %v7366_v3 = vcombine.high %v3165_v14, %v3169_v15  ;;  %v7404_v61 = vcombine.high %v3204_v54, %v3208_v55  ;;  %v3212_v63 = vld [vmem:[#allocation17 + $0x880] sm:$0xff] }
 0x4a9   :  { %v3216_v0 = vld [vmem:[#allocation17 + $0x8a0] sm:$0xff] }
 0x4aa   :  { %6108 = vmatpush1.bf16.msra.mxu0 %v7307_v7  ;;  %6280 = vmatpush1.bf16.msra.mxu1 %v7309_v8  ;;  %v3173_v7 = vld [vmem:[#allocation17 + $0x748] sm:$0xff] }
 0x4ab   :  { %6109 = vmatprep.subr.bf16.mxu0 %v7316_v18  ;;  %6281 = vmatprep.subr.bf16.mxu1 %v7318_v19  ;;  %v3177_v8 = vld [vmem:[#allocation17 + $0x768] sm:$0xff]  ;;  %v7363_v18 = vcombine.low %v3164_v11, %v3168_v13  ;;  %v7365_v19 = vcombine.low %v3165_v14, %v3169_v15  ;;  %v7412_v11 = vcombine.high %v3212_v63, %v3216_v0  ;;  %v3220_v14 = vld [vmem:[#allocation17 + $0x8c0] sm:$0xff] }
 0x4ac   :  { %v7374_v21 = vcombine.high %v3173_v7, %v3177_v8  ;;  %v3224_v15 = vld [vmem:[#allocation17 + $0x8e0] sm:$0xff] }
 0x4ae   :  { %6110 = vmatpush1.bf16.msra.mxu0 %v7315_v24  ;;  %6282 = vmatpush1.bf16.msra.mxu1 %v7317_v27  ;;  %v3181_v24 = vld [vmem:[#allocation17 + $0x788] sm:$0xff] }
 0x4af   :  { %6111 = vmatprep.subr.bf16.mxu0 %v7324_v28  ;;  %6283 = vmatprep.subr.bf16.mxu1 %v7326_v29  ;;  %v3185_v27 = vld [vmem:[#allocation17 + $0x7a8] sm:$0xff]  ;;  %v7371_v28 = vcombine.low %v3172_v4, %v3176_v6  ;;  %v7373_v29 = vcombine.low %v3173_v7, %v3177_v8  ;;  %v7420_v4 = vcombine.high %v3220_v14, %v3224_v15  ;;  %v3228_v7 = vld [vmem:[#allocation17 + $0x900] sm:$0xff] }
 0x4b0   :  { %v7382_v31 = vcombine.high %v3181_v24, %v3185_v27  ;;  %v3232_v8 = vld [vmem:[#allocation17 + $0x920] sm:$0xff] }
 0x4b2   :  { %6112 = vmatpush1.bf16.msra.mxu0 %v7323_v58  ;;  %6284 = vmatpush1.bf16.msra.mxu1 %v7325_v36  ;;  %v3189_v58 = vld [vmem:[#allocation17 + $0x7c8] sm:$0xff] }
 0x4b3   :  { %6113 = vmatprep.subr.bf16.mxu0 %v7332_v37  ;;  %6285 = vmatprep.subr.bf16.mxu1 %v7334_v38  ;;  %v3193_v36 = vld [vmem:[#allocation17 + $0x7e8] sm:$0xff]  ;;  %v7379_v37 = vcombine.low %v3180_v22, %v3184_v23  ;;  %v7381_v38 = vcombine.low %v3181_v24, %v3185_v27  ;;  %v7428_v22 = vcombine.high %v3228_v7, %v3232_v8  ;;  %v3236_v24 = vld [vmem:[#allocation17 + $0x940] sm:$0xff] }
 0x4b4   :  { %v7390_v46 = vcombine.high %v3189_v58, %v3193_v36  ;;  %v3240_v27 = vld [vmem:[#allocation17 + $0x960] sm:$0xff] }
 0x4b6   :  { %6114 = vmatpush1.bf16.msra.mxu0 %v7331_v41  ;;  %6286 = vmatpush1.bf16.msra.mxu1 %v7333_v42  ;;  %v3197_v41 = vld [vmem:[#allocation17 + $0x808] sm:$0xff] }
 0x4b7   :  { %6115 = vmatprep.subr.bf16.mxu0 %v7340_v48  ;;  %6287 = vmatprep.subr.bf16.mxu1 %v7342_v51  ;;  %v3201_v42 = vld [vmem:[#allocation17 + $0x828] sm:$0xff]  ;;  %v7387_v48 = vcombine.low %v3188_v34, %v3192_v35  ;;  %v7389_v51 = vcombine.low %v3189_v58, %v3193_v36  ;;  %v7436_v34 = vcombine.high %v3236_v24, %v3240_v27  ;;  %v3244_v58 = vld [vmem:[#allocation17 + $0x980] sm:$0xff] }
 0x4b8   :  { %v7398_v53 = vcombine.high %v3197_v41, %v3201_v42  ;;  %v3248_v36 = vld [vmem:[#allocation17 + $0x9a0] sm:$0xff] }
 0x4ba   :  { %6116 = vmatpush1.bf16.msra.mxu0 %v7339_v56  ;;  %6288 = vmatpush1.bf16.msra.mxu1 %v7341_v59  ;;  %v3205_v56 = vld [vmem:[#allocation17 + $0x848] sm:$0xff] }
 0x4bb   :  { %6117 = vmatprep.subr.bf16.mxu0 %v7348_v57  ;;  %6289 = vmatprep.subr.bf16.mxu1 %v7350_v60  ;;  %v3209_v59 = vld [vmem:[#allocation17 + $0x868] sm:$0xff]  ;;  %v7395_v57 = vcombine.low %v3196_v39, %v3200_v40  ;;  %v7397_v60 = vcombine.low %v3197_v41, %v3201_v42  ;;  %v7444_v39 = vcombine.high %v3244_v58, %v3248_v36  ;;  %v3252_v41 = vld [vmem:[#allocation17 + $0x9c0] sm:$0xff] }
 0x4bc   :  { %v7406_v62 = vcombine.high %v3205_v56, %v3209_v59  ;;  %v3256_v42 = vld [vmem:[#allocation17 + $0x9e0] sm:$0xff] }
 0x4be   :  { %6118 = vmatpush1.bf16.msra.mxu0 %v7347_v52  ;;  %6290 = vmatpush1.bf16.msra.mxu1 %v7349_v1  ;;  %v3213_v52 = vld [vmem:[#allocation17 + $0x888] sm:$0xff] }
 0x4bf   :  { %6119 = vmatprep.subr.bf16.mxu0 %v7356_v5  ;;  %6291 = vmatprep.subr.bf16.mxu1 %v7358_v9  ;;  %v3217_v1 = vld [vmem:[#allocation17 + $0x8a8] sm:$0xff]  ;;  %v7403_v5 = vcombine.low %v3204_v54, %v3208_v55  ;;  %v7405_v9 = vcombine.low %v3205_v56, %v3209_v59  ;;  %v7452_v54 = vcombine.high %v3252_v41, %v3256_v42  ;;  %v3260_v56 = vld [vmem:[#allocation17 + $0xa00] sm:$0xff] }
 0x4c0   :  { %v7414_v13 = vcombine.high %v3213_v52, %v3217_v1  ;;  %v3264_v59 = vld [vmem:[#allocation17 + $0xa20] sm:$0xff] }
 0x4c2   :  { %6120 = vmatpush1.bf16.msra.mxu0 %v7355_v16  ;;  %6292 = vmatpush1.bf16.msra.mxu1 %v7357_v17  ;;  %v3221_v16 = vld [vmem:[#allocation17 + $0x8c8] sm:$0xff] }
 0x4c3   :  { %6121 = vmatprep.subr.bf16.mxu0 %v7364_v2  ;;  %6293 = vmatprep.subr.bf16.mxu1 %v7366_v3  ;;  %v3225_v17 = vld [vmem:[#allocation17 + $0x8e8] sm:$0xff]  ;;  %v7411_v2 = vcombine.low %v3212_v63, %v3216_v0  ;;  %v7413_v3 = vcombine.low %v3213_v52, %v3217_v1  ;;  %v7460_v63 = vcombine.high %v3260_v56, %v3264_v59  ;;  %v3268_v52 = vld [vmem:[#allocation17 + $0xa40] sm:$0xff] }
 0x4c4   :  { %v7422_v6 = vcombine.high %v3221_v16, %v3225_v17  ;;  %v3272_v1 = vld [vmem:[#allocation17 + $0xa60] sm:$0xff] }
 0x4c6   :  { %6122 = vmatpush1.bf16.msra.mxu0 %v7363_v18  ;;  %6294 = vmatpush1.bf16.msra.mxu1 %v7365_v19  ;;  %v3229_v18 = vld [vmem:[#allocation17 + $0x908] sm:$0xff] }
 0x4c7   :  { %6123 = vmatprep.subr.bf16.mxu0 %v7372_v20  ;;  %6295 = vmatprep.subr.bf16.mxu1 %v7374_v21  ;;  %v3233_v19 = vld [vmem:[#allocation17 + $0x928] sm:$0xff]  ;;  %v7419_v20 = vcombine.low %v3220_v14, %v3224_v15  ;;  %v7421_v21 = vcombine.low %v3221_v16, %v3225_v17  ;;  %v7468_v14 = vcombine.high %v3268_v52, %v3272_v1  ;;  %v3276_v16 = vld [vmem:[#allocation17 + $0xa80] sm:$0xff] }
 0x4c8   :  { %v7430_v23 = vcombine.high %v3229_v18, %v3233_v19  ;;  %v3280_v17 = vld [vmem:[#allocation17 + $0xaa0] sm:$0xff] }
 0x4ca   :  { %6124 = vmatpush1.bf16.msra.mxu0 %v7371_v28  ;;  %6296 = vmatpush1.bf16.msra.mxu1 %v7373_v29  ;;  %v3237_v28 = vld [vmem:[#allocation17 + $0x948] sm:$0xff] }
 0x4cb   :  { %6125 = vmatprep.subr.bf16.mxu0 %v7380_v30  ;;  %6297 = vmatprep.subr.bf16.mxu1 %v7382_v31  ;;  %v3241_v29 = vld [vmem:[#allocation17 + $0x968] sm:$0xff]  ;;  %v7427_v30 = vcombine.low %v3228_v7, %v3232_v8  ;;  %v7429_v31 = vcombine.low %v3229_v18, %v3233_v19  ;;  %v7476_v7 = vcombine.high %v3276_v16, %v3280_v17  ;;  %v3284_v18 = vld [vmem:[#allocation17 + $0xac0] sm:$0xff] }
 0x4cc   :  { %v7438_v35 = vcombine.high %v3237_v28, %v3241_v29  ;;  %v3288_v19 = vld [vmem:[#allocation17 + $0xae0] sm:$0xff] }
 0x4ce   :  { %6126 = vmatpush1.bf16.msra.mxu0 %v7379_v37  ;;  %6298 = vmatpush1.bf16.msra.mxu1 %v7381_v38  ;;  %v3245_v37 = vld [vmem:[#allocation17 + $0x988] sm:$0xff] }
 0x4cf   :  { %6127 = vmatprep.subr.bf16.mxu0 %v7388_v43  ;;  %6299 = vmatprep.subr.bf16.mxu1 %v7390_v46  ;;  %v3249_v38 = vld [vmem:[#allocation17 + $0x9a8] sm:$0xff]  ;;  %v7435_v43 = vcombine.low %v3236_v24, %v3240_v27  ;;  %v7437_v46 = vcombine.low %v3237_v28, %v3241_v29  ;;  %v7484_v24 = vcombine.high %v3284_v18, %v3288_v19  ;;  %v3292_v28 = vld [vmem:[#allocation17 + $0xb00] sm:$0xff] }
 0x4d0   :  { %v7446_v40 = vcombine.high %v3245_v37, %v3249_v38  ;;  %v3296_v29 = vld [vmem:[#allocation17 + $0xb20] sm:$0xff] }
 0x4d2   :  { %6128 = vmatpush1.bf16.msra.mxu0 %v7387_v48  ;;  %6300 = vmatpush1.bf16.msra.mxu1 %v7389_v51  ;;  %v3253_v48 = vld [vmem:[#allocation17 + $0x9c8] sm:$0xff] }
 0x4d3   :  { %6140 = vmatprep.subr.bf16.mxu0 %v7396_v50  ;;  %6312 = vmatprep.subr.bf16.mxu1 %v7398_v53  ;;  %v3257_v51 = vld [vmem:[#allocation17 + $0x9e8] sm:$0xff]  ;;  %v7443_v50 = vcombine.low %v3244_v58, %v3248_v36  ;;  %v7445_v53 = vcombine.low %v3245_v37, %v3249_v38  ;;  %v7492_v58 = vcombine.high %v3292_v28, %v3296_v29  ;;  %v3300_v37 = vld [vmem:[#allocation17 + $0xb40] sm:$0xff] }
 0x4d4   :  { %v7454_v55 = vcombine.high %v3253_v48, %v3257_v51  ;;  %v3304_v38 = vld [vmem:[#allocation17 + $0xb60] sm:$0xff] }
 0x4d5   :  { %6130 = vmatmul.mubr.bf16.vlgmr.msra.gmra.mrb[16].mxu0 %v8553_v26  ;;  %6302 = vmatmul.mubr.bf16.vlgmr.msra.gmra.mrb[16].mxu1 %v8553_v26 }
 0x4d6   :  { %6141 = vmatpush1.bf16.msra.mxu0 %v7395_v57  ;;  %6313 = vmatpush1.bf16.msra.mxu1 %v7397_v60  ;;  %v3261_v57 = vld [vmem:[#allocation17 + $0xa08] sm:$0xff] }
 0x4d7   :  { %6142 = vmatprep.subr.bf16.mxu0 %v7404_v61  ;;  %6314 = vmatprep.subr.bf16.mxu1 %v7406_v62  ;;  %v3265_v60 = vld [vmem:[#allocation17 + $0xa28] sm:$0xff]  ;;  %v7451_v61 = vcombine.low %v3252_v41, %v3256_v42  ;;  %v7453_v62 = vcombine.low %v3253_v48, %v3257_v51  ;;  %v1242_v41 = vsub.s32 5, %v8459_v44  ;;  %v7491_v42 = vcombine.low %v3292_v28, %v3296_v29 }
 0x4d8   :  { %v7462_v0 = vcombine.high %v3261_v57, %v3265_v60  ;;  %v1250_v51 = vsub.s32 7, %v8459_v44 }
 0x4da   :  { %6143 = vmatpush1.bf16.msra.mxu0 %v7403_v5  ;;  %6315 = vmatpush1.bf16.msra.mxu1 %v7405_v9  ;;  %v3269_v5 = vld [vmem:[#allocation17 + $0xa48] sm:$0xff] }
 0x4db   :  { %6144 = vmatprep.subr.bf16.mxu0 %v7412_v11  ;;  %6316 = vmatprep.subr.bf16.mxu1 %v7414_v13  ;;  %v3273_v9 = vld [vmem:[#allocation17 + $0xa68] sm:$0xff]  ;;  %v7459_v11 = vcombine.low %v3260_v56, %v3264_v59  ;;  %v7461_v13 = vcombine.low %v3261_v57, %v3265_v60  ;;  %v3312_v56 = vld [vmem:[#allocation17 + $0xba0] sm:$0xff] }
 0x4dc   :  { %v7470_v15 = vcombine.high %v3269_v5, %v3273_v9  ;;  %v3309_v59 = vld [vmem:[#allocation17 + $0xb88] sm:$0xff] }
 0x4dd   :  { %v3313_v57 = vld [vmem:[#allocation17 + $0xba8] sm:$0xff] }
 0x4de   :  { %6145 = vmatpush1.bf16.msra.mxu0 %v7411_v2  ;;  %6317 = vmatpush1.bf16.msra.mxu1 %v7413_v3  ;;  %v3277_v2 = vld [vmem:[#allocation17 + $0xa88] sm:$0xff] }
 0x4df   :  { %6146 = vmatprep.subr.bf16.mxu0 %v7420_v4  ;;  %6318 = vmatprep.subr.bf16.mxu1 %v7422_v6  ;;  %v3281_v3 = vld [vmem:[#allocation17 + $0xaa8] sm:$0xff]  ;;  %v7467_v4 = vcombine.low %v3268_v52, %v3272_v1  ;;  %v7469_v6 = vcombine.low %v3269_v5, %v3273_v9  ;;  %v8589_v52 = vld [vmem:[#allocation17 + $0xbc0] sm:$0xff] }
 0x4e0   :  { %v7478_v8 = vcombine.high %v3277_v2, %v3281_v3  ;;  %v8591_v1 = vld [vmem:[#allocation17 + $0xbe0] sm:$0xff] }
 0x4e2   :  { %6147 = vmatpush1.bf16.msra.mxu0 %v7419_v20  ;;  %6319 = vmatpush1.bf16.msra.mxu1 %v7421_v21  ;;  %v3285_v20 = vld [vmem:[#allocation17 + $0xac8] sm:$0xff] }
 0x4e3   :  { %6148 = vmatprep.subr.bf16.mxu0 %v7428_v22  ;;  %6320 = vmatprep.subr.bf16.mxu1 %v7430_v23  ;;  %v3289_v21 = vld [vmem:[#allocation17 + $0xae8] sm:$0xff]  ;;  %v7475_v22 = vcombine.low %v3276_v16, %v3280_v17  ;;  %v7477_v23 = vcombine.low %v3277_v2, %v3281_v3  ;;  %v8599_v3 = vld [vmem:[#allocation17 + $0xc00] sm:$0xff] }
 0x4e4   :  { %v7486_v27 = vcombine.high %v3285_v20, %v3289_v21 }
 0x4e6   :  { %6149 = vmatpush1.bf16.msra.mxu0 %v7427_v30  ;;  %6321 = vmatpush1.bf16.msra.mxu1 %v7429_v31  ;;  %v3293_v30 = vld [vmem:[#allocation17 + $0xb08] sm:$0xff] }
 0x4e7   :  { %6150 = vmatprep.subr.bf16.mxu0 %v7436_v34  ;;  %6322 = vmatprep.subr.bf16.mxu1 %v7438_v35  ;;  %v3297_v31 = vld [vmem:[#allocation17 + $0xb28] sm:$0xff]  ;;  %v7483_v34 = vcombine.low %v3284_v18, %v3288_v19  ;;  %v7485_v35 = vcombine.low %v3285_v20, %v3289_v21  ;;  %v7515_v19 = vcombine.low %v8589_v52, %v8591_v1 }
 0x4e8   :  { %v7494_v36 = vcombine.high %v3293_v30, %v3297_v31  ;;  %v7493_v48 = vcombine.low %v3293_v30, %v3297_v31  ;;  %v7516_v20 = vcombine.high %v8589_v52, %v8591_v1  ;;  %v8607_v21 = vld [vmem:[#allocation17 + $0xc08] sm:$0xff] }
 0x4ea   :  { %6151 = vmatpush1.bf16.msra.mxu0 %v7435_v43  ;;  %6323 = vmatpush1.bf16.msra.mxu1 %v7437_v46  ;;  %v3301_v43 = vld [vmem:[#allocation17 + $0xb48] sm:$0xff] }
 0x4eb   :  { %6152 = vmatprep.subr.bf16.mxu0 %v7444_v39  ;;  %6324 = vmatprep.subr.bf16.mxu1 %v7446_v40  ;;  %v3305_v46 = vld [vmem:[#allocation17 + $0xb68] sm:$0xff]  ;;  %v1238_v39 = vsub.s32 4, %v8459_v44  ;;  %v1246_v40 = vsub.s32 6, %v8459_v44 }
 0x4ed   :  { %v1247_v60 = vrot.slane %v8539_v49, %v1246_v40 }
 0x4ee   :  { %6153 = vmatpush1.bf16.msra.mxu0 %v7443_v50  ;;  %6325 = vmatpush1.bf16.msra.mxu1 %v7445_v53  ;;  %v7500_v50 = vcombine.high %v3300_v37, %v3304_v38  ;;  %v7502_v53 = vcombine.high %v3301_v43, %v3305_v46 }
 0x4ef   :  { %6154 = vmatprep.subr.bf16.mxu0 %v7452_v54  ;;  %6326 = vmatprep.subr.bf16.mxu1 %v7454_v55  ;;  %v8575_v54 = vld [vmem:[#allocation17 + $0xb80] sm:$0xff]  ;;  %v1239_v55 = vrot.slane %v8539_v49, %v1238_v39 }
 0x4f0   :  { %v7508_v9 = vcombine.high %v8575_v54, %v3312_v56  ;;  %v7507_v2 = vcombine.low %v8575_v54, %v3312_v56 }
 0x4f2   :  { %6155 = vmatpush1.bf16.msra.mxu0 %v7451_v61  ;;  %6327 = vmatpush1.bf16.msra.mxu1 %v7453_v62  ;;  %v1243_v61 = vrot.slane %v8539_v49, %v1242_v41  ;;  %v7499_v62 = vcombine.low %v3300_v37, %v3304_v38 }
 0x4f3   :  { %6156 = vmatprep.subr.bf16.mxu0 %v7460_v63  ;;  %6328 = vmatprep.subr.bf16.mxu1 %v7462_v0  ;;  %v7501_v63 = vcombine.low %v3301_v43, %v3305_v46  ;;  %v1251_v0 = vrot.slane %v8539_v49, %v1250_v51  ;;  %v7509_v49 = vcombine.low %v3309_v59, %v3313_v57 }
 0x4f6   :  { %6157 = vmatpush1.bf16.msra.mxu0 %v7459_v11  ;;  %6329 = vmatpush1.bf16.msra.mxu1 %v7461_v13  ;;  %v7510_v11 = vcombine.high %v3309_v59, %v3313_v57  ;;  %v8594_v13 = vld [vmem:[#allocation17 + $0xbc8] sm:$0xff] }
 0x4f7   :  { %6158 = vmatprep.subr.bf16.mxu0 %v7468_v14  ;;  %6330 = vmatprep.subr.bf16.mxu1 %v7470_v15  ;;  %v8596_v14 = vld [vmem:[#allocation17 + $0xbe8] sm:$0xff] }
 0x4f8   :  { %v7517_v30 = vcombine.low %v8594_v13, %v8596_v14  ;;  %v7518_v31 = vcombine.high %v8594_v13, %v8596_v14 }
 0x4fa   :  { %6159 = vmatpush1.bf16.msra.mxu0 %v7467_v4  ;;  %6331 = vmatpush1.bf16.msra.mxu1 %v7469_v6  ;;  %v8601_v4 = vld [vmem:[#allocation17 + $0xc20] sm:$0xff] }
 0x4fb   :  { %6160 = vmatprep.subr.bf16.mxu0 %v7476_v7  ;;  %6332 = vmatprep.subr.bf16.mxu1 %v7478_v8 }
 0x4fe   :  { %6161 = vmatpush1.bf16.msra.mxu0 %v7475_v22  ;;  %6333 = vmatpush1.bf16.msra.mxu1 %v7477_v23  ;;  %v8609_v22 = vld [vmem:[#allocation17 + $0xc28] sm:$0xff] }
 0x4ff   :  { %6162 = vmatprep.subr.bf16.mxu0 %v7484_v24  ;;  %6334 = vmatprep.subr.bf16.mxu1 %v7486_v27  ;;  %v7526_v37 = vcombine.high %v8607_v21, %v8609_v22 }
 0x502   :  { %6163 = vmatpush1.bf16.msra.mxu0 %v7483_v34  ;;  %6335 = vmatpush1.bf16.msra.mxu1 %v7485_v35  ;;  %v7523_v34 = vcombine.low %v8599_v3, %v8601_v4  ;;  %v7524_v35 = vcombine.high %v8599_v3, %v8601_v4  ;;  %v3344_v3 = vld [vmem:[#allocation17 + $0xca0] sm:$0xff]  ;;  %v3341_v4 = vld [vmem:[#allocation17 + $0xc88] sm:$0xff] }
 0x503   :  { %6164 = vmatprep.subr.bf16.mxu0 %v7492_v58  ;;  %6336 = vmatprep.subr.bf16.mxu1 %v7494_v36 }
 0x506   :  { %6165 = vmatpush1.bf16.msra.mxu0 %v7491_v42  ;;  %6337 = vmatpush1.bf16.msra.mxu1 %v7493_v48 }
 0x507   :  { %6166 = vmatprep.subr.bf16.mxu0 %v7500_v50  ;;  %6338 = vmatprep.subr.bf16.mxu1 %v7502_v53  ;;  %v2789_v5 = vpop.f32.mrb[12].mxu0 }
 0x508   :  { %v7676_v15 = vadd.f32 %v2789_v5, %v1239_v55  ;;  %v2875_v16 = vpop.f32.mrb[12].mxu1  ;;  %v2791_v17 = vpop.f32.mrb[13].mxu0  ;;  %v3336_v5 = vld [vmem:[#allocation17 + $0xc60] sm:$0xff] }
 0x509   :  { %v7680_v6 = vadd.f32 %v2875_v16, %v1247_v60  ;;  %v7677_v7 = vadd.f32 %v2791_v17, %v1243_v61  ;;  %v2877_v8 = vpop.f32.mrb[13].mxu1  ;;  %v2793_v18 = vpop.f32.mrb[14].mxu0  ;;  %v3340_v17 = vld [vmem:[#allocation17 + $0xc80] sm:$0xff] }
 0x50a   :  { %v2904_v23 = vmul.f32 0.2, %v7676_v15  ;;  %6167 = vmatpush1.bf16.msra.mxu0 %v7499_v62  ;;  %6339 = vmatpush1.bf16.msra.mxu1 %v7501_v63  ;;  %v7681_v24 = vadd.f32 %v2877_v8, %v1251_v0  ;;  %v7678_v27 = vadd.f32 %v2793_v18, %v1239_v55  ;;  %v2879_v28 = vpop.f32.mrb[14].mxu1  ;;  %v2795_v29 = vpop.f32.mrb[15].mxu0  ;;  %vm2888_vm8 = vcmp.gt.f32.partialorder %v7676_v15, 0.0  ;;  %v3332_v63 = vld [vmem:[#allocation17 + $0xc40] sm:$0xff] }
 0x50b   :  { %6168 = vmatprep.subr.bf16.mxu0 %v7508_v9  ;;  %6340 = vmatprep.subr.bf16.mxu1 %v7510_v11  ;;  %vm2890_vm9 = vcmp.gt.f32.partialorder %v7680_v6, 0.0  ;;  %v2906_v58 = vmul.f32 0.2, %v7680_v6  ;;  %v2881_v36 = vpop.f32.mrb[15].mxu1  ;;  %vm2889_vm11 = vcmp.gt.f32.partialorder %v7677_v7, 0.0  ;;  %v7682_v46 = vadd.f32 %v2879_v28, %v1247_v60  ;;  %v3333_v9 = vld [vmem:[#allocation17 + $0xc48] sm:$0xff] }
 0x50c   :  { %vm2896_vm10 = vcmp.gt.f32.partialorder %v7678_v27, 0.0  ;;  %v2905_v38 = vmul.f32 0.2, %v7677_v7  ;;  %v2912_v43 = vmul.f32 0.2, %v7678_v27  ;;  %v2920_v42 = vsel %vm2888_vm8, %v7676_v15, %v2904_v23  ;;  %v3337_v11 = vld [vmem:[#allocation17 + $0xc68] sm:$0xff] }
 0x50d   :  { %vm2891_vm12 = vcmp.gt.f32.partialorder %v7681_v24, 0.0  ;;  %v7679_v48 = vadd.f32 %v2795_v29, %v1243_v61  ;;  %v7683_v50 = vadd.f32 %v2881_v36, %v1251_v0  ;;  %v2907_v53 = vmul.f32 0.2, %v7681_v24  ;;  %v3353_v23 = vld [vmem:[#allocation17 + $0xce8] sm:$0xff] }
 0x50e   :  { %6169 = vmatpush1.bf16.msra.mxu0 %v7507_v2  ;;  %6341 = vmatpush1.bf16.msra.mxu1 %v7509_v49  ;;  %v2928_v54 = vsel %vm2896_vm10, %v7678_v27, %v2912_v43  ;;  %vm2898_vm13 = vcmp.gt.f32.partialorder %v7682_v46, 0.0  ;;  %v2914_v55 = vmul.f32 0.2, %v7682_v46  ;;  %v2922_v57 = vsel %vm2890_vm9, %v7680_v6, %v2906_v58  ;;  %v3345_v6 = vld [vmem:[#allocation17 + $0xca8] sm:$0xff]  ;;  %v3364_v43 = vld [vmem:[#allocation17 + $0xd40] sm:$0xff] }
 0x50f   :  { %6170 = vmatprep.subr.bf16.mxu0 %v7516_v20  ;;  %6342 = vmatprep.subr.bf16.mxu1 %v7518_v31  ;;  %v8621_v56 = vpack.c.bf16 %v2928_v54, %v2920_v42  ;;  %vm2897_vm14 = vcmp.gt.f32.partialorder %v7679_v48, 0.0  ;;  %v2913_v59 = vmul.f32 0.2, %v7679_v48  ;;  %vm2899_vm15 = vcmp.gt.f32.partialorder %v7683_v50, 0.0  ;;  %v3348_v20 = vld [vmem:[#allocation17 + $0xcc0] sm:$0xff]  ;;  %v3365_v42 = vld [vmem:[#allocation17 + $0xd48] sm:$0xff] }
 0x510   :  { %v2930_v60 = vsel %vm2898_vm13, %v7682_v46, %v2914_v55  ;;  %v2915_v62 = vmul.f32 0.2, %v7683_v50  ;;  %v7525_v61 = vcombine.low %v8607_v21, %v8609_v22  ;;  %v2921_v0 = vsel %vm2889_vm11, %v7677_v7, %v2905_v38  ;;  %v3352_v21 = vld [vmem:[#allocation17 + $0xce0] sm:$0xff]  ;;  %v3349_v22 = vld [vmem:[#allocation17 + $0xcc8] sm:$0xff] }
 0x511   :  { %v8627_v52 = vpack.c.bf16 %v2930_v60, %v2922_v57  ;;  %v2929_v1 = vsel %vm2897_vm14, %v7679_v48, %v2913_v59  ;;  %v2923_v13 = vsel %vm2891_vm12, %v7681_v24, %v2907_v53  ;;  %v7532_v2 = vcombine.high %v3332_v63, %v3336_v5  ;;  %v3360_v31 = vld [vmem:[#allocation17 + $0xd20] sm:$0xff]  ;;  %v3369_v48 = vld [vmem:[#allocation17 + $0xd68] sm:$0xff] }
 0x512   :  { %6171 = vmatpush1.bf16.msra.mxu0 %v7515_v19  ;;  %6343 = vmatpush1.bf16.msra.mxu1 %v7517_v30  ;;  %v8630_v14 = vpack.c.bf16 %v2929_v1, %v2921_v0  ;;  %v2931_v15 = vsel %vm2899_vm15, %v7683_v50, %v2915_v62  ;;  %v7534_v49 = vcombine.high %v3333_v9, %v3337_v11  ;;  %v3356_v30 = vld [vmem:[#allocation17 + $0xd00] sm:$0xff]  ;;  %v3373_v60 = vld [vmem:[#allocation17 + $0xd88] sm:$0xff] }
 0x513   :  { %6183 = vmatprep.subr.bf16.mxu0 %v7524_v35  ;;  %6355 = vmatprep.subr.bf16.mxu1 %v7526_v37  ;;  %v8633_v16 = vpack.c.bf16 %v2931_v15, %v2923_v13  ;;  %v7531_v7 = vcombine.low %v3332_v63, %v3336_v5  ;;  %v7533_v8 = vcombine.low %v3333_v9, %v3337_v11  ;;  %v3361_v35 = vld [vmem:[#allocation17 + $0xd28] sm:$0xff]  ;;  %v3368_v46 = vld [vmem:[#allocation17 + $0xd60] sm:$0xff] }
 0x514   :  { %6172 = vmatprep.mubr.bf16.mxu0 %v8630_v14  ;;  %6344 = vmatprep.mubr.bf16.mxu1 %v8630_v14  ;;  %v7540_v18 = vcombine.high %v3340_v17, %v3344_v3  ;;  %v7542_v19 = vcombine.high %v3341_v4, %v3345_v6  ;;  %v7539_v24 = vcombine.low %v3340_v17, %v3344_v3  ;;  %v3372_v59 = vld [vmem:[#allocation17 + $0xd80] sm:$0xff]  ;;  %v3377_v62 = vld [vmem:[#allocation17 + $0xda8] sm:$0xff] }
 0x515   :  { %6173 = vmatmul.mubr.bf16.vlgmr.msra.gmra.mrb[16].mxu0 %v8621_v56  ;;  %6345 = vmatmul.mubr.bf16.vlgmr.msra.gmra.mrb[16].mxu1 %v8621_v56  ;;  %v7541_v27 = vcombine.low %v3341_v4, %v3345_v6  ;;  %v7548_v28 = vcombine.high %v3348_v20, %v3352_v21  ;;  %v7550_v29 = vcombine.high %v3349_v22, %v3353_v23  ;;  %v3376_v57 = vld [vmem:[#allocation17 + $0xda0] sm:$0xff]  ;;  %v3381_v11 = vld [vmem:[#allocation17 + $0xdc8] sm:$0xff] }
 0x516   :  { %6184 = vmatpush1.bf16.msra.mxu0 %v7523_v34  ;;  %6356 = vmatpush1.bf16.msra.mxu1 %v7525_v61  ;;  %v3357_v34 = vld [vmem:[#allocation17 + $0xd08] sm:$0xff]  ;;  %v7547_v58 = vcombine.low %v3348_v20, %v3352_v21  ;;  %v7549_v36 = vcombine.low %v3349_v22, %v3353_v23  ;;  %v7556_v37 = vcombine.high %v3356_v30, %v3360_v31  ;;  %v3380_v5 = vld [vmem:[#allocation17 + $0xdc0] sm:$0xff] }
 0x517   :  { %6215 = vmatprep.mubr.bf16.mxu0 %v8633_v16  ;;  %6387 = vmatprep.mubr.bf16.mxu1 %v8633_v16  ;;  %v7558_v38 = vcombine.high %v3357_v34, %v3361_v35  ;;  %v7555_v50 = vcombine.low %v3356_v30, %v3360_v31  ;;  %v7557_v53 = vcombine.low %v3357_v34, %v3361_v35  ;;  %v3384_v9 = vld [vmem:[#allocation17 + $0xde0] sm:$0xff]  ;;  %v3385_v13 = vld [vmem:[#allocation17 + $0xde8] sm:$0xff] }
 0x518   :  { %6185 = vmatprep.subr.bf16.mxu0 %v7532_v2  ;;  %6357 = vmatprep.subr.bf16.mxu1 %v7534_v49  ;;  %v7564_v54 = vcombine.high %v3364_v43, %v3368_v46  ;;  %v7566_v55 = vcombine.high %v3365_v42, %v3369_v48  ;;  %v7563_v61 = vcombine.low %v3364_v43, %v3368_v46  ;;  %v3388_v3 = vld [vmem:[#allocation17 + $0xe00] sm:$0xff]  ;;  %v3389_v6 = vld [vmem:[#allocation17 + $0xe08] sm:$0xff] }
 0x519   :  { %v7565_v63 = vcombine.low %v3365_v42, %v3369_v48  ;;  %v7572_v0 = vcombine.high %v3372_v59, %v3376_v57  ;;  %v7574_v1 = vcombine.high %v3373_v60, %v3377_v62  ;;  %v7571_v15 = vcombine.low %v3372_v59, %v3376_v57  ;;  %v3392_v4 = vld [vmem:[#allocation17 + $0xe20] sm:$0xff]  ;;  %v3397_v23 = vld [vmem:[#allocation17 + $0xe48] sm:$0xff] }
 0x51a   :  { %6186 = vmatpush1.bf16.msra.mxu0 %v7531_v7  ;;  %6358 = vmatpush1.bf16.msra.mxu1 %v7533_v8  ;;  %v7573_v17 = vcombine.low %v3373_v60, %v3377_v62  ;;  %v7580_v2 = vcombine.high %v3380_v5, %v3384_v9  ;;  %v7582_v49 = vcombine.high %v3381_v11, %v3385_v13  ;;  %v3393_v7 = vld [vmem:[#allocation17 + $0xe28] sm:$0xff]  ;;  %v3396_v21 = vld [vmem:[#allocation17 + $0xe40] sm:$0xff] }
 0x51b   :  { %6187 = vmatprep.subr.bf16.mxu0 %v7540_v18  ;;  %6359 = vmatprep.subr.bf16.mxu1 %v7542_v19  ;;  %v7579_v8 = vcombine.low %v3380_v5, %v3384_v9  ;;  %v7581_v18 = vcombine.low %v3381_v11, %v3385_v13  ;;  %v7588_v19 = vcombine.high %v3388_v3, %v3392_v4  ;;  %v3400_v22 = vld [vmem:[#allocation17 + $0xe60] sm:$0xff]  ;;  %v3405_v35 = vld [vmem:[#allocation17 + $0xe88] sm:$0xff] }
 0x51c   :  { %v7590_v20 = vcombine.high %v3389_v6, %v3393_v7  ;;  %v3404_v31 = vld [vmem:[#allocation17 + $0xe80] sm:$0xff]  ;;  %v3413_v48 = vld [vmem:[#allocation17 + $0xec8] sm:$0xff] }
 0x51d   :  { %v3408_v34 = vld [vmem:[#allocation17 + $0xea0] sm:$0xff]  ;;  %v3421_v62 = vld [vmem:[#allocation17 + $0xf08] sm:$0xff] }
 0x51e   :  { %6188 = vmatpush1.bf16.msra.mxu0 %v7539_v24  ;;  %6360 = vmatpush1.bf16.msra.mxu1 %v7541_v27  ;;  %v3401_v24 = vld [vmem:[#allocation17 + $0xe68] sm:$0xff]  ;;  %v7587_v27 = vcombine.low %v3388_v3, %v3392_v4  ;;  %v3412_v46 = vld [vmem:[#allocation17 + $0xec0] sm:$0xff] }
 0x51f   :  { %6189 = vmatprep.subr.bf16.mxu0 %v7548_v28  ;;  %6361 = vmatprep.subr.bf16.mxu1 %v7550_v29  ;;  %v7589_v28 = vcombine.low %v3389_v6, %v3393_v7  ;;  %v7596_v29 = vcombine.high %v3396_v21, %v3400_v22  ;;  %v7598_v30 = vcombine.high %v3397_v23, %v3401_v24  ;;  %v3416_v42 = vld [vmem:[#allocation17 + $0xee0] sm:$0xff]  ;;  %v3429_v13 = vld [vmem:[#allocation17 + $0xf48] sm:$0xff] }
 0x520   :  { %v3420_v57 = vld [vmem:[#allocation17 + $0xf00] sm:$0xff]  ;;  %v3437_v7 = vld [vmem:[#allocation17 + $0xf88] sm:$0xff] }
 0x521   :  { %v3424_v60 = vld [vmem:[#allocation17 + $0xf20] sm:$0xff] }
 0x522   :  { %6190 = vmatpush1.bf16.msra.mxu0 %v7547_v58  ;;  %6362 = vmatpush1.bf16.msra.mxu1 %v7549_v36  ;;  %v3409_v58 = vld [vmem:[#allocation17 + $0xea8] sm:$0xff]  ;;  %v7595_v36 = vcombine.low %v3396_v21, %v3400_v22  ;;  %v3428_v9 = vld [vmem:[#allocation17 + $0xf40] sm:$0xff] }
 0x523   :  { %6191 = vmatprep.subr.bf16.mxu0 %v7556_v37  ;;  %6363 = vmatprep.subr.bf16.mxu1 %v7558_v38  ;;  %v7597_v37 = vcombine.low %v3397_v23, %v3401_v24  ;;  %v7604_v38 = vcombine.high %v3404_v31, %v3408_v34  ;;  %v7606_v43 = vcombine.high %v3405_v35, %v3409_v58  ;;  %v3432_v11 = vld [vmem:[#allocation17 + $0xf60] sm:$0xff]  ;;  %v3445_v24 = vld [vmem:[#allocation17 + $0xfc8] sm:$0xff] }
 0x524   :  { %v3436_v4 = vld [vmem:[#allocation17 + $0xf80] sm:$0xff] }
 0x525   :  { %v3440_v6 = vld [vmem:[#allocation17 + $0xfa0] sm:$0xff] }
 0x526   :  { %6192 = vmatpush1.bf16.msra.mxu0 %v7555_v50  ;;  %6364 = vmatpush1.bf16.msra.mxu1 %v7557_v53  ;;  %v3417_v50 = vld [vmem:[#allocation17 + $0xee8] sm:$0xff]  ;;  %v7603_v53 = vcombine.low %v3404_v31, %v3408_v34  ;;  %v3444_v22 = vld [vmem:[#allocation17 + $0xfc0] sm:$0xff]  ;;  %v2942_v34 = vld [vmem:[#allocation17 + $0x10] sm:$0xff] }
 0x527   :  { %6193 = vmatprep.subr.bf16.mxu0 %v7564_v54  ;;  %6365 = vmatprep.subr.bf16.mxu1 %v7566_v55  ;;  %v7605_v54 = vcombine.low %v3405_v35, %v3409_v58  ;;  %v7612_v55 = vcombine.high %v3412_v46, %v3416_v42  ;;  %v7614_v59 = vcombine.high %v3413_v48, %v3417_v50  ;;  %v3448_v23 = vld [vmem:[#allocation17 + $0xfe0] sm:$0xff]  ;;  %v2946_v35 = vld [vmem:[#allocation17 + $0x30] sm:$0xff]  ;;  %v2943_v58 = vld [vmem:[#allocation17 + $0x18] sm:$0xff] }
 0x52a   :  { %6194 = vmatpush1.bf16.msra.mxu0 %v7563_v61  ;;  %6366 = vmatpush1.bf16.msra.mxu1 %v7565_v63  ;;  %v3425_v61 = vld [vmem:[#allocation17 + $0xf28] sm:$0xff]  ;;  %v7611_v63 = vcombine.low %v3412_v46, %v3416_v42  ;;  %v2950_v42 = vld [vmem:[#allocation17 + $0x50] sm:$0xff] }
 0x52b   :  { %6195 = vmatprep.subr.bf16.mxu0 %v7572_v0  ;;  %6367 = vmatprep.subr.bf16.mxu1 %v7574_v1  ;;  %v7613_v0 = vcombine.low %v3413_v48, %v3417_v50  ;;  %v7620_v1 = vcombine.high %v3420_v57, %v3424_v60  ;;  %v7622_v5 = vcombine.high %v3421_v62, %v3425_v61  ;;  %v2954_v48 = vld [vmem:[#allocation17 + $0x70] sm:$0xff]  ;;  %v2951_v50 = vld [vmem:[#allocation17 + $0x58] sm:$0xff] }
 0x52e   :  { %6196 = vmatpush1.bf16.msra.mxu0 %v7571_v15  ;;  %6368 = vmatpush1.bf16.msra.mxu1 %v7573_v17  ;;  %v3433_v15 = vld [vmem:[#allocation17 + $0xf68] sm:$0xff]  ;;  %v7619_v17 = vcombine.low %v3420_v57, %v3424_v60  ;;  %v2958_v60 = vld [vmem:[#allocation17 + $0x90] sm:$0xff] }
 0x52f   :  { %6197 = vmatprep.subr.bf16.mxu0 %v7580_v2  ;;  %6369 = vmatprep.subr.bf16.mxu1 %v7582_v49  ;;  %v7621_v2 = vcombine.low %v3421_v62, %v3425_v61  ;;  %v7628_v49 = vcombine.high %v3428_v9, %v3432_v11  ;;  %v7630_v3 = vcombine.high %v3429_v13, %v3433_v15  ;;  %v2962_v62 = vld [vmem:[#allocation17 + $0xb0] sm:$0xff]  ;;  %v2959_v61 = vld [vmem:[#allocation17 + $0x98] sm:$0xff] }
 0x532   :  { %6198 = vmatpush1.bf16.msra.mxu0 %v7579_v8  ;;  %6370 = vmatpush1.bf16.msra.mxu1 %v7581_v18  ;;  %v3441_v8 = vld [vmem:[#allocation17 + $0xfa8] sm:$0xff]  ;;  %v7627_v18 = vcombine.low %v3428_v9, %v3432_v11  ;;  %v2966_v11 = vld [vmem:[#allocation17 + $0xd0] sm:$0xff] }
 0x533   :  { %6199 = vmatprep.subr.bf16.mxu0 %v7588_v19  ;;  %6371 = vmatprep.subr.bf16.mxu1 %v7590_v20  ;;  %v7629_v19 = vcombine.low %v3429_v13, %v3433_v15  ;;  %v7636_v20 = vcombine.high %v3436_v4, %v3440_v6  ;;  %v7638_v21 = vcombine.high %v3437_v7, %v3441_v8  ;;  %v2970_v13 = vld [vmem:[#allocation17 + $0xf0] sm:$0xff]  ;;  %v2967_v15 = vld [vmem:[#allocation17 + $0xd8] sm:$0xff] }
 0x536   :  { %6200 = vmatpush1.bf16.msra.mxu0 %v7587_v27  ;;  %6372 = vmatpush1.bf16.msra.mxu1 %v7589_v28  ;;  %v3449_v27 = vld [vmem:[#allocation17 + $0xfe8] sm:$0xff]  ;;  %v7635_v28 = vcombine.low %v3436_v4, %v3440_v6  ;;  %v2974_v6 = vld [vmem:[#allocation17 + $0x110] sm:$0xff] }
 0x537   :  { %6201 = vmatprep.subr.bf16.mxu0 %v7596_v29  ;;  %6373 = vmatprep.subr.bf16.mxu1 %v7598_v30  ;;  %v7637_v29 = vcombine.low %v3437_v7, %v3441_v8  ;;  %v7644_v30 = vcombine.high %v3444_v22, %v3448_v23  ;;  %v7646_v31 = vcombine.high %v3445_v24, %v3449_v27  ;;  %v2978_v7 = vld [vmem:[#allocation17 + $0x130] sm:$0xff]  ;;  %v2979_v8 = vld [vmem:[#allocation17 + $0x138] sm:$0xff] }
 0x53a   :  { %6202 = vmatpush1.bf16.msra.mxu0 %v7595_v36  ;;  %6374 = vmatpush1.bf16.msra.mxu1 %v7597_v37  ;;  %v2947_v36 = vld [vmem:[#allocation17 + $0x38] sm:$0xff]  ;;  %v7643_v37 = vcombine.low %v3444_v22, %v3448_v23  ;;  %v2982_v22 = vld [vmem:[#allocation17 + $0x150] sm:$0xff] }
 0x53b   :  { %6203 = vmatprep.subr.bf16.mxu0 %v7604_v38  ;;  %6375 = vmatprep.subr.bf16.mxu1 %v7606_v43  ;;  %v7645_v38 = vcombine.low %v3445_v24, %v3449_v27  ;;  %v7144_v43 = vcombine.high %v2942_v34, %v2946_v35  ;;  %v7146_v46 = vcombine.high %v2943_v58, %v2947_v36  ;;  %v2986_v23 = vld [vmem:[#allocation17 + $0x170] sm:$0xff]  ;;  %v2983_v24 = vld [vmem:[#allocation17 + $0x158] sm:$0xff] }
 0x53c   :  { %v2987_v27 = vld [vmem:[#allocation17 + $0x178] sm:$0xff] }
 0x53e   :  { %6204 = vmatpush1.bf16.msra.mxu0 %v7603_v53  ;;  %6376 = vmatpush1.bf16.msra.mxu1 %v7605_v54  ;;  %v2955_v53 = vld [vmem:[#allocation17 + $0x78] sm:$0xff]  ;;  %v7143_v54 = vcombine.low %v2942_v34, %v2946_v35  ;;  %v2990_v34 = vld [vmem:[#allocation17 + $0x190] sm:$0xff] }
 0x53f   :  { %6205 = vmatprep.subr.bf16.mxu0 %v7612_v55  ;;  %6377 = vmatprep.subr.bf16.mxu1 %v7614_v59  ;;  %v7145_v55 = vcombine.low %v2943_v58, %v2947_v36  ;;  %v7152_v59 = vcombine.high %v2950_v42, %v2954_v48  ;;  %v7154_v57 = vcombine.high %v2951_v50, %v2955_v53  ;;  %v2994_v35 = vld [vmem:[#allocation17 + $0x1b0] sm:$0xff]  ;;  %v2991_v58 = vld [vmem:[#allocation17 + $0x198] sm:$0xff] }
 0x540   :  { %v2995_v36 = vld [vmem:[#allocation17 + $0x1b8] sm:$0xff] }
 0x542   :  { %6206 = vmatpush1.bf16.msra.mxu0 %v7611_v63  ;;  %6378 = vmatpush1.bf16.msra.mxu1 %v7613_v0  ;;  %v2963_v63 = vld [vmem:[#allocation17 + $0xb8] sm:$0xff]  ;;  %v7151_v0 = vcombine.low %v2950_v42, %v2954_v48  ;;  %v2998_v42 = vld [vmem:[#allocation17 + $0x1d0] sm:$0xff] }
 0x543   :  { %6207 = vmatprep.subr.bf16.mxu0 %v7620_v1  ;;  %6379 = vmatprep.subr.bf16.mxu1 %v7622_v5  ;;  %v7153_v1 = vcombine.low %v2951_v50, %v2955_v53  ;;  %v7160_v5 = vcombine.high %v2958_v60, %v2962_v62  ;;  %v7162_v9 = vcombine.high %v2959_v61, %v2963_v63  ;;  %v3002_v48 = vld [vmem:[#allocation17 + $0x1f0] sm:$0xff]  ;;  %v2999_v50 = vld [vmem:[#allocation17 + $0x1d8] sm:$0xff] }
 0x544   :  { %v3003_v53 = vld [vmem:[#allocation17 + $0x1f8] sm:$0xff] }
 0x546   :  { %6208 = vmatpush1.bf16.msra.mxu0 %v7619_v17  ;;  %6380 = vmatpush1.bf16.msra.mxu1 %v7621_v2  ;;  %v2971_v17 = vld [vmem:[#allocation17 + $0xf8] sm:$0xff]  ;;  %v7159_v2 = vcombine.low %v2958_v60, %v2962_v62  ;;  %v3006_v60 = vld [vmem:[#allocation17 + $0x210] sm:$0xff] }
 0x547   :  { %6209 = vmatprep.subr.bf16.mxu0 %v7628_v49  ;;  %6381 = vmatprep.subr.bf16.mxu1 %v7630_v3  ;;  %v7161_v49 = vcombine.low %v2959_v61, %v2963_v63  ;;  %v7168_v3 = vcombine.high %v2966_v11, %v2970_v13  ;;  %v7170_v4 = vcombine.high %v2967_v15, %v2971_v17  ;;  %v3010_v62 = vld [vmem:[#allocation17 + $0x230] sm:$0xff]  ;;  %v3007_v61 = vld [vmem:[#allocation17 + $0x218] sm:$0xff] }
 0x548   :  { %v3011_v63 = vld [vmem:[#allocation17 + $0x238] sm:$0xff] }
 0x54a   :  { %6210 = vmatpush1.bf16.msra.mxu0 %v7627_v18  ;;  %6382 = vmatpush1.bf16.msra.mxu1 %v7629_v19  ;;  %v7167_v18 = vcombine.low %v2966_v11, %v2970_v13  ;;  %v7169_v19 = vcombine.low %v2967_v15, %v2971_v17  ;;  %v3014_v11 = vld [vmem:[#allocation17 + $0x250] sm:$0xff]  ;;  %v3015_v15 = vld [vmem:[#allocation17 + $0x258] sm:$0xff] }
 0x54b   :  { %6211 = vmatprep.subr.bf16.mxu0 %v7636_v20  ;;  %6383 = vmatprep.subr.bf16.mxu1 %v7638_v21  ;;  %v7176_v20 = vcombine.high %v2974_v6, %v2978_v7  ;;  %v3018_v13 = vld [vmem:[#allocation17 + $0x270] sm:$0xff]  ;;  %v3019_v17 = vld [vmem:[#allocation17 + $0x278] sm:$0xff] }
 0x54e   :  { %6212 = vmatpush1.bf16.msra.mxu0 %v7635_v28  ;;  %6384 = vmatpush1.bf16.msra.mxu1 %v7637_v29  ;;  %v7175_v28 = vcombine.low %v2974_v6, %v2978_v7  ;;  %v3022_v6 = vld [vmem:[#allocation17 + $0x290] sm:$0xff] }
 0x54f   :  { %6213 = vmatprep.subr.bf16.mxu0 %v7644_v30  ;;  %6385 = vmatprep.subr.bf16.mxu1 %v7646_v31  ;;  %v7184_v30 = vcombine.high %v2982_v22, %v2986_v23  ;;  %v7186_v31 = vcombine.high %v2983_v24, %v2987_v27  ;;  %v3026_v7 = vld [vmem:[#allocation17 + $0x2b0] sm:$0xff] }
 0x552   :  { %6214 = vmatpush1.bf16.msra.mxu0 %v7643_v37  ;;  %6386 = vmatpush1.bf16.msra.mxu1 %v7645_v38  ;;  %v7183_v37 = vcombine.low %v2982_v22, %v2986_v23  ;;  %v7185_v38 = vcombine.low %v2983_v24, %v2987_v27  ;;  %v3030_v22 = vld [vmem:[#allocation17 + $0x2d0] sm:$0xff]  ;;  %v3031_v24 = vld [vmem:[#allocation17 + $0x2d8] sm:$0xff] }
 0x553   :  { %6398 = vmatprep.subr.bf16.mxu0 %v7144_v43  ;;  %6570 = vmatprep.subr.bf16.mxu1 %v7146_v46  ;;  %v7192_v43 = vcombine.high %v2990_v34, %v2994_v35  ;;  %v7194_v46 = vcombine.high %v2991_v58, %v2995_v36  ;;  %v3034_v23 = vld [vmem:[#allocation17 + $0x2f0] sm:$0xff]  ;;  %v3035_v27 = vld [vmem:[#allocation17 + $0x2f8] sm:$0xff] }
 0x555   :  { %6216 = vmatmul.mubr.bf16.vlgmr.msra.gmra.mrb[16].mxu0 %v8627_v52  ;;  %6388 = vmatmul.mubr.bf16.vlgmr.msra.gmra.mrb[16].mxu1 %v8627_v52 }
 0x556   :  { %6399 = vmatpush1.bf16.msra.mxu0 %v7143_v54  ;;  %6430 = vmatprep.mubr.bf16.mxu0 %v8555_v32  ;;  %v7191_v54 = vcombine.low %v2990_v34, %v2994_v35  ;;  %v3038_v34 = vld [vmem:[#allocation17 + $0x310] sm:$0xff] }
 0x557   :  { %6571 = vmatpush1.bf16.msra.mxu1 %v7145_v55  ;;  %6602 = vmatprep.mubr.bf16.mxu1 %v8555_v32  ;;  %v2975_v32 = vld [vmem:[#allocation17 + $0x118] sm:$0xff]  ;;  %v7193_v55 = vcombine.low %v2991_v58, %v2995_v36  ;;  %v3042_v35 = vld [vmem:[#allocation17 + $0x330] sm:$0xff] }
 0x558   :  { %6400 = vmatprep.subr.bf16.mxu0 %v7152_v59  ;;  %6572 = vmatprep.subr.bf16.mxu1 %v7154_v57  ;;  %v7178_v21 = vcombine.high %v2975_v32, %v2979_v8  ;;  %v7177_v29 = vcombine.low %v2975_v32, %v2979_v8  ;;  %v7200_v59 = vcombine.high %v2998_v42, %v3002_v48  ;;  %v3023_v32 = vld [vmem:[#allocation17 + $0x298] sm:$0xff] }
 0x559   :  { %v7202_v57 = vcombine.high %v2999_v50, %v3003_v53  ;;  %v3027_v8 = vld [vmem:[#allocation17 + $0x2b8] sm:$0xff] }
 0x55a   :  { %6401 = vmatpush1.bf16.msra.mxu0 %v7151_v0  ;;  %v7199_v0 = vcombine.low %v2998_v42, %v3002_v48  ;;  %v3039_v58 = vld [vmem:[#allocation17 + $0x318] sm:$0xff]  ;;  %v3046_v42 = vld [vmem:[#allocation17 + $0x350] sm:$0xff] }
 0x55b   :  { %6573 = vmatpush1.bf16.msra.mxu1 %v7153_v1  ;;  %6402 = vmatprep.subr.bf16.mxu0 %v7160_v5  ;;  %v7201_v1 = vcombine.low %v2999_v50, %v3003_v53  ;;  %v7208_v5 = vcombine.high %v3006_v60, %v3010_v62  ;;  %v3043_v36 = vld [vmem:[#allocation17 + $0x338] sm:$0xff]  ;;  %v3050_v48 = vld [vmem:[#allocation17 + $0x370] sm:$0xff] }
 0x55c   :  { %6574 = vmatprep.subr.bf16.mxu1 %v7162_v9  ;;  %v7210_v9 = vcombine.high %v3007_v61, %v3011_v63  ;;  %v3047_v50 = vld [vmem:[#allocation17 + $0x358] sm:$0xff] }
 0x55d   :  { %v3051_v53 = vld [vmem:[#allocation17 + $0x378] sm:$0xff] }
 0x55e   :  { %6403 = vmatpush1.bf16.msra.mxu0 %v7159_v2  ;;  %v7207_v2 = vcombine.low %v3006_v60, %v3010_v62  ;;  %v3054_v60 = vld [vmem:[#allocation17 + $0x390] sm:$0xff] }
 0x55f   :  { %6575 = vmatpush1.bf16.msra.mxu1 %v7161_v49  ;;  %6404 = vmatprep.subr.bf16.mxu0 %v7168_v3  ;;  %v7209_v49 = vcombine.low %v3007_v61, %v3011_v63  ;;  %v7216_v3 = vcombine.high %v3014_v11, %v3018_v13  ;;  %v3058_v62 = vld [vmem:[#allocation17 + $0x3b0] sm:$0xff]  ;;  %v3055_v61 = vld [vmem:[#allocation17 + $0x398] sm:$0xff] }
 0x560   :  { %6576 = vmatprep.subr.bf16.mxu1 %v7170_v4  ;;  %v7218_v4 = vcombine.high %v3015_v15, %v3019_v17  ;;  %v3059_v63 = vld [vmem:[#allocation17 + $0x3b8] sm:$0xff] }
 0x562   :  { %6405 = vmatpush1.bf16.msra.mxu0 %v7167_v18  ;;  %v7215_v18 = vcombine.low %v3014_v11, %v3018_v13  ;;  %v3062_v11 = vld [vmem:[#allocation17 + $0x3d0] sm:$0xff] }
 0x563   :  { %6577 = vmatpush1.bf16.msra.mxu1 %v7169_v19  ;;  %6406 = vmatprep.subr.bf16.mxu0 %v7176_v20  ;;  %v7217_v19 = vcombine.low %v3015_v15, %v3019_v17  ;;  %v7224_v20 = vcombine.high %v3022_v6, %v3026_v7  ;;  %v3066_v13 = vld [vmem:[#allocation17 + $0x3f0] sm:$0xff]  ;;  %v3063_v15 = vld [vmem:[#allocation17 + $0x3d8] sm:$0xff] }
 0x564   :  { %6578 = vmatprep.subr.bf16.mxu1 %v7178_v21  ;;  %v7226_v21 = vcombine.high %v3023_v32, %v3027_v8  ;;  %v3067_v17 = vld [vmem:[#allocation17 + $0x3f8] sm:$0xff] }
 0x566   :  { %6407 = vmatpush1.bf16.msra.mxu0 %v7175_v28  ;;  %v7223_v28 = vcombine.low %v3022_v6, %v3026_v7  ;;  %v3070_v6 = vld [vmem:[#allocation17 + $0x410] sm:$0xff] }
 0x567   :  { %6579 = vmatpush1.bf16.msra.mxu1 %v7177_v29  ;;  %6408 = vmatprep.subr.bf16.mxu0 %v7184_v30  ;;  %v7225_v29 = vcombine.low %v3023_v32, %v3027_v8  ;;  %v7232_v30 = vcombine.high %v3030_v22, %v3034_v23  ;;  %v3074_v7 = vld [vmem:[#allocation17 + $0x430] sm:$0xff]  ;;  %v3071_v32 = vld [vmem:[#allocation17 + $0x418] sm:$0xff] }
 0x568   :  { %6580 = vmatprep.subr.bf16.mxu1 %v7186_v31  ;;  %v7234_v31 = vcombine.high %v3031_v24, %v3035_v27  ;;  %v3075_v8 = vld [vmem:[#allocation17 + $0x438] sm:$0xff] }
 0x56a   :  { %6409 = vmatpush1.bf16.msra.mxu0 %v7183_v37  ;;  %v7231_v37 = vcombine.low %v3030_v22, %v3034_v23  ;;  %v3078_v22 = vld [vmem:[#allocation17 + $0x450] sm:$0xff] }
 0x56b   :  { %6581 = vmatpush1.bf16.msra.mxu1 %v7185_v38  ;;  %6410 = vmatprep.subr.bf16.mxu0 %v7192_v43  ;;  %v7233_v38 = vcombine.low %v3031_v24, %v3035_v27  ;;  %v7240_v43 = vcombine.high %v3038_v34, %v3042_v35  ;;  %v3082_v23 = vld [vmem:[#allocation17 + $0x470] sm:$0xff]  ;;  %v7271_v24 = vcombine.low %v3070_v6, %v3074_v7  ;;  %v3079_v27 = vld [vmem:[#allocation17 + $0x458] sm:$0xff] }
 0x56c   :  { %6582 = vmatprep.subr.bf16.mxu1 %v7194_v46  ;;  %v7242_v46 = vcombine.high %v3039_v58, %v3043_v36 }
 0x56e   :  { %6411 = vmatpush1.bf16.msra.mxu0 %v7191_v54  ;;  %v7239_v54 = vcombine.low %v3038_v34, %v3042_v35  ;;  %v3090_v34 = vld [vmem:[#allocation17 + $0x4b0] sm:$0xff] }
 0x56f   :  { %6583 = vmatpush1.bf16.msra.mxu1 %v7193_v55  ;;  %6412 = vmatprep.subr.bf16.mxu0 %v7200_v59  ;;  %v7241_v55 = vcombine.low %v3039_v58, %v3043_v36  ;;  %v7248_v59 = vcombine.high %v3046_v42, %v3050_v48  ;;  %v3087_v58 = vld [vmem:[#allocation17 + $0x498] sm:$0xff] }
 0x570   :  { %6584 = vmatprep.subr.bf16.mxu1 %v7202_v57  ;;  %v7250_v57 = vcombine.high %v3047_v50, %v3051_v53  ;;  %v3091_v36 = vld [vmem:[#allocation17 + $0x4b8] sm:$0xff] }
 0x572   :  { %6413 = vmatpush1.bf16.msra.mxu0 %v7199_v0  ;;  %v7247_v0 = vcombine.low %v3046_v42, %v3050_v48  ;;  %v3094_v42 = vld [vmem:[#allocation17 + $0x4d0] sm:$0xff] }
 0x573   :  { %6585 = vmatpush1.bf16.msra.mxu1 %v7201_v1  ;;  %6414 = vmatprep.subr.bf16.mxu0 %v7208_v5  ;;  %v7249_v1 = vcombine.low %v3047_v50, %v3051_v53  ;;  %v7256_v5 = vcombine.high %v3054_v60, %v3058_v62  ;;  %v3098_v48 = vld [vmem:[#allocation17 + $0x4f0] sm:$0xff]  ;;  %v3095_v50 = vld [vmem:[#allocation17 + $0x4d8] sm:$0xff] }
 0x574   :  { %6586 = vmatprep.subr.bf16.mxu1 %v7210_v9  ;;  %v7258_v9 = vcombine.high %v3055_v61, %v3059_v63  ;;  %v3099_v53 = vld [vmem:[#allocation17 + $0x4f8] sm:$0xff] }
 0x576   :  { %6415 = vmatpush1.bf16.msra.mxu0 %v7207_v2  ;;  %v7255_v2 = vcombine.low %v3054_v60, %v3058_v62  ;;  %v3106_v60 = vld [vmem:[#allocation17 + $0x530] sm:$0xff]  ;;  %v3103_v62 = vld [vmem:[#allocation17 + $0x518] sm:$0xff] }
 0x577   :  { %6587 = vmatpush1.bf16.msra.mxu1 %v7209_v49  ;;  %6416 = vmatprep.subr.bf16.mxu0 %v7216_v3  ;;  %v7257_v49 = vcombine.low %v3055_v61, %v3059_v63  ;;  %v7264_v3 = vcombine.high %v3062_v11, %v3066_v13  ;;  %v3107_v61 = vld [vmem:[#allocation17 + $0x538] sm:$0xff]  ;;  %v7297_v63 = vcombine.low %v3095_v50, %v3099_v53 }
 0x578   :  { %6588 = vmatprep.subr.bf16.mxu1 %v7218_v4  ;;  %v7266_v4 = vcombine.high %v3063_v15, %v3067_v17 }
 0x57a   :  { %6417 = vmatpush1.bf16.msra.mxu0 %v7215_v18  ;;  %v7263_v18 = vcombine.low %v3062_v11, %v3066_v13  ;;  %v3111_v11 = vld [vmem:[#allocation17 + $0x558] sm:$0xff] }
 0x57b   :  { %6589 = vmatpush1.bf16.msra.mxu1 %v7217_v19  ;;  %6418 = vmatprep.subr.bf16.mxu0 %v7224_v20  ;;  %v7265_v19 = vcombine.low %v3063_v15, %v3067_v17  ;;  %v7272_v20 = vcombine.high %v3070_v6, %v3074_v7  ;;  %v3115_v13 = vld [vmem:[#allocation17 + $0x578] sm:$0xff]  ;;  %v7305_v17 = vcombine.low %v3103_v62, %v3107_v61 }
 0x57c   :  { %6590 = vmatprep.subr.bf16.mxu1 %v7226_v21  ;;  %v7274_v21 = vcombine.high %v3071_v32, %v3075_v8  ;;  %v3119_v6 = vld [vmem:[#allocation17 + $0x598] sm:$0xff] }
 0x57d   :  { %v3123_v7 = vld [vmem:[#allocation17 + $0x5b8] sm:$0xff] }
 0x57e   :  { %6419 = vmatpush1.bf16.msra.mxu0 %v7223_v28  ;;  %v3083_v28 = vld [vmem:[#allocation17 + $0x478] sm:$0xff] }
 0x57f   :  { %6591 = vmatpush1.bf16.msra.mxu1 %v7225_v29  ;;  %6420 = vmatprep.subr.bf16.mxu0 %v7232_v30  ;;  %v7273_v29 = vcombine.low %v3071_v32, %v3075_v8  ;;  %v7280_v30 = vcombine.high %v3078_v22, %v3082_v23  ;;  %v7282_v35 = vcombine.high %v3079_v27, %v3083_v28 }
 0x580   :  { %6592 = vmatprep.subr.bf16.mxu1 %v7234_v31  ;;  %v3086_v31 = vld [vmem:[#allocation17 + $0x490] sm:$0xff]  ;;  %v7313_v8 = vcombine.low %v3111_v11, %v3115_v13 }
 0x582   :  { %6421 = vmatpush1.bf16.msra.mxu0 %v7231_v37  ;;  %v7279_v37 = vcombine.low %v3078_v22, %v3082_v23  ;;  %v3127_v22 = vld [vmem:[#allocation17 + $0x5d8] sm:$0xff] }
 0x583   :  { %6593 = vmatpush1.bf16.msra.mxu1 %v7233_v38  ;;  %6422 = vmatprep.subr.bf16.mxu0 %v7240_v43  ;;  %v7281_v38 = vcombine.low %v3079_v27, %v3083_v28  ;;  %v7288_v43 = vcombine.high %v3086_v31, %v3090_v34  ;;  %v3131_v23 = vld [vmem:[#allocation17 + $0x5f8] sm:$0xff]  ;;  %v7321_v27 = vcombine.low %v3119_v6, %v3123_v7 }
 0x584   :  { %6594 = vmatprep.subr.bf16.mxu1 %v7242_v46  ;;  %v7290_v46 = vcombine.high %v3087_v58, %v3091_v36 }
 0x586   :  { %6423 = vmatpush1.bf16.msra.mxu0 %v7239_v54  ;;  %v7287_v54 = vcombine.low %v3086_v31, %v3090_v34  ;;  %v3138_v31 = vld [vmem:[#allocation17 + $0x630] sm:$0xff]  ;;  %v3135_v34 = vld [vmem:[#allocation17 + $0x618] sm:$0xff] }
 0x587   :  { %6595 = vmatpush1.bf16.msra.mxu1 %v7241_v55  ;;  %6424 = vmatprep.subr.bf16.mxu0 %v7248_v59  ;;  %v7296_v55 = vcombine.high %v3094_v42, %v3098_v48  ;;  %v7298_v59 = vcombine.high %v3095_v50, %v3099_v53 }
 0x588   :  { %6596 = vmatprep.subr.bf16.mxu1 %v7250_v57  ;;  %v3102_v57 = vld [vmem:[#allocation17 + $0x510] sm:$0xff] }
 0x589   :  { %v7303_v15 = vcombine.low %v3102_v57, %v3106_v60 }
 0x58a   :  { %6425 = vmatpush1.bf16.msra.mxu0 %v7247_v0  ;;  %v7304_v0 = vcombine.high %v3102_v57, %v3106_v60  ;;  %v3151_v57 = vld [vmem:[#allocation17 + $0x698] sm:$0xff] }
 0x58b   :  { %6597 = vmatpush1.bf16.msra.mxu1 %v7249_v1  ;;  %6426 = vmatprep.subr.bf16.mxu0 %v7256_v5  ;;  %v7306_v1 = vcombine.high %v3103_v62, %v3107_v61  ;;  %v3110_v5 = vld [vmem:[#allocation17 + $0x550] sm:$0xff]  ;;  %v3155_v60 = vld [vmem:[#allocation17 + $0x6b8] sm:$0xff] }
 0x58c   :  { %6598 = vmatprep.subr.bf16.mxu1 %v7258_v9  ;;  %v3114_v9 = vld [vmem:[#allocation17 + $0x570] sm:$0xff] }
 0x58d   :  { %v7311_v32 = vcombine.low %v3110_v5, %v3114_v9 }
 0x58e   :  { %6427 = vmatpush1.bf16.msra.mxu0 %v7255_v2  ;;  %v7312_v2 = vcombine.high %v3110_v5, %v3114_v9  ;;  %v3159_v5 = vld [vmem:[#allocation17 + $0x6d8] sm:$0xff] }
 0x58f   :  { %6599 = vmatpush1.bf16.msra.mxu1 %v7257_v49  ;;  %6428 = vmatprep.subr.bf16.mxu0 %v7264_v3  ;;  %v7314_v49 = vcombine.high %v3111_v11, %v3115_v13  ;;  %v3118_v3 = vld [vmem:[#allocation17 + $0x590] sm:$0xff]  ;;  %v3163_v9 = vld [vmem:[#allocation17 + $0x6f8] sm:$0xff]  ;;  %v7353_v13 = vcombine.low %v3151_v57, %v3155_v60 }
 0x590   :  { %6600 = vmatprep.subr.bf16.mxu1 %v7266_v4  ;;  %v3122_v4 = vld [vmem:[#allocation17 + $0x5b0] sm:$0xff] }
 0x592   :  { %6429 = vmatpush1.bf16.msra.mxu0 %v7263_v18  ;;  %v7320_v18 = vcombine.high %v3118_v3, %v3122_v4 }
 0x593   :  { %6601 = vmatpush1.bf16.msra.mxu1 %v7265_v19  ;;  %6441 = vmatprep.subr.bf16.mxu0 %v7272_v20  ;;  %v7322_v19 = vcombine.high %v3119_v6, %v3123_v7  ;;  %v3126_v20 = vld [vmem:[#allocation17 + $0x5d0] sm:$0xff]  ;;  %v7361_v7 = vcombine.low %v3159_v5, %v3163_v9 }
 0x594   :  { %6613 = vmatprep.subr.bf16.mxu1 %v7274_v21  ;;  %v3130_v21 = vld [vmem:[#allocation17 + $0x5f0] sm:$0xff] }
 0x595   :  { %6431 = vmatmul.mubr.bf16.vlgmr.msra.gmra.mrb[20].mxu0 %v8551_v25  ;;  %v7328_v28 = vcombine.high %v3126_v20, %v3130_v21 }
 0x596   :  { %6603 = vmatmul.mubr.bf16.vlgmr.msra.gmra.mrb[20].mxu1 %v8551_v25  ;;  %6442 = vmatpush1.bf16.msra.mxu0 %v7271_v24  ;;  %v7289_v25 = vcombine.low %v3087_v58, %v3091_v36  ;;  %v7319_v24 = vcombine.low %v3118_v3, %v3122_v4  ;;  %v7327_v58 = vcombine.low %v3126_v20, %v3130_v21  ;;  %v3167_v3 = vld [vmem:[#allocation17 + $0x718] sm:$0xff] }
 0x597   :  { %6473 = vmatprep.mubr.bf16.mxu0 %v8557_v33  ;;  %6614 = vmatpush1.bf16.msra.mxu1 %v7273_v29  ;;  %v7330_v29 = vcombine.high %v3127_v22, %v3131_v23  ;;  %v7329_v36 = vcombine.low %v3127_v22, %v3131_v23  ;;  %v3171_v4 = vld [vmem:[#allocation17 + $0x738] sm:$0xff] }
 0x598   :  { %6645 = vmatprep.mubr.bf16.mxu1 %v8557_v33  ;;  %6443 = vmatprep.subr.bf16.mxu0 %v7280_v30  ;;  %v7295_v33 = vcombine.low %v3094_v42, %v3098_v48  ;;  %v3134_v30 = vld [vmem:[#allocation17 + $0x610] sm:$0xff]  ;;  %v3143_v42 = vld [vmem:[#allocation17 + $0x658] sm:$0xff]  ;;  %v7369_v23 = vcombine.low %v3167_v3, %v3171_v4 }
 0x599   :  { %6615 = vmatprep.subr.bf16.mxu1 %v7282_v35  ;;  %v3139_v35 = vld [vmem:[#allocation17 + $0x638] sm:$0xff]  ;;  %v7335_v50 = vcombine.low %v3134_v30, %v3138_v31 }
 0x59a   :  { %6444 = vmatpush1.bf16.msra.mxu0 %v7279_v37  ;;  %v7336_v37 = vcombine.high %v3134_v30, %v3138_v31  ;;  %v3147_v48 = vld [vmem:[#allocation17 + $0x678] sm:$0xff]  ;;  %v7337_v53 = vcombine.low %v3135_v34, %v3139_v35 }
 0x59b   :  { %6616 = vmatpush1.bf16.msra.mxu1 %v7281_v38  ;;  %6445 = vmatprep.subr.bf16.mxu0 %v7288_v43  ;;  %v7338_v38 = vcombine.high %v3135_v34, %v3139_v35  ;;  %v3142_v43 = vld [vmem:[#allocation17 + $0x650] sm:$0xff]  ;;  %v7345_v61 = vcombine.low %v3143_v42, %v3147_v48  ;;  %v3175_v20 = vld [vmem:[#allocation17 + $0x758] sm:$0xff] }
 0x59c   :  { %6617 = vmatprep.subr.bf16.mxu1 %v7290_v46  ;;  %v3146_v46 = vld [vmem:[#allocation17 + $0x670] sm:$0xff]  ;;  %v3179_v21 = vld [vmem:[#allocation17 + $0x778] sm:$0xff] }
 0x59d   :  { %v7343_v62 = vcombine.low %v3142_v43, %v3146_v46  ;;  %v3183_v30 = vld [vmem:[#allocation17 + $0x798] sm:$0xff]  ;;  %v7377_v35 = vcombine.low %v3175_v20, %v3179_v21 }
 0x59e   :  { %6446 = vmatpush1.bf16.msra.mxu0 %v7287_v54  ;;  %v7344_v54 = vcombine.high %v3142_v43, %v3146_v46  ;;  %v3187_v31 = vld [vmem:[#allocation17 + $0x7b8] sm:$0xff] }
 0x59f   :  { %6618 = vmatpush1.bf16.msra.mxu1 %v7289_v25  ;;  %6447 = vmatprep.subr.bf16.mxu0 %v7296_v55  ;;  %v7346_v25 = vcombine.high %v3143_v42, %v3147_v48  ;;  %v3150_v55 = vld [vmem:[#allocation17 + $0x690] sm:$0xff]  ;;  %v3191_v43 = vld [vmem:[#allocation17 + $0x7d8] sm:$0xff]  ;;  %v7385_v48 = vcombine.low %v3183_v30, %v3187_v31 }
 0x5a0   :  { %6619 = vmatprep.subr.bf16.mxu1 %v7298_v59  ;;  %v3154_v59 = vld [vmem:[#allocation17 + $0x6b0] sm:$0xff]  ;;  %v3195_v46 = vld [vmem:[#allocation17 + $0x7f8] sm:$0xff] }
 0x5a1   :  { %v7351_v11 = vcombine.low %v3150_v55, %v3154_v59 }
 0x5a2   :  { %6448 = vmatpush1.bf16.msra.mxu0 %v7295_v33  ;;  %v7352_v33 = vcombine.high %v3150_v55, %v3154_v59  ;;  %v3199_v55 = vld [vmem:[#allocation17 + $0x818] sm:$0xff] }
 0x5a3   :  { %6620 = vmatpush1.bf16.msra.mxu1 %v7297_v63  ;;  %6449 = vmatprep.subr.bf16.mxu0 %v7304_v0  ;;  %v7354_v63 = vcombine.high %v3151_v57, %v3155_v60  ;;  %v3158_v0 = vld [vmem:[#allocation17 + $0x6d0] sm:$0xff]  ;;  %v3203_v59 = vld [vmem:[#allocation17 + $0x838] sm:$0xff]  ;;  %v7393_v60 = vcombine.low %v3191_v43, %v3195_v46 }
 0x5a4   :  { %6621 = vmatprep.subr.bf16.mxu1 %v7306_v1  ;;  %v3162_v1 = vld [vmem:[#allocation17 + $0x6f0] sm:$0xff] }
 0x5a5   :  { %v7359_v6 = vcombine.low %v3158_v0, %v3162_v1 }
 0x5a6   :  { %6450 = vmatpush1.bf16.msra.mxu0 %v7303_v15  ;;  %v7360_v15 = vcombine.high %v3158_v0, %v3162_v1  ;;  %v3207_v1 = vld [vmem:[#allocation17 + $0x858] sm:$0xff] }
 0x5a7   :  { %6622 = vmatpush1.bf16.msra.mxu1 %v7305_v17  ;;  %6451 = vmatprep.subr.bf16.mxu0 %v7312_v2  ;;  %v7362_v17 = vcombine.high %v3159_v5, %v3163_v9  ;;  %v3166_v2 = vld [vmem:[#allocation17 + $0x710] sm:$0xff]  ;;  %v3211_v5 = vld [vmem:[#allocation17 + $0x878] sm:$0xff]  ;;  %v7401_v9 = vcombine.low %v3199_v55, %v3203_v59 }
 0x5a8   :  { %6623 = vmatprep.subr.bf16.mxu1 %v7314_v49  ;;  %v3170_v49 = vld [vmem:[#allocation17 + $0x730] sm:$0xff] }
 0x5a9   :  { %v7367_v22 = vcombine.low %v3166_v2, %v3170_v49 }
 0x5aa   :  { %6452 = vmatpush1.bf16.msra.mxu0 %v7311_v32  ;;  %v7368_v32 = vcombine.high %v3166_v2, %v3170_v49  ;;  %v3215_v2 = vld [vmem:[#allocation17 + $0x898] sm:$0xff] }
 0x5ab   :  { %6624 = vmatpush1.bf16.msra.mxu1 %v7313_v8  ;;  %6453 = vmatprep.subr.bf16.mxu0 %v7320_v18  ;;  %v7370_v8 = vcombine.high %v3167_v3, %v3171_v4  ;;  %v3174_v18 = vld [vmem:[#allocation17 + $0x750] sm:$0xff]  ;;  %v3219_v49 = vld [vmem:[#allocation17 + $0x8b8] sm:$0xff]  ;;  %v7409_v4 = vcombine.low %v3207_v1, %v3211_v5 }
 0x5ac   :  { %6625 = vmatprep.subr.bf16.mxu1 %v7322_v19  ;;  %v3178_v19 = vld [vmem:[#allocation17 + $0x770] sm:$0xff] }
 0x5ad   :  { %v7375_v34 = vcombine.low %v3174_v18, %v3178_v19 }
 0x5ae   :  { %6454 = vmatpush1.bf16.msra.mxu0 %v7319_v24  ;;  %v7376_v24 = vcombine.high %v3174_v18, %v3178_v19  ;;  %v3223_v18 = vld [vmem:[#allocation17 + $0x8d8] sm:$0xff] }
 0x5af   :  { %6626 = vmatpush1.bf16.msra.mxu1 %v7321_v27  ;;  %6455 = vmatprep.subr.bf16.mxu0 %v7328_v28  ;;  %v7378_v27 = vcombine.high %v3175_v20, %v3179_v21  ;;  %v3182_v28 = vld [vmem:[#allocation17 + $0x790] sm:$0xff]  ;;  %v3227_v19 = vld [vmem:[#allocation17 + $0x8f8] sm:$0xff] }
 0x5b0   :  { %6627 = vmatprep.subr.bf16.mxu1 %v7330_v29  ;;  %v3186_v29 = vld [vmem:[#allocation17 + $0x7b0] sm:$0xff] }
 0x5b1   :  { %v7383_v42 = vcombine.low %v3182_v28, %v3186_v29 }
 0x5b2   :  { %6456 = vmatpush1.bf16.msra.mxu0 %v7327_v58  ;;  %v7384_v58 = vcombine.high %v3182_v28, %v3186_v29  ;;  %v3235_v28 = vld [vmem:[#allocation17 + $0x938] sm:$0xff]  ;;  %v7425_v29 = vcombine.low %v3223_v18, %v3227_v19 }
 0x5b3   :  { %6628 = vmatpush1.bf16.msra.mxu1 %v7329_v36  ;;  %6457 = vmatprep.subr.bf16.mxu0 %v7336_v37  ;;  %v7386_v36 = vcombine.high %v3183_v30, %v3187_v31  ;;  %v3190_v37 = vld [vmem:[#allocation17 + $0x7d0] sm:$0xff] }
 0x5b4   :  { %6629 = vmatprep.subr.bf16.mxu1 %v7338_v38  ;;  %v3194_v38 = vld [vmem:[#allocation17 + $0x7f0] sm:$0xff] }
 0x5b5   :  { %v7391_v57 = vcombine.low %v3190_v37, %v3194_v38 }
 0x5b6   :  { %6458 = vmatpush1.bf16.msra.mxu0 %v7335_v50  ;;  %v7392_v50 = vcombine.high %v3190_v37, %v3194_v38 }
 0x5b7   :  { %6630 = vmatpush1.bf16.msra.mxu1 %v7337_v53  ;;  %6459 = vmatprep.subr.bf16.mxu0 %v7344_v54  ;;  %v7394_v53 = vcombine.high %v3191_v43, %v3195_v46  ;;  %v3198_v54 = vld [vmem:[#allocation17 + $0x810] sm:$0xff] }
 0x5b8   :  { %6631 = vmatprep.subr.bf16.mxu1 %v7346_v25  ;;  %v3202_v25 = vld [vmem:[#allocation17 + $0x830] sm:$0xff] }
 0x5b9   :  { %v7399_v0 = vcombine.low %v3198_v54, %v3202_v25 }
 0x5ba   :  { %6460 = vmatpush1.bf16.msra.mxu0 %v7343_v62  ;;  %v7400_v62 = vcombine.high %v3198_v54, %v3202_v25 }
 0x5bb   :  { %6632 = vmatpush1.bf16.msra.mxu1 %v7345_v61  ;;  %6461 = vmatprep.subr.bf16.mxu0 %v7352_v33  ;;  %v7402_v61 = vcombine.high %v3199_v55, %v3203_v59  ;;  %v3206_v33 = vld [vmem:[#allocation17 + $0x850] sm:$0xff] }
 0x5bc   :  { %6633 = vmatprep.subr.bf16.mxu1 %v7354_v63  ;;  %v3210_v63 = vld [vmem:[#allocation17 + $0x870] sm:$0xff] }
 0x5bd   :  { %v7407_v3 = vcombine.low %v3206_v33, %v3210_v63 }
 0x5be   :  { %6462 = vmatpush1.bf16.msra.mxu0 %v7351_v11  ;;  %v7408_v11 = vcombine.high %v3206_v33, %v3210_v63 }
 0x5bf   :  { %6634 = vmatpush1.bf16.msra.mxu1 %v7353_v13  ;;  %6463 = vmatprep.subr.bf16.mxu0 %v7360_v15  ;;  %v3214_v13 = vld [vmem:[#allocation17 + $0x890] sm:$0xff] }
 0x5c0   :  { %6635 = vmatprep.subr.bf16.mxu1 %v7362_v17  ;;  %v3218_v15 = vld [vmem:[#allocation17 + $0x8b0] sm:$0xff]  ;;  %v7410_v17 = vcombine.high %v3207_v1, %v3211_v5 }
 0x5c1   :  { %v7415_v20 = vcombine.low %v3214_v13, %v3218_v15  ;;  %v3262_v5 = vld [vmem:[#allocation17 + $0xa10] sm:$0xff] }
 0x5c2   :  { %6464 = vmatpush1.bf16.msra.mxu0 %v7359_v6  ;;  %v7416_v6 = vcombine.high %v3214_v13, %v3218_v15  ;;  %v3267_v13 = vld [vmem:[#allocation17 + $0xa38] sm:$0xff] }
 0x5c3   :  { %6636 = vmatpush1.bf16.msra.mxu1 %v7361_v7  ;;  %6465 = vmatprep.subr.bf16.mxu0 %v7368_v32  ;;  %v7418_v7 = vcombine.high %v3215_v2, %v3219_v49  ;;  %v3222_v32 = vld [vmem:[#allocation17 + $0x8d0] sm:$0xff] }
 0x5c4   :  { %6637 = vmatprep.subr.bf16.mxu1 %v7370_v8  ;;  %v3226_v8 = vld [vmem:[#allocation17 + $0x8f0] sm:$0xff] }
 0x5c5   :  { %v7424_v21 = vcombine.high %v3222_v32, %v3226_v8 }
 0x5c6   :  { %6466 = vmatpush1.bf16.msra.mxu0 %v7367_v22  ;;  %v7426_v22 = vcombine.high %v3223_v18, %v3227_v19 }
 0x5c7   :  { %6638 = vmatpush1.bf16.msra.mxu1 %v7369_v23  ;;  %6467 = vmatprep.subr.bf16.mxu0 %v7376_v24  ;;  %v3230_v23 = vld [vmem:[#allocation17 + $0x910] sm:$0xff] }
 0x5c8   :  { %6639 = vmatprep.subr.bf16.mxu1 %v7378_v27  ;;  %v3234_v24 = vld [vmem:[#allocation17 + $0x930] sm:$0xff]  ;;  %v3231_v27 = vld [vmem:[#allocation17 + $0x918] sm:$0xff] }
 0x5c9   :  { %v7432_v30 = vcombine.high %v3230_v23, %v3234_v24  ;;  %v7434_v31 = vcombine.high %v3231_v27, %v3235_v28  ;;  %v7431_v37 = vcombine.low %v3230_v23, %v3234_v24  ;;  %v7433_v38 = vcombine.low %v3231_v27, %v3235_v28 }
 0x5ca   :  { %6468 = vmatpush1.bf16.msra.mxu0 %v7375_v34  ;;  %v3238_v34 = vld [vmem:[#allocation17 + $0x950] sm:$0xff] }
 0x5cb   :  { %6640 = vmatpush1.bf16.msra.mxu1 %v7377_v35  ;;  %6469 = vmatprep.subr.bf16.mxu0 %v7384_v58  ;;  %v3242_v35 = vld [vmem:[#allocation17 + $0x970] sm:$0xff]  ;;  %v3239_v58 = vld [vmem:[#allocation17 + $0x958] sm:$0xff] }
 0x5cc   :  { %6641 = vmatprep.subr.bf16.mxu1 %v7386_v36  ;;  %v3243_v36 = vld [vmem:[#allocation17 + $0x978] sm:$0xff]  ;;  %v7440_v43 = vcombine.high %v3238_v34, %v3242_v35  ;;  %v7439_v54 = vcombine.low %v3238_v34, %v3242_v35 }
 0x5cd   :  { %v7442_v46 = vcombine.high %v3239_v58, %v3243_v36  ;;  %v7441_v25 = vcombine.low %v3239_v58, %v3243_v36 }
 0x5ce   :  { %6470 = vmatpush1.bf16.msra.mxu0 %v7383_v42  ;;  %v3246_v42 = vld [vmem:[#allocation17 + $0x990] sm:$0xff] }
 0x5cf   :  { %6642 = vmatpush1.bf16.msra.mxu1 %v7385_v48  ;;  %6471 = vmatprep.subr.bf16.mxu0 %v7392_v50  ;;  %v3250_v48 = vld [vmem:[#allocation17 + $0x9b0] sm:$0xff]  ;;  %v3247_v50 = vld [vmem:[#allocation17 + $0x998] sm:$0xff] }
 0x5d0   :  { %6643 = vmatprep.subr.bf16.mxu1 %v7394_v53  ;;  %v3251_v53 = vld [vmem:[#allocation17 + $0x9b8] sm:$0xff]  ;;  %v7448_v55 = vcombine.high %v3246_v42, %v3250_v48  ;;  %v7447_v33 = vcombine.low %v3246_v42, %v3250_v48 }
 0x5d1   :  { %v7450_v59 = vcombine.high %v3247_v50, %v3251_v53  ;;  %v7449_v63 = vcombine.low %v3247_v50, %v3251_v53 }
 0x5d2   :  { %6472 = vmatpush1.bf16.msra.mxu0 %v7391_v57  ;;  %v3254_v57 = vld [vmem:[#allocation17 + $0x9d0] sm:$0xff] }
 0x5d3   :  { %6644 = vmatpush1.bf16.msra.mxu1 %v7393_v60  ;;  %6484 = vmatprep.subr.bf16.mxu0 %v7400_v62  ;;  %v3258_v60 = vld [vmem:[#allocation17 + $0x9f0] sm:$0xff]  ;;  %v3255_v62 = vld [vmem:[#allocation17 + $0x9d8] sm:$0xff] }
 0x5d4   :  { %6656 = vmatprep.subr.bf16.mxu1 %v7402_v61  ;;  %v3259_v61 = vld [vmem:[#allocation17 + $0x9f8] sm:$0xff]  ;;  %v7455_v15 = vcombine.low %v3254_v57, %v3258_v60 }
 0x5d5   :  { %6474 = vmatmul.mubr.bf16.vlgmr.msra.gmra.mrb[20].mxu0 %v8553_v26  ;;  %v7458_v1 = vcombine.high %v3255_v62, %v3259_v61 }
 0x5d6   :  { %6646 = vmatmul.mubr.bf16.vlgmr.msra.gmra.mrb[20].mxu1 %v8553_v26  ;;  %6485 = vmatpush1.bf16.msra.mxu0 %v7399_v0  ;;  %v7417_v26 = vcombine.low %v3215_v2, %v3219_v49  ;;  %v7456_v0 = vcombine.high %v3254_v57, %v3258_v60 }
 0x5d7   :  { %6516 = vmatprep.mubr.bf16.mxu0 %v8630_v14  ;;  %6657 = vmatpush1.bf16.msra.mxu1 %v7401_v9  ;;  %v3266_v9 = vld [vmem:[#allocation17 + $0xa30] sm:$0xff] }
 0x5d8   :  { %6688 = vmatprep.mubr.bf16.mxu1 %v8630_v14  ;;  %6486 = vmatprep.subr.bf16.mxu0 %v7408_v11  ;;  %v7423_v14 = vcombine.low %v3222_v32, %v3226_v8  ;;  %v3263_v11 = vld [vmem:[#allocation17 + $0xa18] sm:$0xff]  ;;  %v7464_v2 = vcombine.high %v3262_v5, %v3266_v9  ;;  %v7463_v32 = vcombine.low %v3262_v5, %v3266_v9 }
 0x5d9   :  { %6658 = vmatprep.subr.bf16.mxu1 %v7410_v17  ;;  %v7457_v17 = vcombine.low %v3255_v62, %v3259_v61  ;;  %v7466_v49 = vcombine.high %v3263_v11, %v3267_v13  ;;  %v7465_v8 = vcombine.low %v3263_v11, %v3267_v13 }
 0x5da   :  { %6487 = vmatpush1.bf16.msra.mxu0 %v7407_v3  ;;  %v3270_v3 = vld [vmem:[#allocation17 + $0xa50] sm:$0xff] }
 0x5db   :  { %6659 = vmatpush1.bf16.msra.mxu1 %v7409_v4  ;;  %6488 = vmatprep.subr.bf16.mxu0 %v7416_v6  ;;  %v3274_v4 = vld [vmem:[#allocation17 + $0xa70] sm:$0xff]  ;;  %v3271_v6 = vld [vmem:[#allocation17 + $0xa58] sm:$0xff] }
 0x5dc   :  { %6660 = vmatprep.subr.bf16.mxu1 %v7418_v7  ;;  %v3275_v7 = vld [vmem:[#allocation17 + $0xa78] sm:$0xff]  ;;  %v7472_v18 = vcombine.high %v3270_v3, %v3274_v4  ;;  %v7471_v23 = vcombine.low %v3270_v3, %v3274_v4 }
 0x5dd   :  { %v7474_v19 = vcombine.high %v3271_v6, %v3275_v7  ;;  %v7473_v24 = vcombine.low %v3271_v6, %v3275_v7 }
 0x5de   :  { %6489 = vmatpush1.bf16.msra.mxu0 %v7415_v20  ;;  %v3278_v20 = vld [vmem:[#allocation17 + $0xa90] sm:$0xff] }
 0x5df   :  { %6661 = vmatpush1.bf16.msra.mxu1 %v7417_v26  ;;  %6490 = vmatprep.subr.bf16.mxu0 %v7424_v21  ;;  %v3282_v26 = vld [vmem:[#allocation17 + $0xab0] sm:$0xff]  ;;  %v3279_v21 = vld [vmem:[#allocation17 + $0xa98] sm:$0xff] }
 0x5e0   :  { %6662 = vmatprep.subr.bf16.mxu1 %v7426_v22  ;;  %v3283_v22 = vld [vmem:[#allocation17 + $0xab8] sm:$0xff]  ;;  %v7480_v27 = vcombine.high %v3278_v20, %v3282_v26  ;;  %v7479_v34 = vcombine.low %v3278_v20, %v3282_v26 }
 0x5e1   :  { %v7482_v28 = vcombine.high %v3279_v21, %v3283_v22  ;;  %v7481_v35 = vcombine.low %v3279_v21, %v3283_v22 }
 0x5e2   :  { %6491 = vmatpush1.bf16.msra.mxu0 %v7423_v14  ;;  %v3286_v14 = vld [vmem:[#allocation17 + $0xad0] sm:$0xff] }
 0x5e3   :  { %6663 = vmatpush1.bf16.msra.mxu1 %v7425_v29  ;;  %6492 = vmatprep.subr.bf16.mxu0 %v7432_v30  ;;  %v3290_v29 = vld [vmem:[#allocation17 + $0xaf0] sm:$0xff]  ;;  %v3287_v30 = vld [vmem:[#allocation17 + $0xad8] sm:$0xff] }
 0x5e4   :  { %6664 = vmatprep.subr.bf16.mxu1 %v7434_v31  ;;  %v3291_v31 = vld [vmem:[#allocation17 + $0xaf8] sm:$0xff]  ;;  %v7488_v58 = vcombine.high %v3286_v14, %v3290_v29  ;;  %v7487_v42 = vcombine.low %v3286_v14, %v3290_v29 }
 0x5e5   :  { %v7490_v36 = vcombine.high %v3287_v30, %v3291_v31  ;;  %v7489_v48 = vcombine.low %v3287_v30, %v3291_v31  ;;  %v3339_v14 = vld [vmem:[#allocation17 + $0xc78] sm:$0xff]  ;;  %v3342_v31 = vld [vmem:[#allocation17 + $0xc90] sm:$0xff] }
 0x5e6   :  { %6493 = vmatpush1.bf16.msra.mxu0 %v7431_v37  ;;  %v3294_v37 = vld [vmem:[#allocation17 + $0xb10] sm:$0xff] }
 0x5e7   :  { %6665 = vmatpush1.bf16.msra.mxu1 %v7433_v38  ;;  %6494 = vmatprep.subr.bf16.mxu0 %v7440_v43  ;;  %v3298_v38 = vld [vmem:[#allocation17 + $0xb30] sm:$0xff]  ;;  %v3295_v43 = vld [vmem:[#allocation17 + $0xb18] sm:$0xff] }
 0x5e8   :  { %6666 = vmatprep.subr.bf16.mxu1 %v7442_v46  ;;  %v3299_v46 = vld [vmem:[#allocation17 + $0xb38] sm:$0xff]  ;;  %v7496_v50 = vcombine.high %v3294_v37, %v3298_v38  ;;  %v7495_v57 = vcombine.low %v3294_v37, %v3298_v38 }
 0x5e9   :  { %v7498_v53 = vcombine.high %v3295_v43, %v3299_v46  ;;  %v7497_v60 = vcombine.low %v3295_v43, %v3299_v46 }
 0x5ea   :  { %6495 = vmatpush1.bf16.msra.mxu0 %v7439_v54  ;;  %v3302_v54 = vld [vmem:[#allocation17 + $0xb50] sm:$0xff] }
 0x5eb   :  { %6667 = vmatpush1.bf16.msra.mxu1 %v7441_v25  ;;  %6496 = vmatprep.subr.bf16.mxu0 %v7448_v55  ;;  %v3306_v25 = vld [vmem:[#allocation17 + $0xb70] sm:$0xff]  ;;  %v3303_v55 = vld [vmem:[#allocation17 + $0xb58] sm:$0xff] }
 0x5ec   :  { %6668 = vmatprep.subr.bf16.mxu1 %v7450_v59  ;;  %v3307_v59 = vld [vmem:[#allocation17 + $0xb78] sm:$0xff]  ;;  %v7504_v62 = vcombine.high %v3302_v54, %v3306_v25  ;;  %v7503_v5 = vcombine.low %v3302_v54, %v3306_v25 }
 0x5ed   :  { %v7506_v61 = vcombine.high %v3303_v55, %v3307_v59  ;;  %v7505_v9 = vcombine.low %v3303_v55, %v3307_v59  ;;  %v3358_v59 = vld [vmem:[#allocation17 + $0xd10] sm:$0xff] }
 0x5ee   :  { %6497 = vmatpush1.bf16.msra.mxu0 %v7447_v33  ;;  %v3310_v33 = vld [vmem:[#allocation17 + $0xb90] sm:$0xff] }
 0x5ef   :  { %6669 = vmatpush1.bf16.msra.mxu1 %v7449_v63  ;;  %6498 = vmatprep.subr.bf16.mxu0 %v7456_v0  ;;  %v3314_v63 = vld [vmem:[#allocation17 + $0xbb0] sm:$0xff]  ;;  %v3311_v0 = vld [vmem:[#allocation17 + $0xb98] sm:$0xff] }
 0x5f0   :  { %6670 = vmatprep.subr.bf16.mxu1 %v7458_v1  ;;  %v3315_v1 = vld [vmem:[#allocation17 + $0xbb8] sm:$0xff]  ;;  %v7512_v11 = vcombine.high %v3310_v33, %v3314_v63  ;;  %v7511_v3 = vcombine.low %v3310_v33, %v3314_v63 }
 0x5f1   :  { %v7514_v13 = vcombine.high %v3311_v0, %v3315_v1  ;;  %v7513_v4 = vcombine.low %v3311_v0, %v3315_v1  ;;  %v3366_v0 = vld [vmem:[#allocation17 + $0xd50] sm:$0xff] }
 0x5f2   :  { %6499 = vmatpush1.bf16.msra.mxu0 %v7455_v15  ;;  %v3318_v15 = vld [vmem:[#allocation17 + $0xbd0] sm:$0xff] }
 0x5f3   :  { %6671 = vmatpush1.bf16.msra.mxu1 %v7457_v17  ;;  %6500 = vmatprep.subr.bf16.mxu0 %v7464_v2  ;;  %v3322_v17 = vld [vmem:[#allocation17 + $0xbf0] sm:$0xff]  ;;  %v3319_v2 = vld [vmem:[#allocation17 + $0xbd8] sm:$0xff] }
 0x5f4   :  { %6672 = vmatprep.subr.bf16.mxu1 %v7466_v49  ;;  %v3323_v49 = vld [vmem:[#allocation17 + $0xbf8] sm:$0xff]  ;;  %v7520_v6 = vcombine.high %v3318_v15, %v3322_v17  ;;  %v7519_v20 = vcombine.low %v3318_v15, %v3322_v17  ;;  %v3370_v1 = vld [vmem:[#allocation17 + $0xd70] sm:$0xff] }
 0x5f5   :  { %v7522_v7 = vcombine.high %v3319_v2, %v3323_v49  ;;  %v7521_v26 = vcombine.low %v3319_v2, %v3323_v49  ;;  %v7568_v17 = vcombine.high %v3366_v0, %v3370_v1  ;;  %v3374_v49 = vld [vmem:[#allocation17 + $0xd90] sm:$0xff] }
 0x5f6   :  { %6501 = vmatpush1.bf16.msra.mxu0 %v7463_v32  ;;  %v3326_v32 = vld [vmem:[#allocation17 + $0xc10] sm:$0xff] }
 0x5f7   :  { %6673 = vmatpush1.bf16.msra.mxu1 %v7465_v8  ;;  %6502 = vmatprep.subr.bf16.mxu0 %v7472_v18  ;;  %v3330_v8 = vld [vmem:[#allocation17 + $0xc30] sm:$0xff]  ;;  %v3327_v18 = vld [vmem:[#allocation17 + $0xc18] sm:$0xff] }
 0x5f8   :  { %6674 = vmatprep.subr.bf16.mxu1 %v7474_v19  ;;  %v3331_v19 = vld [vmem:[#allocation17 + $0xc38] sm:$0xff]  ;;  %v7528_v21 = vcombine.high %v3326_v32, %v3330_v8 }
 0x5f9   :  { %v7530_v22 = vcombine.high %v3327_v18, %v3331_v19  ;;  %v7529_v29 = vcombine.low %v3327_v18, %v3331_v19  ;;  %v7567_v19 = vcombine.low %v3366_v0, %v3370_v1 }
 0x5fa   :  { %6503 = vmatpush1.bf16.msra.mxu0 %v7471_v23  ;;  %v3334_v23 = vld [vmem:[#allocation17 + $0xc50] sm:$0xff] }
 0x5fb   :  { %6675 = vmatpush1.bf16.msra.mxu1 %v7473_v24  ;;  %6504 = vmatprep.subr.bf16.mxu0 %v7480_v27  ;;  %v3338_v24 = vld [vmem:[#allocation17 + $0xc70] sm:$0xff]  ;;  %v7527_v27 = vcombine.low %v3326_v32, %v3330_v8  ;;  %v3379_v32 = vld [vmem:[#allocation17 + $0xdb8] sm:$0xff] }
 0x5fc   :  { %6676 = vmatprep.subr.bf16.mxu1 %v7482_v28  ;;  %v3335_v28 = vld [vmem:[#allocation17 + $0xc58] sm:$0xff]  ;;  %v7536_v30 = vcombine.high %v3334_v23, %v3338_v24  ;;  %v7535_v37 = vcombine.low %v3334_v23, %v3338_v24  ;;  %v3382_v23 = vld [vmem:[#allocation17 + $0xdd0] sm:$0xff] }
 0x5fd   :  { %v7537_v38 = vcombine.low %v3335_v28, %v3339_v14 }
 0x5fe   :  { %6505 = vmatpush1.bf16.msra.mxu0 %v7479_v34  ;;  %v3346_v34 = vld [vmem:[#allocation17 + $0xcb0] sm:$0xff] }
 0x5ff   :  { %6677 = vmatpush1.bf16.msra.mxu1 %v7481_v35  ;;  %6506 = vmatprep.subr.bf16.mxu0 %v7488_v58  ;;  %v7538_v35 = vcombine.high %v3335_v28, %v3339_v14  ;;  %v3343_v58 = vld [vmem:[#allocation17 + $0xc98] sm:$0xff]  ;;  %v7544_v43 = vcombine.high %v3342_v31, %v3346_v34  ;;  %v7543_v54 = vcombine.low %v3342_v31, %v3346_v34 }
 0x600   :  { %6678 = vmatprep.subr.bf16.mxu1 %v7490_v36  ;;  %v3347_v36 = vld [vmem:[#allocation17 + $0xcb8] sm:$0xff] }
 0x601   :  { %v7546_v46 = vcombine.high %v3343_v58, %v3347_v36 }
 0x602   :  { %6507 = vmatpush1.bf16.msra.mxu0 %v7487_v42  ;;  %v3350_v42 = vld [vmem:[#allocation17 + $0xcd0] sm:$0xff] }
 0x603   :  { %6679 = vmatpush1.bf16.msra.mxu1 %v7489_v48  ;;  %6508 = vmatprep.subr.bf16.mxu0 %v7496_v50  ;;  %v3354_v48 = vld [vmem:[#allocation17 + $0xcf0] sm:$0xff]  ;;  %v3351_v50 = vld [vmem:[#allocation17 + $0xcd8] sm:$0xff] }
 0x604   :  { %6680 = vmatprep.subr.bf16.mxu1 %v7498_v53  ;;  %v3355_v53 = vld [vmem:[#allocation17 + $0xcf8] sm:$0xff]  ;;  %v7552_v25 = vcombine.high %v3350_v42, %v3354_v48 }
 0x605   :  { %v7554_v55 = vcombine.high %v3351_v50, %v3355_v53 }
 0x606   :  { %6509 = vmatpush1.bf16.msra.mxu0 %v7495_v57  ;;  %v3362_v57 = vld [vmem:[#allocation17 + $0xd30] sm:$0xff] }
 0x607   :  { %6681 = vmatpush1.bf16.msra.mxu1 %v7497_v60  ;;  %6510 = vmatprep.subr.bf16.mxu0 %v7504_v62  ;;  %v3359_v60 = vld [vmem:[#allocation17 + $0xd18] sm:$0xff]  ;;  %v7560_v33 = vcombine.high %v3358_v59, %v3362_v57 }
 0x608   :  { %6682 = vmatprep.subr.bf16.mxu1 %v7506_v61  ;;  %v3363_v62 = vld [vmem:[#allocation17 + $0xd38] sm:$0xff]  ;;  %v7553_v61 = vcombine.low %v3351_v50, %v3355_v53  ;;  %v3394_v50 = vld [vmem:[#allocation17 + $0xe30] sm:$0xff] }
 0x609   :  { %v7562_v63 = vcombine.high %v3359_v60, %v3363_v62  ;;  %v7561_v15 = vcombine.low %v3359_v60, %v3363_v62  ;;  %v3398_v62 = vld [vmem:[#allocation17 + $0xe50] sm:$0xff] }
 0x60a   :  { %6511 = vmatpush1.bf16.msra.mxu0 %v7503_v5  ;;  %v3367_v5 = vld [vmem:[#allocation17 + $0xd58] sm:$0xff] }
 0x60b   :  { %6683 = vmatpush1.bf16.msra.mxu1 %v7505_v9  ;;  %6512 = vmatprep.subr.bf16.mxu0 %v7512_v11  ;;  %v3371_v9 = vld [vmem:[#allocation17 + $0xd78] sm:$0xff]  ;;  %v7559_v11 = vcombine.low %v3358_v59, %v3362_v57 }
 0x60c   :  { %6684 = vmatprep.subr.bf16.mxu1 %v7514_v13  ;;  %v8657_v13 = vld [vmem:[#allocation19] sm:$0xff]  ;;  %v7570_v2 = vcombine.high %v3367_v5, %v3371_v9 }
 0x60d   :  { %v3461_v8 = vrot.slane %v8657_v13, %v8465_v47  ;;  %v3469_v18 = vrot.slane %v8657_v13, %v8489_v12  ;;  %v3387_v47 = vld [vmem:[#allocation17 + $0xdf8] sm:$0xff] }
 0x60e   :  { %6513 = vmatpush1.bf16.msra.mxu0 %v7511_v3  ;;  %v3378_v3 = vld [vmem:[#allocation17 + $0xdb0] sm:$0xff] }
 0x60f   :  { %6685 = vmatpush1.bf16.msra.mxu1 %v7513_v4  ;;  %6514 = vmatprep.subr.bf16.mxu0 %v7520_v6  ;;  %v3457_v4 = vrot.slane %v8657_v13, %v8462_v45  ;;  %v3465_v6 = vrot.slane %v8657_v13, %v8486_v10  ;;  %v3386_v10 = vld [vmem:[#allocation17 + $0xdf0] sm:$0xff] }
 0x610   :  { %6686 = vmatprep.subr.bf16.mxu1 %v7522_v7  ;;  %v3375_v7 = vld [vmem:[#allocation17 + $0xd98] sm:$0xff] }
 0x611   :  { %v7578_v45 = vcombine.high %v3375_v7, %v3379_v32 }
 0x612   :  { %6515 = vmatpush1.bf16.msra.mxu0 %v7519_v20  ;;  %v7569_v20 = vcombine.low %v3367_v5, %v3371_v9  ;;  %v3406_v9 = vld [vmem:[#allocation17 + $0xe90] sm:$0xff] }
 0x613   :  { %6687 = vmatpush1.bf16.msra.mxu1 %v7521_v26  ;;  %6527 = vmatprep.subr.bf16.mxu0 %v7528_v21  ;;  %v7576_v26 = vcombine.high %v3374_v49, %v3378_v3 }
 0x614   :  { %6699 = vmatprep.subr.bf16.mxu1 %v7530_v22 }
 0x615   :  { %6517 = vmatmul.mubr.bf16.vlgmr.msra.gmra.mrb[20].mxu0 %v8621_v56 }
 0x616   :  { %6689 = vmatmul.mubr.bf16.vlgmr.msra.gmra.mrb[20].mxu1 %v8621_v56  ;;  %6528 = vmatpush1.bf16.msra.mxu0 %v7527_v27  ;;  %v7545_v56 = vcombine.low %v3343_v58, %v3347_v36 }
 0x617   :  { %6559 = vmatprep.mubr.bf16.mxu0 %v8633_v16  ;;  %6700 = vmatpush1.bf16.msra.mxu1 %v7529_v29  ;;  %v3383_v29 = vld [vmem:[#allocation17 + $0xdd8] sm:$0xff] }
 0x618   :  { %6731 = vmatprep.mubr.bf16.mxu1 %v8633_v16  ;;  %6529 = vmatprep.subr.bf16.mxu0 %v7536_v30  ;;  %v7551_v16 = vcombine.low %v3350_v42, %v3354_v48  ;;  %v7586_v42 = vcombine.high %v3383_v29, %v3387_v47  ;;  %v3390_v48 = vld [vmem:[#allocation17 + $0xe10] sm:$0xff]  ;;  %v7585_v59 = vcombine.low %v3383_v29, %v3387_v47  ;;  %v3423_v47 = vld [vmem:[#allocation17 + $0xf18] sm:$0xff] }
 0x619   :  { %6701 = vmatprep.subr.bf16.mxu1 %v7538_v35  ;;  %v7575_v35 = vcombine.low %v3374_v49, %v3378_v3  ;;  %v7592_v57 = vcombine.high %v3390_v48, %v3394_v50  ;;  %v3426_v29 = vld [vmem:[#allocation17 + $0xf30] sm:$0xff] }
 0x61a   :  { %6530 = vmatpush1.bf16.msra.mxu0 %v7535_v37 }
 0x61b   :  { %6702 = vmatpush1.bf16.msra.mxu1 %v7537_v38  ;;  %6531 = vmatprep.subr.bf16.mxu0 %v7544_v43  ;;  %v7577_v38 = vcombine.low %v3375_v7, %v3379_v32  ;;  %v7584_v43 = vcombine.high %v3382_v23, %v3386_v10 }
 0x61c   :  { %6703 = vmatprep.subr.bf16.mxu1 %v7546_v46 }
 0x61e   :  { %6532 = vmatpush1.bf16.msra.mxu0 %v7543_v54  ;;  %v3391_v54 = vld [vmem:[#allocation17 + $0xe18] sm:$0xff] }
 0x61f   :  { %6704 = vmatpush1.bf16.msra.mxu1 %v7545_v56  ;;  %6533 = vmatprep.subr.bf16.mxu0 %v7552_v25  ;;  %v3395_v56 = vld [vmem:[#allocation17 + $0xe38] sm:$0xff] }
 0x620   :  { %6705 = vmatprep.subr.bf16.mxu1 %v7554_v55  ;;  %v7583_v55 = vcombine.low %v3382_v23, %v3386_v10  ;;  %v7594_v60 = vcombine.high %v3391_v54, %v3395_v56  ;;  %v7593_v0 = vcombine.low %v3391_v54, %v3395_v56  ;;  %v3439_v54 = vld [vmem:[#allocation17 + $0xf98] sm:$0xff] }
 0x621   :  { %v3443_v56 = vld [vmem:[#allocation17 + $0xfb8] sm:$0xff] }
 0x622   :  { %6534 = vmatpush1.bf16.msra.mxu0 %v7551_v16  ;;  %v3402_v16 = vld [vmem:[#allocation17 + $0xe70] sm:$0xff] }
 0x623   :  { %6706 = vmatpush1.bf16.msra.mxu1 %v7553_v61  ;;  %6535 = vmatprep.subr.bf16.mxu0 %v7560_v33  ;;  %v3399_v61 = vld [vmem:[#allocation17 + $0xe58] sm:$0xff]  ;;  %v7600_v1 = vcombine.high %v3398_v62, %v3402_v16  ;;  %v7599_v3 = vcombine.low %v3398_v62, %v3402_v16  ;;  %v3450_v62 = vld [vmem:[#allocation17 + $0xff0] sm:$0xff] }
 0x624   :  { %6707 = vmatprep.subr.bf16.mxu1 %v7562_v63  ;;  %v3403_v33 = vld [vmem:[#allocation17 + $0xe78] sm:$0xff]  ;;  %v7591_v63 = vcombine.low %v3390_v48, %v3394_v50  ;;  %v3438_v50 = vld [vmem:[#allocation17 + $0xf90] sm:$0xff] }
 0x625   :  { %v7602_v5 = vcombine.high %v3399_v61, %v3403_v33  ;;  %v3447_v16 = vld [vmem:[#allocation17 + $0xfd8] sm:$0xff] }
 0x626   :  { %6536 = vmatpush1.bf16.msra.mxu0 %v7559_v11  ;;  %v3410_v11 = vld [vmem:[#allocation17 + $0xeb0] sm:$0xff] }
 0x627   :  { %6708 = vmatpush1.bf16.msra.mxu1 %v7561_v15  ;;  %6537 = vmatprep.subr.bf16.mxu0 %v7568_v17  ;;  %v3407_v17 = vld [vmem:[#allocation17 + $0xe98] sm:$0xff]  ;;  %v7608_v7 = vcombine.high %v3406_v9, %v3410_v11 }
 0x628   :  { %v6217_v21 = vpop.f32.mrb[16].mxu0  ;;  %v6389_v22 = vpop.f32.mrb[16].mxu1  ;;  %6709 = vmatprep.subr.bf16.mxu1 %v7570_v2  ;;  %v3411_v2 = vld [vmem:[#allocation17 + $0xeb8] sm:$0xff] }
 0x629   :  { %v7684_v24 = vadd.f32 %v6217_v21, %v3457_v4  ;;  %v7688_v27 = vadd.f32 %v6389_v22, %v3465_v6  ;;  %v6219_v28 = vpop.f32.mrb[17].mxu0  ;;  %v6391_v14 = vpop.f32.mrb[17].mxu1  ;;  %v3419_v21 = vld [vmem:[#allocation17 + $0xef8] sm:$0xff]  ;;  %v7609_v10 = vcombine.low %v3407_v17, %v3411_v2 }
 0x62a   :  { %v7685_v30 = vadd.f32 %v6219_v28, %v3461_v8  ;;  %v7689_v31 = vadd.f32 %v6391_v14, %v3469_v18  ;;  %v6221_v12 = vpop.f32.mrb[18].mxu0  ;;  %v6393_v34 = vpop.f32.mrb[18].mxu1  ;;  %6538 = vmatpush1.bf16.msra.mxu0 %v7567_v19  ;;  %v3418_v19 = vld [vmem:[#allocation17 + $0xef0] sm:$0xff] }
 0x62b   :  { %7913 = vtanh.f32 %v7684_v24  ;;  %v7686_v58 = vadd.f32 %v6221_v12, %v3457_v4  ;;  %6710 = vmatpush1.bf16.msra.mxu1 %v7569_v20  ;;  %v6223_v36 = vpop.f32.mrb[19].mxu0  ;;  %v6395_v37 = vpop.f32.mrb[19].mxu1  ;;  %6539 = vmatprep.subr.bf16.mxu0 %v7576_v26  ;;  %v7690_v46 = vadd.f32 %v6393_v34, %v3465_v6  ;;  %v7601_v6 = vcombine.low %v3399_v61, %v3403_v33  ;;  %v3415_v26 = vld [vmem:[#allocation17 + $0xed8] sm:$0xff]  ;;  %v3422_v14 = vld [vmem:[#allocation17 + $0xf10] sm:$0xff] }
 0x62c   :  { %7915 = vtanh.f32 %v7688_v27  ;;  %6711 = vmatprep.subr.bf16.mxu1 %v7578_v45  ;;  %v7687_v53 = vadd.f32 %v6223_v36, %v3461_v8  ;;  %v7691_v25 = vadd.f32 %v6395_v37, %v3469_v18  ;;  %v7610_v8 = vcombine.high %v3407_v17, %v3411_v2  ;;  %v3414_v18 = vld [vmem:[#allocation17 + $0xed0] sm:$0xff]  ;;  %v3431_v37 = vld [vmem:[#allocation17 + $0xf58] sm:$0xff] }
 0x62d   :  { %7917 = vtanh.f32 %v7685_v30  ;;  %v7607_v45 = vcombine.low %v3406_v9, %v3410_v11  ;;  %v7616_v24 = vcombine.high %v3414_v18, %v3418_v19  ;;  %v7618_v28 = vcombine.high %v3415_v26, %v3419_v21  ;;  %v3427_v30 = vld [vmem:[#allocation17 + $0xf38] sm:$0xff]  ;;  %v3434_v36 = vld [vmem:[#allocation17 + $0xf70] sm:$0xff] }
 0x62e   :  { %7919 = vtanh.f32 %v7689_v31  ;;  %6540 = vmatpush1.bf16.msra.mxu0 %v7575_v35  ;;  %v7615_v31 = vcombine.low %v3414_v18, %v3418_v19  ;;  %v7617_v12 = vcombine.low %v3415_v26, %v3419_v21  ;;  %v7624_v34 = vcombine.high %v3422_v14, %v3426_v29  ;;  %v3451_v61 = vld [vmem:[#allocation17 + $0xff8] sm:$0xff] }
 0x62f   :  { %7921 = vtanh.f32 %v7686_v58  ;;  %6712 = vmatpush1.bf16.msra.mxu1 %v7577_v38  ;;  %6541 = vmatprep.subr.bf16.mxu0 %v7584_v43  ;;  %v7626_v35 = vcombine.high %v3423_v47, %v3427_v30  ;;  %v3430_v58 = vld [vmem:[#allocation17 + $0xf50] sm:$0xff]  ;;  %v3435_v38 = vld [vmem:[#allocation17 + $0xf78] sm:$0xff]  ;;  %v7623_v43 = vcombine.low %v3422_v14, %v3426_v29  ;;  %v7649_v9 = vcombine.low %v3447_v16, %v3451_v61 }
 0x630   :  { %7923 = vtanh.f32 %v7690_v46  ;;  %6713 = vmatprep.subr.bf16.mxu1 %v7586_v42  ;;  %v7625_v46 = vcombine.low %v3423_v47, %v3427_v30  ;;  %v7632_v42 = vcombine.high %v3430_v58, %v3434_v36  ;;  %v7634_v48 = vcombine.high %v3431_v37, %v3435_v38 }
 0x631   :  { %7925 = vtanh.f32 %v7687_v53  ;;  %v3442_v53 = vld [vmem:[#allocation17 + $0xfb0] sm:$0xff]  ;;  %v3473_v11 = vrot.slane %v8657_v13, %v1238_v39  ;;  %v3477_v17 = vrot.slane %v8657_v13, %v1242_v41  ;;  %v3485_v2 = vrot.slane %v8657_v13, %v1250_v51 }
 0x632   :  { %7927 = vtanh.f32 %v7691_v25  ;;  %6542 = vmatpush1.bf16.msra.mxu0 %v7583_v55  ;;  %v7631_v25 = vcombine.low %v3430_v58, %v3434_v36  ;;  %v7633_v55 = vcombine.low %v3431_v37, %v3435_v38  ;;  %v7639_v33 = vcombine.low %v3438_v50, %v3442_v53 }
 0x633   :  { %6714 = vmatpush1.bf16.msra.mxu1 %v7585_v59  ;;  %6543 = vmatprep.subr.bf16.mxu0 %v7592_v57  ;;  %v7640_v59 = vcombine.high %v3438_v50, %v3442_v53  ;;  %v7642_v57 = vcombine.high %v3439_v54, %v3443_v56 }
 0x634   :  { %6715 = vmatprep.subr.bf16.mxu1 %v7594_v60  ;;  %v3446_v60 = vld [vmem:[#allocation17 + $0xfd0] sm:$0xff] }
 0x635   :  { %v7914_v15 = vpop.eup %7913 }
 0x636   :  { %v7916_v49 = vpop.eup %7915  ;;  %6758 = vst [vmem:[#allocation20] sm:$0xff] %v7914_v15  ;;  %6544 = vmatpush1.bf16.msra.mxu0 %v7591_v63  ;;  %v7641_v63 = vcombine.low %v3439_v54, %v3443_v56  ;;  %v3481_v15 = vrot.slane %v8657_v13, %v1246_v40 }
 0x637   :  { %v7918_v4 = vpop.eup %7917  ;;  %6760 = vst [vmem:[#allocation20 + $0x10] sm:$0xff] %v7916_v49  ;;  %6716 = vmatpush1.bf16.msra.mxu1 %v7593_v0  ;;  %6545 = vmatprep.subr.bf16.mxu0 %v7600_v1  ;;  %v7648_v0 = vcombine.high %v3446_v60, %v3450_v62  ;;  %v7650_v1 = vcombine.high %v3447_v16, %v3451_v61 }
 0x638   :  { %v7920_v32 = vpop.eup %7919  ;;  %6759 = vst [vmem:[#allocation20 + $0x8] sm:$0xff] %v7918_v4  ;;  %6717 = vmatprep.subr.bf16.mxu1 %v7602_v5  ;;  %v7647_v5 = vcombine.low %v3446_v60, %v3450_v62 }
 0x639   :  { %v7922_v20 = vpop.eup %7921  ;;  %6761 = vst [vmem:[#allocation20 + $0x18] sm:$0xff] %v7920_v32 }
 0x63a   :  { %v7924_v22 = vpop.eup %7923  ;;  %6766 = vst [vmem:[#allocation20 + $0x40] sm:$0xff] %v7922_v20  ;;  %6546 = vmatpush1.bf16.msra.mxu0 %v7599_v3 }
 0x63b   :  { %v7926_v23 = vpop.eup %7925  ;;  %6768 = vst [vmem:[#allocation20 + $0x50] sm:$0xff] %v7924_v22  ;;  %6718 = vmatpush1.bf16.msra.mxu1 %v7601_v6  ;;  %6547 = vmatprep.subr.bf16.mxu0 %v7608_v7 }
 0x63c   :  { %v7928_v27 = vpop.eup %7927  ;;  %6767 = vst [vmem:[#allocation20 + $0x48] sm:$0xff] %v7926_v23  ;;  %6719 = vmatprep.subr.bf16.mxu1 %v7610_v8 }
 0x63d   :  { %6769 = vst [vmem:[#allocation20 + $0x58] sm:$0xff] %v7928_v27 }
 0x63e   :  { %6548 = vmatpush1.bf16.msra.mxu0 %v7607_v45 }
 0x63f   :  { %6720 = vmatpush1.bf16.msra.mxu1 %v7609_v10  ;;  %6549 = vmatprep.subr.bf16.mxu0 %v7616_v24 }
 0x640   :  { %6721 = vmatprep.subr.bf16.mxu1 %v7618_v28 }
 0x642   :  { %6550 = vmatpush1.bf16.msra.mxu0 %v7615_v31 }
 0x643   :  { %6722 = vmatpush1.bf16.msra.mxu1 %v7617_v12  ;;  %6551 = vmatprep.subr.bf16.mxu0 %v7624_v34 }
 0x644   :  { %6723 = vmatprep.subr.bf16.mxu1 %v7626_v35 }
 0x646   :  { %6552 = vmatpush1.bf16.msra.mxu0 %v7623_v43 }
 0x647   :  { %6724 = vmatpush1.bf16.msra.mxu1 %v7625_v46  ;;  %6553 = vmatprep.subr.bf16.mxu0 %v7632_v42 }
 0x648   :  { %6725 = vmatprep.subr.bf16.mxu1 %v7634_v48 }
 0x64a   :  { %6554 = vmatpush1.bf16.msra.mxu0 %v7631_v25 }
 0x64b   :  { %6726 = vmatpush1.bf16.msra.mxu1 %v7633_v55  ;;  %6555 = vmatprep.subr.bf16.mxu0 %v7640_v59 }
 0x64c   :  { %6727 = vmatprep.subr.bf16.mxu1 %v7642_v57 }
 0x64e   :  { %6556 = vmatpush1.bf16.msra.mxu0 %v7639_v33 }
 0x64f   :  { %6728 = vmatpush1.bf16.msra.mxu1 %v7641_v63  ;;  %6557 = vmatprep.subr.bf16.mxu0 %v7648_v0 }
 0x650   :  { %6729 = vmatprep.subr.bf16.mxu1 %v7650_v1 }
 0x652   :  { %6558 = vmatpush1.bf16.msra.mxu0 %v7647_v5 }
 0x653   :  { %6730 = vmatpush1.bf16.msra.mxu1 %v7649_v9 }
 0x655   :  { %6560 = vmatmul.mubr.bf16.vlgmr.msra.gmra.mrb[20].mxu0 %v8627_v52 }
 0x656   :  { %6732 = vmatmul.mubr.bf16.vlgmr.msra.gmra.mrb[20].mxu1 %v8627_v52 }
 0x728   :  { %v6561_v49 = vpop.f32.mrb[20].mxu0 }
 0x729   :  { %v7692_v3 = vadd.f32 %v6561_v49, %v3473_v11  ;;  %v6733_v4 = vpop.f32.mrb[20].mxu1  ;;  %v6563_v52 = vpop.f32.mrb[21].mxu0 }
 0x72a   :  { %v7696_v6 = vadd.f32 %v6733_v4, %v3481_v15  ;;  %v7693_v7 = vadd.f32 %v6563_v52, %v3477_v17  ;;  %v6735_v32 = vpop.f32.mrb[21].mxu1  ;;  %v6565_v39 = vpop.f32.mrb[22].mxu0 }
 0x72b   :  { %7929 = vtanh.f32 %v7692_v3  ;;  %v7697_v8 = vadd.f32 %v6735_v32, %v3485_v2  ;;  %v7694_v18 = vadd.f32 %v6565_v39, %v3473_v11  ;;  %v6737_v40 = vpop.f32.mrb[22].mxu1  ;;  %v6567_v19 = vpop.f32.mrb[23].mxu0 }
 0x72c   :  { %7931 = vtanh.f32 %v7696_v6  ;;  %v7698_v20 = vadd.f32 %v6737_v40, %v3481_v15  ;;  %v6739_v41 = vpop.f32.mrb[23].mxu1  ;;  %v7695_v44 = vadd.f32 %v6567_v19, %v3477_v17 }
 0x72d   :  { %7933 = vtanh.f32 %v7693_v7  ;;  %v7699_v51 = vadd.f32 %v6739_v41, %v3485_v2 }
 0x72e   :  { %7935 = vtanh.f32 %v7697_v8 }
 0x72f   :  { %7937 = vtanh.f32 %v7694_v18 }
 0x730   :  { %7939 = vtanh.f32 %v7698_v20 }
 0x731   :  { %7941 = vtanh.f32 %v7695_v44 }
 0x732   :  { %7943 = vtanh.f32 %v7699_v51 }
 0x735   :  { %v7930_v13 = vpop.eup %7929 }
 0x736   :  { %v7932_v26 = vpop.eup %7931  ;;  %6762 = vst [vmem:[#allocation20 + $0x20] sm:$0xff] %v7930_v13 }
 0x737   :  { %v7934_v21 = vpop.eup %7933  ;;  %6764 = vst [vmem:[#allocation20 + $0x30] sm:$0xff] %v7932_v26 }
 0x738   :  { %v7936_v22 = vpop.eup %7935  ;;  %6763 = vst [vmem:[#allocation20 + $0x28] sm:$0xff] %v7934_v21 }
 0x739   :  { %v7938_v45 = vpop.eup %7937  ;;  %6765 = vst [vmem:[#allocation20 + $0x38] sm:$0xff] %v7936_v22 }
 0x73a   :  { %v7940_v23 = vpop.eup %7939  ;;  %6770 = vst [vmem:[#allocation20 + $0x60] sm:$0xff] %v7938_v45 }
 0x73b   :  { %v7942_v10 = vpop.eup %7941  ;;  %6772 = vst [vmem:[#allocation20 + $0x70] sm:$0xff] %v7940_v23 }
 0x73c   :  { %v7944_v24 = vpop.eup %7943  ;;  %6771 = vst [vmem:[#allocation20 + $0x68] sm:$0xff] %v7942_v10 }
 0x73d   :  { %6773 = vst [vmem:[#allocation20 + $0x78] sm:$0xff] %v7944_v24 }
 0x73e   :  { %8198 = shalt.err (!%p8195_p8)
}
 0x73f   :  { %s8199_s23 = scalar_lea.hbm %s8705_s11, 2048 }
 0x740   :  { %p8200_p9 = scmp.ne.s32.totalorder %s8705_s11, %s8199_s23  ;;  %p8203_p10 = scmp.lt.u32.totalorder %s8199_s23, %s8705_s11 }
 0x742   :  { %p8205_p11 = pnand %p8203_p10, %p8200_p9 }
 0x744   :  { %8208 = shalt.err (!%p8205_p11)
}
 0x745   :  { %s8246_s14 = smov 1024  }
 0x746   :  { %6785 = dma.vmem_to_hbm [thread:$0]  %s6780_s1, 2048, %s8705_s11, [#allocation4], %s8246_s14, %s8246_s14, %s8225_s29  }
 0x747   :  { %8221 = dma.done.wait [#allocation4], 2048  }
 0x748   :  { %8222 = vsyncadd [#allocation4], 4294965248 }
 0x749   :  { %6789 = vsyncpa [#allocation3], 1 }
 0x74a   :  { %6790 = vsyncpa [#allocation6], 1 }
 0x74b   :  { %6791 = vsyncpa [#allocation9], 1 }
 0x74c   :  { %6792 = vsyncpa [#allocation12], 1 }
 0x74d   :  { %6793 = vsyncpa [#allocation15], 1 }
 0x74e   :  { %6794 = vsyncpa [#allocation18], 1 }
 0x74f   :  { %6795 = vsyncpa [#allocation4], 1 }

</bundles_post_ra>
